<compile_context>
chip_gen: v5e
topology: v5e:2x2
jax: 0.10.0
libtpu: 0.0.40
codegen_flags: <defaults>
</compile_context>

<pallas_src>
import math
from functools import partial

import jax
import jax.numpy as jnp
from jax import lax
from jax.experimental import pallas as pl
from jax.experimental.pallas import tpu as pltpu


# ----------------------------------------------------------------------------
# Device-aware sizing helpers.
# ----------------------------------------------------------------------------
def _round_up(x, m):
    return ((x + m - 1) // m) * m


def _tpu_vmem_capacity_bytes():
    try:
        info = pltpu.get_tpu_info()
        cap = int(getattr(info, "vmem_capacity_bytes", 0))
        if cap > 0:
            return cap
    except Exception:
        pass
    return 64 << 20            # conservative fallback = v7x per-core VMEM


_VMEM_CAP = _tpu_vmem_capacity_bytes()
_VMEM_LIMIT = (_VMEM_CAP * 3) // 4        # explicit scoped-VMEM limit for every kernel
_CHUNK_BUDGET = _VMEM_CAP // 4            # budget for one streamed (double-buffered) operand


def _default_tn():
    # Halve the encoder batch tile on v7x (64 MiB VMEM) vs v5e/v6e (128 MiB).
    return 64 if _VMEM_CAP <= (64 << 20) else 128


# ----------------------------------------------------------------------------
# Encoder kernel: TN sequences per grid step.
#   DMA row-gather from the HBM embedding table -> masked CLS attention pooling
#   (VPU/XLU/EUP, f32) -> dense projection (MXU, bf16 operands / f32 acc) -> tanh.
# ----------------------------------------------------------------------------
def _encoder_kernel(idsf_ref, ids_ref, emb_hbm, w_ref, b_ref, o_ref, hbuf, sem):
    # idsf_ref: (N_pad*L,) int32  SMEM (scalar prefetch) - flat token ids (DMA indices)
    # ids_ref : (TN, L)    int32  VMEM block             - token ids (attention mask)
    # emb_hbm : (V, H)     f32    HBM (pl.ANY)           - embedding table (never in VMEM)
    # w_ref   : (H, H)     bf16   VMEM                   - output projection
    # b_ref   : (1, H)     f32    VMEM                   - output bias
    # o_ref   : (TN, H)    bf16   VMEM block             - CLS embeddings (lane-dense, H%128==0)
    # hbuf    : (TN*L, H)  f32    VMEM scratch           - gathered embedding rows
    # sem     : scalar DMA semaphore
    TN, L = ids_ref.shape
    H = o_ref.shape[1]
    base = pl.program_id(0) * (TN * L)

    # Row-gather the embedding table straight from HBM. All DMAs are issued before any
    # wait so the small row copies overlap each other (and the BlockSpec pipeline DMAs).
    copies = []
    for r in range(TN * L):
        idx = idsf_ref[base + r]
        cp = pltpu.make_async_copy(emb_hbm.at[pl.ds(idx, 1), :],
                                   hbuf.at[pl.ds(r, 1), :], sem)
        cp.start()
        copies.append(cp)
    for cp in copies:
        cp.wait()

    hb = hbuf[...].reshape(TN, L, H)                              # (TN, L, H) f32
    mask = ids_ref[...] != 0                                      # attention_mask = 1-(ids==0)

    # CLS (position 0) attends over the sequence (masked softmax, f32).
    q = hb[:, 0:1, :]                                             # (TN, 1, H)
    scores = jnp.sum(hb * q, axis=-1) * (1.0 / math.sqrt(H))      # (TN, L)
    scores = jnp.where(mask, scores, jnp.float32(-1e30))
    smax = jnp.max(scores, axis=-1, keepdims=True)
    p = jnp.exp(scores - smax)
    denom = jnp.sum(p, axis=-1, keepdims=True)
    p = p * pl.reciprocal(denom, approx=True)                     # EUP divide
    ctx = jnp.sum(hb * p[:, :, None], axis=1)                     # (TN, H) f32

    proj = jnp.dot(ctx.astype(jnp.bfloat16), w_ref[...],
                   preferred_element_type=jnp.float32)            # MXU, f32 acc
    o_ref[...] = jnp.tanh(proj + b_ref[...]).astype(o_ref.dtype)  # bf16 out


def encode(ids2d, enc_params, *, tn=None):
    """ids2d: (N, L) int32 -> (N, H) bfloat16 CLS embeddings."""
    N, L = ids2d.shape
    V, H = enc_params["emb"].shape

    if tn is None:
        tn = _default_tn()
    # tn must be a multiple of 8, no larger than the (8-padded) batch, and the statically
    # unrolled per-row DMA gather must stay bounded.
    # TODO(synk): for large L / tn, replace the unrolled gather with a double-buffered
    #             fori_loop over row-chunks to bound trace size.
    unroll_cap = max(8, (512 // max(L, 1)) // 8 * 8)
    tn = max(8, min(tn, _round_up(N, 8), unroll_cap))

    n_pad = _round_up(N, tn)
    if n_pad != N:
        ids2d = jnp.pad(ids2d, ((0, n_pad - N), (0, 0)))          # pad rows = all-PAD ids
    ids_flat = ids2d.reshape(-1)

    out = pl.pallas_call(
        _encoder_kernel,
        out_shape=jax.ShapeDtypeStruct((n_pad, H), jnp.bfloat16),
        grid_spec=pltpu.PrefetchScalarGridSpec(
            num_scalar_prefetch=1,
            grid=(n_pad // tn,),
            in_specs=[
                pl.BlockSpec((tn, L), lambda n, idsf: (n, 0)),
                pl.BlockSpec(memory_space=pl.ANY),                # table stays in HBM
                pl.BlockSpec((H, H), lambda n, idsf: (0, 0)),
                pl.BlockSpec((1, H), lambda n, idsf: (0, 0)),
            ],
            out_specs=pl.BlockSpec((tn, H), lambda n, idsf: (n, 0)),
            scratch_shapes=[pltpu.VMEM((tn * L, H), jnp.float32),
                            pltpu.SemaphoreType.DMA(())],
        ),
        compiler_params=pltpu.CompilerParams(
            dimension_semantics=("parallel",),
            vmem_limit_bytes=_VMEM_LIMIT),
    )(ids_flat, ids2d, enc_params["emb"], enc_params["w"], enc_params["b"])
    return out[:N]


# ----------------------------------------------------------------------------
# 3-D entity path: logits (B, B) via max over S + cross-entropy(labels=arange(B)).
# Entity axis is tiled in chunks of `gb` groups (gb % 8 == 0 or gb == B); the resident
# (B, B) output block is the running accumulator; CE is finalised at the last grid step.
# ----------------------------------------------------------------------------
def _pick_groups_per_chunk(B, S, H, budget_bytes):
    # bf16 entity block (2 B/elem), double-buffered by the BlockSpec pipeline (x2).
    cands = [g for g in range(1, B + 1) if B % g == 0 and (g == B or g % 8 == 0)]
    for g in sorted(cands, reverse=True):
        if g * S * H * 2 * 2 <= budget_bytes:
            return g
    return min(cands)


def _score3d_kernel(men_ref, ent_ref, lt_ref, loss_ref, *, B, S, gb):
    # men_ref: (B, H) bf16;  ent_ref: (gb*S, H) bf16
    # lt_ref:  (B, B) f32 accumulator with lt[b, m] = logits[m, b];  loss_ref: (1, 1) f32
    k = pl.program_id(0)

    @pl.when(k == 0)
    def _():
        loss_ref[...] = jnp.zeros_like(loss_ref)

    # scores_t[j, m] = <ent[j], men[m]>   (same orientation as torch's ent @ men.T)
    scores_t = lax.dot_general(ent_ref[...], men_ref[...], (((1,), (1,)), ((), ())),
                               preferred_element_type=jnp.float32)   # (gb*S, B) f32
    part_t = jnp.max(scores_t.reshape(gb, S, B), axis=1)             # (gb, B)

    if gb == B:                                                      # single chunk
        lt_ref[...] = part_t
    else:                                                            # gb % 8 == 0 guaranteed
        row = pl.multiple_of(k * gb, gb)
        lt_ref[pl.ds(row, gb), :] = part_t

    @pl.when(k == pl.num_programs(0) - 1)
    def _():
        lt = lt_ref[...]                                             # (B, B) f32
        # CrossEntropy(logits, arange(B)), mean reduction, on the transposed layout:
        #   lse_m = logsumexp_b logits[m, b]  -> column m of lt;  diag_m = lt[m, m].
        cmax = jnp.max(lt, axis=0, keepdims=True)                    # (1, B)
        lse = cmax + jnp.log(jnp.sum(jnp.exp(lt - cmax), axis=0, keepdims=True))
        r = lax.broadcasted_iota(jnp.int32, (B, B), 0)
        c = lax.broadcasted_iota(jnp.int32, (B, B), 1)
        diag = jnp.sum(jnp.where(r == c, lt, 0.0), axis=0, keepdims=True)   # (1, B)
        loss_ref[...] = jnp.sum(lse - diag, axis=1, keepdims=True) * (1.0 / B)


def score_3d(mention_emd, entity_emd, B, S):
    H = mention_emd.shape[1]
    gb = _pick_groups_per_chunk(B, S, H, _CHUNK_BUDGET)
    n_chunks = B // gb

    # TODO(synk): on v7x add a parallel mention-tile grid axis (partial CE per tile,
    #             summed outside) so both TensorCores are used.
    lt, loss = pl.pallas_call(
        partial(_score3d_kernel, B=B, S=S, gb=gb),
        out_shape=(jax.ShapeDtypeStruct((B, B), jnp.float32),
                   jax.ShapeDtypeStruct((1, 1), jnp.float32)),
        grid=(n_chunks,),
        in_specs=[pl.BlockSpec((B, H), lambda k: (0, 0)),
                  pl.BlockSpec((gb * S, H), lambda k: (k, 0))],
        out_specs=(pl.BlockSpec((B, B), lambda k: (0, 0)),
                   pl.BlockSpec((1, 1), lambda k: (0, 0))),
        compiler_params=pltpu.CompilerParams(
            dimension_semantics=("arbitrary",),
            vmem_limit_bytes=_VMEM_LIMIT),
    )(mention_emd, entity_emd)

    # lt is logits.T; transposing the tiny (B, B) slab here is layout plumbing only.
    return loss[0, 0], lt.T


# ----------------------------------------------------------------------------
# 4-D entity path: logits (B, C, S), loss = None.  The batch tile divides B (no
# full-tensor jnp.pad); batched mat-vec as a VPU multiply + lane reduction.
# ----------------------------------------------------------------------------
def _pick_batch_tile(B, CS, H, budget_bytes):
    # bf16 entity block (2 B/elem), double-buffered (x2).
    cands = [d for d in range(1, B + 1) if B % d == 0 and (d == B or d % 8 == 0)]
    for d in sorted(cands, reverse=True):
        if d * CS * H * 2 * 2 <= budget_bytes:
            return d
    return min(cands)


def _score4d_kernel(men_ref, ent_ref, out_ref):
    # men_ref: (TB, H) bf16;  ent_ref: (TB, CS, H) bf16;  out_ref: (TB, CS) f32
    men = men_ref[...].astype(jnp.float32)
    ent = ent_ref[...].astype(jnp.float32)
    out_ref[...] = jnp.sum(ent * men[:, None, :], axis=-1)


def score_4d(mention_emd, entity_emd, B, C, S):
    H = mention_emd.shape[1]
    CS = C * S
    ent3 = entity_emd.reshape(B, CS, H)         # free reshape, no padded copy of the big tensor
    tb = _pick_batch_tile(B, CS, H, _CHUNK_BUDGET)

    out = pl.pallas_call(
        _score4d_kernel,
        out_shape=jax.ShapeDtypeStruct((B, CS), jnp.float32),
        grid=(B // tb,),
        in_specs=[pl.BlockSpec((tb, H), lambda b: (b, 0)),
                  pl.BlockSpec((tb, CS, H), lambda b: (b, 0, 0))],
        out_specs=pl.BlockSpec((tb, CS), lambda b: (b, 0)),
        compiler_params=pltpu.CompilerParams(
            dimension_semantics=("parallel",),
            vmem_limit_bytes=_VMEM_LIMIT),
    )(mention_emd, ent3)
    return out.reshape(B, C, S)


# ----------------------------------------------------------------------------
# RetrievalModel.forward
# ----------------------------------------------------------------------------
def retrieval_forward(params, mention_ids=None, entity_ids=None):
    if mention_ids is None:
        return encode(entity_ids, params["entity_encoder"])
    if entity_ids is None:
        return encode(mention_ids, params["mention_encoder"])

    mention_emd = encode(mention_ids, params["mention_encoder"])

    if entity_ids.ndim == 3:
        B, S, L = entity_ids.shape
        entity_emd = encode(entity_ids.reshape(B * S, L), params["entity_encoder"])
        loss, logits = score_3d(mention_emd, entity_emd, B, S)
        return loss, logits
    else:
        B, C, S, L = entity_ids.shape
        entity_emd = encode(entity_ids.reshape(B * C * S, L), params["entity_encoder"])
        logits = score_4d(mention_emd, entity_emd, B, C, S)
        return None, logits


def init_encoder_params(key, vocab, hidden):
    k1, k2, k3 = jax.random.split(key, 3)
    return {
        # Embedding table lives in HBM (DMA row gather); f32 rows keep per-row DMAs
        # sublane-aligned.  Projection weight is bf16 (MXU operand); bias stays f32.
        "emb": jax.random.normal(k1, (vocab, hidden), jnp.float32) * 0.02,
        "w": (jax.random.normal(k2, (hidden, hidden), jnp.float32) / math.sqrt(hidden)
              ).astype(jnp.bfloat16),
        "b": jax.random.normal(k3, (1, hidden), jnp.float32) * 0.01,
    }


if __name__ == "__main__":
    V, H, L, B, S, C = 64, 128, 8, 2, 4, 3
    key = jax.random.PRNGKey(0)
    km, ke, k_mid, k_eid3, k_eid4 = jax.random.split(key, 5)

    params = {
        "mention_encoder": init_encoder_params(km, V, H),
        "entity_encoder": init_encoder_params(ke, V, H),
    }

    # id 0 is the PAD id (masked out of the attention pooling).
    mention_ids = jax.random.randint(k_mid, (B, L), 0, V, dtype=jnp.int32)
    entity_ids_3d = jax.random.randint(k_eid3, (B, S, L), 0, V, dtype=jnp.int32)
    entity_ids_4d = jax.random.randint(k_eid4, (B, C, S, L), 0, V, dtype=jnp.int32)

    # Training path (3-D entity ids): (loss, logits (B, B))
    loss, logits = retrieval_forward(params, mention_ids, entity_ids_3d)
    jax.block_until_ready((loss, logits))
    assert logits.shape == (B, B)
    assert bool(jnp.isfinite(loss)) and bool(jnp.isfinite(logits).all())

    # Inference path (4-D entity ids): (None, logits (B, C, S))
    loss4, logits4 = retrieval_forward(params, mention_ids, entity_ids_4d)
    jax.block_until_ready(logits4)
    assert loss4 is None and logits4.shape == (B, C, S)
    assert bool(jnp.isfinite(logits4).all())

    # Single-tower branches
    men_only = retrieval_forward(params, mention_ids=mention_ids, entity_ids=None)
    ent_only = retrieval_forward(params, mention_ids=None,
                                 entity_ids=entity_ids_3d.reshape(B * S, L))
    jax.block_until_ready((men_only, ent_only))
    assert men_only.shape == (B, H) and ent_only.shape == (B * S, H)

    print("KERNEL_OK")
</pallas_src>

<mosaic_0001>
module attributes {stable_mosaic.version = 11 : i64} {
  func.func @_encoder_kernel(%arg0: i32, %arg1: memref<64xi32, #tpu.memory_space<smem>>, %arg2: memref<8x8xi32, #tpu.memory_space<vmem>>, %arg3: memref<64x128xf32, #tpu.memory_space<any>>, %arg4: memref<128x128xbf16, #tpu.memory_space<vmem>>, %arg5: memref<1x128xf32, #tpu.memory_space<vmem>>, %arg6: memref<8x128xbf16, #tpu.memory_space<vmem>>, %arg7: memref<64x128xf32, #tpu.memory_space<vmem>>, %arg8: memref<!tpu.dma_semaphore, #tpu.memory_space<semaphore_mem>>) attributes {dimension_semantics = [#tpu.dimension_semantics<parallel>], iteration_bounds = array<i64: 1>, scalar_prefetch = 1 : i64, scratch_operands = 2 : i64, tpu.core_type = #tpu.core_type<tc>, window_params = [{transform_indices = @transform_0, window_bounds = array<i64: 8, 8>}, {}, {pipeline_mode = #tpu.pipeline_mode<synchronous>, transform_indices = @transform_2, window_bounds = array<i64: 128, 128>}, {pipeline_mode = #tpu.pipeline_mode<synchronous>, transform_indices = @transform_3, window_bounds = array<i64: 1, 128>}, {transform_indices = @transform_4, window_bounds = array<i64: 8, 128>}]} {
    %c64_i32 = arith.constant 64 : i32
    %0 = arith.muli %arg0, %c64_i32 : i32
    %c0_i32 = arith.constant 0 : i32
    %1 = arith.addi %0, %c0_i32 : i32
    %2 = arith.index_cast %1 : i32 to index
    %3 = memref.load %arg1[%2] : memref<64xi32, #tpu.memory_space<smem>>
    %c0_i32_0 = arith.constant 0 : i32
    %4 = tpu.memref_slice %arg3[%3, %c0_i32_0] : memref<64x128xf32, #tpu.memory_space<any>> -> memref<1x128xf32, #tpu.memory_space<any>>
    %c0_i32_1 = arith.constant 0 : i32
    %c0_i32_2 = arith.constant 0 : i32
    %5 = tpu.memref_slice %arg7[%c0_i32_1, %c0_i32_2] : memref<64x128xf32, #tpu.memory_space<vmem>> -> memref<1x128xf32, #tpu.memory_space<vmem>>
    tpu.enqueue_dma source(%4 : memref<1x128xf32, #tpu.memory_space<any>>) target(%5 : memref<1x128xf32, #tpu.memory_space<vmem>>) target_semaphore(%arg8 : memref<!tpu.dma_semaphore, #tpu.memory_space<semaphore_mem>>)
    %c1_i32 = arith.constant 1 : i32
    %6 = arith.addi %0, %c1_i32 : i32
    %7 = arith.index_cast %6 : i32 to index
    %8 = memref.load %arg1[%7] : memref<64xi32, #tpu.memory_space<smem>>
    %c0_i32_3 = arith.constant 0 : i32
    %9 = tpu.memref_slice %arg3[%8, %c0_i32_3] : memref<64x128xf32, #tpu.memory_space<any>> -> memref<1x128xf32, #tpu.memory_space<any>>
    %c1_i32_4 = arith.constant 1 : i32
    %c0_i32_5 = arith.constant 0 : i32
    %10 = tpu.memref_slice %arg7[%c1_i32_4, %c0_i32_5] : memref<64x128xf32, #tpu.memory_space<vmem>> -> memref<1x128xf32, #tpu.memory_space<vmem>>
    tpu.enqueue_dma source(%9 : memref<1x128xf32, #tpu.memory_space<any>>) target(%10 : memref<1x128xf32, #tpu.memory_space<vmem>>) target_semaphore(%arg8 : memref<!tpu.dma_semaphore, #tpu.memory_space<semaphore_mem>>)
    %c2_i32 = arith.constant 2 : i32
    %11 = arith.addi %0, %c2_i32 : i32
    %12 = arith.index_cast %11 : i32 to index
    %13 = memref.load %arg1[%12] : memref<64xi32, #tpu.memory_space<smem>>
    %c0_i32_6 = arith.constant 0 : i32
    %14 = tpu.memref_slice %arg3[%13, %c0_i32_6] : memref<64x128xf32, #tpu.memory_space<any>> -> memref<1x128xf32, #tpu.memory_space<any>>
    %c2_i32_7 = arith.constant 2 : i32
    %c0_i32_8 = arith.constant 0 : i32
    %15 = tpu.memref_slice %arg7[%c2_i32_7, %c0_i32_8] : memref<64x128xf32, #tpu.memory_space<vmem>> -> memref<1x128xf32, #tpu.memory_space<vmem>>
    tpu.enqueue_dma source(%14 : memref<1x128xf32, #tpu.memory_space<any>>) target(%15 : memref<1x128xf32, #tpu.memory_space<vmem>>) target_semaphore(%arg8 : memref<!tpu.dma_semaphore, #tpu.memory_space<semaphore_mem>>)
    %c3_i32 = arith.constant 3 : i32
    %16 = arith.addi %0, %c3_i32 : i32
    %17 = arith.index_cast %16 : i32 to index
    %18 = memref.load %arg1[%17] : memref<64xi32, #tpu.memory_space<smem>>
    %c0_i32_9 = arith.constant 0 : i32
    %19 = tpu.memref_slice %arg3[%18, %c0_i32_9] : memref<64x128xf32, #tpu.memory_space<any>> -> memref<1x128xf32, #tpu.memory_space<any>>
    %c3_i32_10 = arith.constant 3 : i32
    %c0_i32_11 = arith.constant 0 : i32
    %20 = tpu.memref_slice %arg7[%c3_i32_10, %c0_i32_11] : memref<64x128xf32, #tpu.memory_space<vmem>> -> memref<1x128xf32, #tpu.memory_space<vmem>>
    tpu.enqueue_dma source(%19 : memref<1x128xf32, #tpu.memory_space<any>>) target(%20 : memref<1x128xf32, #tpu.memory_space<vmem>>) target_semaphore(%arg8 : memref<!tpu.dma_semaphore, #tpu.memory_space<semaphore_mem>>)
    %c4_i32 = arith.constant 4 : i32
    %21 = arith.addi %0, %c4_i32 : i32
    %22 = arith.index_cast %21 : i32 to index
    %23 = memref.load %arg1[%22] : memref<64xi32, #tpu.memory_space<smem>>
    %c0_i32_12 = arith.constant 0 : i32
    %24 = tpu.memref_slice %arg3[%23, %c0_i32_12] : memref<64x128xf32, #tpu.memory_space<any>> -> memref<1x128xf32, #tpu.memory_space<any>>
    %c4_i32_13 = arith.constant 4 : i32
    %c0_i32_14 = arith.constant 0 : i32
    %25 = tpu.memref_slice %arg7[%c4_i32_13, %c0_i32_14] : memref<64x128xf32, #tpu.memory_space<vmem>> -> memref<1x128xf32, #tpu.memory_space<vmem>>
    tpu.enqueue_dma source(%24 : memref<1x128xf32, #tpu.memory_space<any>>) target(%25 : memref<1x128xf32, #tpu.memory_space<vmem>>) target_semaphore(%arg8 : memref<!tpu.dma_semaphore, #tpu.memory_space<semaphore_mem>>)
    %c5_i32 = arith.constant 5 : i32
    %26 = arith.addi %0, %c5_i32 : i32
    %27 = arith.index_cast %26 : i32 to index
    %28 = memref.load %arg1[%27] : memref<64xi32, #tpu.memory_space<smem>>
    %c0_i32_15 = arith.constant 0 : i32
    %29 = tpu.memref_slice %arg3[%28, %c0_i32_15] : memref<64x128xf32, #tpu.memory_space<any>> -> memref<1x128xf32, #tpu.memory_space<any>>
    %c5_i32_16 = arith.constant 5 : i32
    %c0_i32_17 = arith.constant 0 : i32
    %30 = tpu.memref_slice %arg7[%c5_i32_16, %c0_i32_17] : memref<64x128xf32, #tpu.memory_space<vmem>> -> memref<1x128xf32, #tpu.memory_space<vmem>>
    tpu.enqueue_dma source(%29 : memref<1x128xf32, #tpu.memory_space<any>>) target(%30 : memref<1x128xf32, #tpu.memory_space<vmem>>) target_semaphore(%arg8 : memref<!tpu.dma_semaphore, #tpu.memory_space<semaphore_mem>>)
    %c6_i32 = arith.constant 6 : i32
    %31 = arith.addi %0, %c6_i32 : i32
    %32 = arith.index_cast %31 : i32 to index
    %33 = memref.load %arg1[%32] : memref<64xi32, #tpu.memory_space<smem>>
    %c0_i32_18 = arith.constant 0 : i32
    %34 = tpu.memref_slice %arg3[%33, %c0_i32_18] : memref<64x128xf32, #tpu.memory_space<any>> -> memref<1x128xf32, #tpu.memory_space<any>>
    %c6_i32_19 = arith.constant 6 : i32
    %c0_i32_20 = arith.constant 0 : i32
    %35 = tpu.memref_slice %arg7[%c6_i32_19, %c0_i32_20] : memref<64x128xf32, #tpu.memory_space<vmem>> -> memref<1x128xf32, #tpu.memory_space<vmem>>
    tpu.enqueue_dma source(%34 : memref<1x128xf32, #tpu.memory_space<any>>) target(%35 : memref<1x128xf32, #tpu.memory_space<vmem>>) target_semaphore(%arg8 : memref<!tpu.dma_semaphore, #tpu.memory_space<semaphore_mem>>)
    %c7_i32 = arith.constant 7 : i32
    %36 = arith.addi %0, %c7_i32 : i32
    %37 = arith.index_cast %36 : i32 to index
    %38 = memref.load %arg1[%37] : memref<64xi32, #tpu.memory_space<smem>>
    %c0_i32_21 = arith.constant 0 : i32
    %39 = tpu.memref_slice %arg3[%38, %c0_i32_21] : memref<64x128xf32, #tpu.memory_space<any>> -> memref<1x128xf32, #tpu.memory_space<any>>
    %c7_i32_22 = arith.constant 7 : i32
    %c0_i32_23 = arith.constant 0 : i32
    %40 = tpu.memref_slice %arg7[%c7_i32_22, %c0_i32_23] : memref<64x128xf32, #tpu.memory_space<vmem>> -> memref<1x128xf32, #tpu.memory_space<vmem>>
    tpu.enqueue_dma source(%39 : memref<1x128xf32, #tpu.memory_space<any>>) target(%40 : memref<1x128xf32, #tpu.memory_space<vmem>>) target_semaphore(%arg8 : memref<!tpu.dma_semaphore, #tpu.memory_space<semaphore_mem>>)
    %c8_i32 = arith.constant 8 : i32
    %41 = arith.addi %0, %c8_i32 : i32
    %42 = arith.index_cast %41 : i32 to index
    %43 = memref.load %arg1[%42] : memref<64xi32, #tpu.memory_space<smem>>
    %c0_i32_24 = arith.constant 0 : i32
    %44 = tpu.memref_slice %arg3[%43, %c0_i32_24] : memref<64x128xf32, #tpu.memory_space<any>> -> memref<1x128xf32, #tpu.memory_space<any>>
    %c8_i32_25 = arith.constant 8 : i32
    %c0_i32_26 = arith.constant 0 : i32
    %45 = tpu.memref_slice %arg7[%c8_i32_25, %c0_i32_26] : memref<64x128xf32, #tpu.memory_space<vmem>> -> memref<1x128xf32, #tpu.memory_space<vmem>>
    tpu.enqueue_dma source(%44 : memref<1x128xf32, #tpu.memory_space<any>>) target(%45 : memref<1x128xf32, #tpu.memory_space<vmem>>) target_semaphore(%arg8 : memref<!tpu.dma_semaphore, #tpu.memory_space<semaphore_mem>>)
    %c9_i32 = arith.constant 9 : i32
    %46 = arith.addi %0, %c9_i32 : i32
    %47 = arith.index_cast %46 : i32 to index
    %48 = memref.load %arg1[%47] : memref<64xi32, #tpu.memory_space<smem>>
    %c0_i32_27 = arith.constant 0 : i32
    %49 = tpu.memref_slice %arg3[%48, %c0_i32_27] : memref<64x128xf32, #tpu.memory_space<any>> -> memref<1x128xf32, #tpu.memory_space<any>>
    %c9_i32_28 = arith.constant 9 : i32
    %c0_i32_29 = arith.constant 0 : i32
    %50 = tpu.memref_slice %arg7[%c9_i32_28, %c0_i32_29] : memref<64x128xf32, #tpu.memory_space<vmem>> -> memref<1x128xf32, #tpu.memory_space<vmem>>
    tpu.enqueue_dma source(%49 : memref<1x128xf32, #tpu.memory_space<any>>) target(%50 : memref<1x128xf32, #tpu.memory_space<vmem>>) target_semaphore(%arg8 : memref<!tpu.dma_semaphore, #tpu.memory_space<semaphore_mem>>)
    %c10_i32 = arith.constant 10 : i32
    %51 = arith.addi %0, %c10_i32 : i32
    %52 = arith.index_cast %51 : i32 to index
    %53 = memref.load %arg1[%52] : memref<64xi32, #tpu.memory_space<smem>>
    %c0_i32_30 = arith.constant 0 : i32
    %54 = tpu.memref_slice %arg3[%53, %c0_i32_30] : memref<64x128xf32, #tpu.memory_space<any>> -> memref<1x128xf32, #tpu.memory_space<any>>
    %c10_i32_31 = arith.constant 10 : i32
    %c0_i32_32 = arith.constant 0 : i32
    %55 = tpu.memref_slice %arg7[%c10_i32_31, %c0_i32_32] : memref<64x128xf32, #tpu.memory_space<vmem>> -> memref<1x128xf32, #tpu.memory_space<vmem>>
    tpu.enqueue_dma source(%54 : memref<1x128xf32, #tpu.memory_space<any>>) target(%55 : memref<1x128xf32, #tpu.memory_space<vmem>>) target_semaphore(%arg8 : memref<!tpu.dma_semaphore, #tpu.memory_space<semaphore_mem>>)
    %c11_i32 = arith.constant 11 : i32
    %56 = arith.addi %0, %c11_i32 : i32
    %57 = arith.index_cast %56 : i32 to index
    %58 = memref.load %arg1[%57] : memref<64xi32, #tpu.memory_space<smem>>
    %c0_i32_33 = arith.constant 0 : i32
    %59 = tpu.memref_slice %arg3[%58, %c0_i32_33] : memref<64x128xf32, #tpu.memory_space<any>> -> memref<1x128xf32, #tpu.memory_space<any>>
    %c11_i32_34 = arith.constant 11 : i32
    %c0_i32_35 = arith.constant 0 : i32
    %60 = tpu.memref_slice %arg7[%c11_i32_34, %c0_i32_35] : memref<64x128xf32, #tpu.memory_space<vmem>> -> memref<1x128xf32, #tpu.memory_space<vmem>>
    tpu.enqueue_dma source(%59 : memref<1x128xf32, #tpu.memory_space<any>>) target(%60 : memref<1x128xf32, #tpu.memory_space<vmem>>) target_semaphore(%arg8 : memref<!tpu.dma_semaphore, #tpu.memory_space<semaphore_mem>>)
    %c12_i32 = arith.constant 12 : i32
    %61 = arith.addi %0, %c12_i32 : i32
    %62 = arith.index_cast %61 : i32 to index
    %63 = memref.load %arg1[%62] : memref<64xi32, #tpu.memory_space<smem>>
    %c0_i32_36 = arith.constant 0 : i32
    %64 = tpu.memref_slice %arg3[%63, %c0_i32_36] : memref<64x128xf32, #tpu.memory_space<any>> -> memref<1x128xf32, #tpu.memory_space<any>>
    %c12_i32_37 = arith.constant 12 : i32
    %c0_i32_38 = arith.constant 0 : i32
    %65 = tpu.memref_slice %arg7[%c12_i32_37, %c0_i32_38] : memref<64x128xf32, #tpu.memory_space<vmem>> -> memref<1x128xf32, #tpu.memory_space<vmem>>
    tpu.enqueue_dma source(%64 : memref<1x128xf32, #tpu.memory_space<any>>) target(%65 : memref<1x128xf32, #tpu.memory_space<vmem>>) target_semaphore(%arg8 : memref<!tpu.dma_semaphore, #tpu.memory_space<semaphore_mem>>)
    %c13_i32 = arith.constant 13 : i32
    %66 = arith.addi %0, %c13_i32 : i32
    %67 = arith.index_cast %66 : i32 to index
    %68 = memref.load %arg1[%67] : memref<64xi32, #tpu.memory_space<smem>>
    %c0_i32_39 = arith.constant 0 : i32
    %69 = tpu.memref_slice %arg3[%68, %c0_i32_39] : memref<64x128xf32, #tpu.memory_space<any>> -> memref<1x128xf32, #tpu.memory_space<any>>
    %c13_i32_40 = arith.constant 13 : i32
    %c0_i32_41 = arith.constant 0 : i32
    %70 = tpu.memref_slice %arg7[%c13_i32_40, %c0_i32_41] : memref<64x128xf32, #tpu.memory_space<vmem>> -> memref<1x128xf32, #tpu.memory_space<vmem>>
    tpu.enqueue_dma source(%69 : memref<1x128xf32, #tpu.memory_space<any>>) target(%70 : memref<1x128xf32, #tpu.memory_space<vmem>>) target_semaphore(%arg8 : memref<!tpu.dma_semaphore, #tpu.memory_space<semaphore_mem>>)
    %c14_i32 = arith.constant 14 : i32
    %71 = arith.addi %0, %c14_i32 : i32
    %72 = arith.index_cast %71 : i32 to index
    %73 = memref.load %arg1[%72] : memref<64xi32, #tpu.memory_space<smem>>
    %c0_i32_42 = arith.constant 0 : i32
    %74 = tpu.memref_slice %arg3[%73, %c0_i32_42] : memref<64x128xf32, #tpu.memory_space<any>> -> memref<1x128xf32, #tpu.memory_space<any>>
    %c14_i32_43 = arith.constant 14 : i32
    %c0_i32_44 = arith.constant 0 : i32
    %75 = tpu.memref_slice %arg7[%c14_i32_43, %c0_i32_44] : memref<64x128xf32, #tpu.memory_space<vmem>> -> memref<1x128xf32, #tpu.memory_space<vmem>>
    tpu.enqueue_dma source(%74 : memref<1x128xf32, #tpu.memory_space<any>>) target(%75 : memref<1x128xf32, #tpu.memory_space<vmem>>) target_semaphore(%arg8 : memref<!tpu.dma_semaphore, #tpu.memory_space<semaphore_mem>>)
    %c15_i32 = arith.constant 15 : i32
    %76 = arith.addi %0, %c15_i32 : i32
    %77 = arith.index_cast %76 : i32 to index
    %78 = memref.load %arg1[%77] : memref<64xi32, #tpu.memory_space<smem>>
    %c0_i32_45 = arith.constant 0 : i32
    %79 = tpu.memref_slice %arg3[%78, %c0_i32_45] : memref<64x128xf32, #tpu.memory_space<any>> -> memref<1x128xf32, #tpu.memory_space<any>>
    %c15_i32_46 = arith.constant 15 : i32
    %c0_i32_47 = arith.constant 0 : i32
    %80 = tpu.memref_slice %arg7[%c15_i32_46, %c0_i32_47] : memref<64x128xf32, #tpu.memory_space<vmem>> -> memref<1x128xf32, #tpu.memory_space<vmem>>
    tpu.enqueue_dma source(%79 : memref<1x128xf32, #tpu.memory_space<any>>) target(%80 : memref<1x128xf32, #tpu.memory_space<vmem>>) target_semaphore(%arg8 : memref<!tpu.dma_semaphore, #tpu.memory_space<semaphore_mem>>)
    %c16_i32 = arith.constant 16 : i32
    %81 = arith.addi %0, %c16_i32 : i32
    %82 = arith.index_cast %81 : i32 to index
    %83 = memref.load %arg1[%82] : memref<64xi32, #tpu.memory_space<smem>>
    %c0_i32_48 = arith.constant 0 : i32
    %84 = tpu.memref_slice %arg3[%83, %c0_i32_48] : memref<64x128xf32, #tpu.memory_space<any>> -> memref<1x128xf32, #tpu.memory_space<any>>
    %c16_i32_49 = arith.constant 16 : i32
    %c0_i32_50 = arith.constant 0 : i32
    %85 = tpu.memref_slice %arg7[%c16_i32_49, %c0_i32_50] : memref<64x128xf32, #tpu.memory_space<vmem>> -> memref<1x128xf32, #tpu.memory_space<vmem>>
    tpu.enqueue_dma source(%84 : memref<1x128xf32, #tpu.memory_space<any>>) target(%85 : memref<1x128xf32, #tpu.memory_space<vmem>>) target_semaphore(%arg8 : memref<!tpu.dma_semaphore, #tpu.memory_space<semaphore_mem>>)
    %c17_i32 = arith.constant 17 : i32
    %86 = arith.addi %0, %c17_i32 : i32
    %87 = arith.index_cast %86 : i32 to index
    %88 = memref.load %arg1[%87] : memref<64xi32, #tpu.memory_space<smem>>
    %c0_i32_51 = arith.constant 0 : i32
    %89 = tpu.memref_slice %arg3[%88, %c0_i32_51] : memref<64x128xf32, #tpu.memory_space<any>> -> memref<1x128xf32, #tpu.memory_space<any>>
    %c17_i32_52 = arith.constant 17 : i32
    %c0_i32_53 = arith.constant 0 : i32
    %90 = tpu.memref_slice %arg7[%c17_i32_52, %c0_i32_53] : memref<64x128xf32, #tpu.memory_space<vmem>> -> memref<1x128xf32, #tpu.memory_space<vmem>>
    tpu.enqueue_dma source(%89 : memref<1x128xf32, #tpu.memory_space<any>>) target(%90 : memref<1x128xf32, #tpu.memory_space<vmem>>) target_semaphore(%arg8 : memref<!tpu.dma_semaphore, #tpu.memory_space<semaphore_mem>>)
    %c18_i32 = arith.constant 18 : i32
    %91 = arith.addi %0, %c18_i32 : i32
    %92 = arith.index_cast %91 : i32 to index
    %93 = memref.load %arg1[%92] : memref<64xi32, #tpu.memory_space<smem>>
    %c0_i32_54 = arith.constant 0 : i32
    %94 = tpu.memref_slice %arg3[%93, %c0_i32_54] : memref<64x128xf32, #tpu.memory_space<any>> -> memref<1x128xf32, #tpu.memory_space<any>>
    %c18_i32_55 = arith.constant 18 : i32
    %c0_i32_56 = arith.constant 0 : i32
    %95 = tpu.memref_slice %arg7[%c18_i32_55, %c0_i32_56] : memref<64x128xf32, #tpu.memory_space<vmem>> -> memref<1x128xf32, #tpu.memory_space<vmem>>
    tpu.enqueue_dma source(%94 : memref<1x128xf32, #tpu.memory_space<any>>) target(%95 : memref<1x128xf32, #tpu.memory_space<vmem>>) target_semaphore(%arg8 : memref<!tpu.dma_semaphore, #tpu.memory_space<semaphore_mem>>)
    %c19_i32 = arith.constant 19 : i32
    %96 = arith.addi %0, %c19_i32 : i32
    %97 = arith.index_cast %96 : i32 to index
    %98 = memref.load %arg1[%97] : memref<64xi32, #tpu.memory_space<smem>>
    %c0_i32_57 = arith.constant 0 : i32
    %99 = tpu.memref_slice %arg3[%98, %c0_i32_57] : memref<64x128xf32, #tpu.memory_space<any>> -> memref<1x128xf32, #tpu.memory_space<any>>
    %c19_i32_58 = arith.constant 19 : i32
    %c0_i32_59 = arith.constant 0 : i32
    %100 = tpu.memref_slice %arg7[%c19_i32_58, %c0_i32_59] : memref<64x128xf32, #tpu.memory_space<vmem>> -> memref<1x128xf32, #tpu.memory_space<vmem>>
    tpu.enqueue_dma source(%99 : memref<1x128xf32, #tpu.memory_space<any>>) target(%100 : memref<1x128xf32, #tpu.memory_space<vmem>>) target_semaphore(%arg8 : memref<!tpu.dma_semaphore, #tpu.memory_space<semaphore_mem>>)
    %c20_i32 = arith.constant 20 : i32
    %101 = arith.addi %0, %c20_i32 : i32
    %102 = arith.index_cast %101 : i32 to index
    %103 = memref.load %arg1[%102] : memref<64xi32, #tpu.memory_space<smem>>
    %c0_i32_60 = arith.constant 0 : i32
    %104 = tpu.memref_slice %arg3[%103, %c0_i32_60] : memref<64x128xf32, #tpu.memory_space<any>> -> memref<1x128xf32, #tpu.memory_space<any>>
    %c20_i32_61 = arith.constant 20 : i32
    %c0_i32_62 = arith.constant 0 : i32
    %105 = tpu.memref_slice %arg7[%c20_i32_61, %c0_i32_62] : memref<64x128xf32, #tpu.memory_space<vmem>> -> memref<1x128xf32, #tpu.memory_space<vmem>>
    tpu.enqueue_dma source(%104 : memref<1x128xf32, #tpu.memory_space<any>>) target(%105 : memref<1x128xf32, #tpu.memory_space<vmem>>) target_semaphore(%arg8 : memref<!tpu.dma_semaphore, #tpu.memory_space<semaphore_mem>>)
    %c21_i32 = arith.constant 21 : i32
    %106 = arith.addi %0, %c21_i32 : i32
    %107 = arith.index_cast %106 : i32 to index
    %108 = memref.load %arg1[%107] : memref<64xi32, #tpu.memory_space<smem>>
    %c0_i32_63 = arith.constant 0 : i32
    %109 = tpu.memref_slice %arg3[%108, %c0_i32_63] : memref<64x128xf32, #tpu.memory_space<any>> -> memref<1x128xf32, #tpu.memory_space<any>>
    %c21_i32_64 = arith.constant 21 : i32
    %c0_i32_65 = arith.constant 0 : i32
    %110 = tpu.memref_slice %arg7[%c21_i32_64, %c0_i32_65] : memref<64x128xf32, #tpu.memory_space<vmem>> -> memref<1x128xf32, #tpu.memory_space<vmem>>
    tpu.enqueue_dma source(%109 : memref<1x128xf32, #tpu.memory_space<any>>) target(%110 : memref<1x128xf32, #tpu.memory_space<vmem>>) target_semaphore(%arg8 : memref<!tpu.dma_semaphore, #tpu.memory_space<semaphore_mem>>)
    %c22_i32 = arith.constant 22 : i32
    %111 = arith.addi %0, %c22_i32 : i32
    %112 = arith.index_cast %111 : i32 to index
    %113 = memref.load %arg1[%112] : memref<64xi32, #tpu.memory_space<smem>>
    %c0_i32_66 = arith.constant 0 : i32
    %114 = tpu.memref_slice %arg3[%113, %c0_i32_66] : memref<64x128xf32, #tpu.memory_space<any>> -> memref<1x128xf32, #tpu.memory_space<any>>
    %c22_i32_67 = arith.constant 22 : i32
    %c0_i32_68 = arith.constant 0 : i32
    %115 = tpu.memref_slice %arg7[%c22_i32_67, %c0_i32_68] : memref<64x128xf32, #tpu.memory_space<vmem>> -> memref<1x128xf32, #tpu.memory_space<vmem>>
    tpu.enqueue_dma source(%114 : memref<1x128xf32, #tpu.memory_space<any>>) target(%115 : memref<1x128xf32, #tpu.memory_space<vmem>>) target_semaphore(%arg8 : memref<!tpu.dma_semaphore, #tpu.memory_space<semaphore_mem>>)
    %c23_i32 = arith.constant 23 : i32
    %116 = arith.addi %0, %c23_i32 : i32
    %117 = arith.index_cast %116 : i32 to index
    %118 = memref.load %arg1[%117] : memref<64xi32, #tpu.memory_space<smem>>
    %c0_i32_69 = arith.constant 0 : i32
    %119 = tpu.memref_slice %arg3[%118, %c0_i32_69] : memref<64x128xf32, #tpu.memory_space<any>> -> memref<1x128xf32, #tpu.memory_space<any>>
    %c23_i32_70 = arith.constant 23 : i32
    %c0_i32_71 = arith.constant 0 : i32
    %120 = tpu.memref_slice %arg7[%c23_i32_70, %c0_i32_71] : memref<64x128xf32, #tpu.memory_space<vmem>> -> memref<1x128xf32, #tpu.memory_space<vmem>>
    tpu.enqueue_dma source(%119 : memref<1x128xf32, #tpu.memory_space<any>>) target(%120 : memref<1x128xf32, #tpu.memory_space<vmem>>) target_semaphore(%arg8 : memref<!tpu.dma_semaphore, #tpu.memory_space<semaphore_mem>>)
    %c24_i32 = arith.constant 24 : i32
    %121 = arith.addi %0, %c24_i32 : i32
    %122 = arith.index_cast %121 : i32 to index
    %123 = memref.load %arg1[%122] : memref<64xi32, #tpu.memory_space<smem>>
    %c0_i32_72 = arith.constant 0 : i32
    %124 = tpu.memref_slice %arg3[%123, %c0_i32_72] : memref<64x128xf32, #tpu.memory_space<any>> -> memref<1x128xf32, #tpu.memory_space<any>>
    %c24_i32_73 = arith.constant 24 : i32
    %c0_i32_74 = arith.constant 0 : i32
    %125 = tpu.memref_slice %arg7[%c24_i32_73, %c0_i32_74] : memref<64x128xf32, #tpu.memory_space<vmem>> -> memref<1x128xf32, #tpu.memory_space<vmem>>
    tpu.enqueue_dma source(%124 : memref<1x128xf32, #tpu.memory_space<any>>) target(%125 : memref<1x128xf32, #tpu.memory_space<vmem>>) target_semaphore(%arg8 : memref<!tpu.dma_semaphore, #tpu.memory_space<semaphore_mem>>)
    %c25_i32 = arith.constant 25 : i32
    %126 = arith.addi %0, %c25_i32 : i32
    %127 = arith.index_cast %126 : i32 to index
    %128 = memref.load %arg1[%127] : memref<64xi32, #tpu.memory_space<smem>>
    %c0_i32_75 = arith.constant 0 : i32
    %129 = tpu.memref_slice %arg3[%128, %c0_i32_75] : memref<64x128xf32, #tpu.memory_space<any>> -> memref<1x128xf32, #tpu.memory_space<any>>
    %c25_i32_76 = arith.constant 25 : i32
    %c0_i32_77 = arith.constant 0 : i32
    %130 = tpu.memref_slice %arg7[%c25_i32_76, %c0_i32_77] : memref<64x128xf32, #tpu.memory_space<vmem>> -> memref<1x128xf32, #tpu.memory_space<vmem>>
    tpu.enqueue_dma source(%129 : memref<1x128xf32, #tpu.memory_space<any>>) target(%130 : memref<1x128xf32, #tpu.memory_space<vmem>>) target_semaphore(%arg8 : memref<!tpu.dma_semaphore, #tpu.memory_space<semaphore_mem>>)
    %c26_i32 = arith.constant 26 : i32
    %131 = arith.addi %0, %c26_i32 : i32
    %132 = arith.index_cast %131 : i32 to index
    %133 = memref.load %arg1[%132] : memref<64xi32, #tpu.memory_space<smem>>
    %c0_i32_78 = arith.constant 0 : i32
    %134 = tpu.memref_slice %arg3[%133, %c0_i32_78] : memref<64x128xf32, #tpu.memory_space<any>> -> memref<1x128xf32, #tpu.memory_space<any>>
    %c26_i32_79 = arith.constant 26 : i32
    %c0_i32_80 = arith.constant 0 : i32
    %135 = tpu.memref_slice %arg7[%c26_i32_79, %c0_i32_80] : memref<64x128xf32, #tpu.memory_space<vmem>> -> memref<1x128xf32, #tpu.memory_space<vmem>>
    tpu.enqueue_dma source(%134 : memref<1x128xf32, #tpu.memory_space<any>>) target(%135 : memref<1x128xf32, #tpu.memory_space<vmem>>) target_semaphore(%arg8 : memref<!tpu.dma_semaphore, #tpu.memory_space<semaphore_mem>>)
    %c27_i32 = arith.constant 27 : i32
    %136 = arith.addi %0, %c27_i32 : i32
    %137 = arith.index_cast %136 : i32 to index
    %138 = memref.load %arg1[%137] : memref<64xi32, #tpu.memory_space<smem>>
    %c0_i32_81 = arith.constant 0 : i32
    %139 = tpu.memref_slice %arg3[%138, %c0_i32_81] : memref<64x128xf32, #tpu.memory_space<any>> -> memref<1x128xf32, #tpu.memory_space<any>>
    %c27_i32_82 = arith.constant 27 : i32
    %c0_i32_83 = arith.constant 0 : i32
    %140 = tpu.memref_slice %arg7[%c27_i32_82, %c0_i32_83] : memref<64x128xf32, #tpu.memory_space<vmem>> -> memref<1x128xf32, #tpu.memory_space<vmem>>
    tpu.enqueue_dma source(%139 : memref<1x128xf32, #tpu.memory_space<any>>) target(%140 : memref<1x128xf32, #tpu.memory_space<vmem>>) target_semaphore(%arg8 : memref<!tpu.dma_semaphore, #tpu.memory_space<semaphore_mem>>)
    %c28_i32 = arith.constant 28 : i32
    %141 = arith.addi %0, %c28_i32 : i32
    %142 = arith.index_cast %141 : i32 to index
    %143 = memref.load %arg1[%142] : memref<64xi32, #tpu.memory_space<smem>>
    %c0_i32_84 = arith.constant 0 : i32
    %144 = tpu.memref_slice %arg3[%143, %c0_i32_84] : memref<64x128xf32, #tpu.memory_space<any>> -> memref<1x128xf32, #tpu.memory_space<any>>
    %c28_i32_85 = arith.constant 28 : i32
    %c0_i32_86 = arith.constant 0 : i32
    %145 = tpu.memref_slice %arg7[%c28_i32_85, %c0_i32_86] : memref<64x128xf32, #tpu.memory_space<vmem>> -> memref<1x128xf32, #tpu.memory_space<vmem>>
    tpu.enqueue_dma source(%144 : memref<1x128xf32, #tpu.memory_space<any>>) target(%145 : memref<1x128xf32, #tpu.memory_space<vmem>>) target_semaphore(%arg8 : memref<!tpu.dma_semaphore, #tpu.memory_space<semaphore_mem>>)
    %c29_i32 = arith.constant 29 : i32
    %146 = arith.addi %0, %c29_i32 : i32
    %147 = arith.index_cast %146 : i32 to index
    %148 = memref.load %arg1[%147] : memref<64xi32, #tpu.memory_space<smem>>
    %c0_i32_87 = arith.constant 0 : i32
    %149 = tpu.memref_slice %arg3[%148, %c0_i32_87] : memref<64x128xf32, #tpu.memory_space<any>> -> memref<1x128xf32, #tpu.memory_space<any>>
    %c29_i32_88 = arith.constant 29 : i32
    %c0_i32_89 = arith.constant 0 : i32
    %150 = tpu.memref_slice %arg7[%c29_i32_88, %c0_i32_89] : memref<64x128xf32, #tpu.memory_space<vmem>> -> memref<1x128xf32, #tpu.memory_space<vmem>>
    tpu.enqueue_dma source(%149 : memref<1x128xf32, #tpu.memory_space<any>>) target(%150 : memref<1x128xf32, #tpu.memory_space<vmem>>) target_semaphore(%arg8 : memref<!tpu.dma_semaphore, #tpu.memory_space<semaphore_mem>>)
    %c30_i32 = arith.constant 30 : i32
    %151 = arith.addi %0, %c30_i32 : i32
    %152 = arith.index_cast %151 : i32 to index
    %153 = memref.load %arg1[%152] : memref<64xi32, #tpu.memory_space<smem>>
    %c0_i32_90 = arith.constant 0 : i32
    %154 = tpu.memref_slice %arg3[%153, %c0_i32_90] : memref<64x128xf32, #tpu.memory_space<any>> -> memref<1x128xf32, #tpu.memory_space<any>>
    %c30_i32_91 = arith.constant 30 : i32
    %c0_i32_92 = arith.constant 0 : i32
    %155 = tpu.memref_slice %arg7[%c30_i32_91, %c0_i32_92] : memref<64x128xf32, #tpu.memory_space<vmem>> -> memref<1x128xf32, #tpu.memory_space<vmem>>
    tpu.enqueue_dma source(%154 : memref<1x128xf32, #tpu.memory_space<any>>) target(%155 : memref<1x128xf32, #tpu.memory_space<vmem>>) target_semaphore(%arg8 : memref<!tpu.dma_semaphore, #tpu.memory_space<semaphore_mem>>)
    %c31_i32 = arith.constant 31 : i32
    %156 = arith.addi %0, %c31_i32 : i32
    %157 = arith.index_cast %156 : i32 to index
    %158 = memref.load %arg1[%157] : memref<64xi32, #tpu.memory_space<smem>>
    %c0_i32_93 = arith.constant 0 : i32
    %159 = tpu.memref_slice %arg3[%158, %c0_i32_93] : memref<64x128xf32, #tpu.memory_space<any>> -> memref<1x128xf32, #tpu.memory_space<any>>
    %c31_i32_94 = arith.constant 31 : i32
    %c0_i32_95 = arith.constant 0 : i32
    %160 = tpu.memref_slice %arg7[%c31_i32_94, %c0_i32_95] : memref<64x128xf32, #tpu.memory_space<vmem>> -> memref<1x128xf32, #tpu.memory_space<vmem>>
    tpu.enqueue_dma source(%159 : memref<1x128xf32, #tpu.memory_space<any>>) target(%160 : memref<1x128xf32, #tpu.memory_space<vmem>>) target_semaphore(%arg8 : memref<!tpu.dma_semaphore, #tpu.memory_space<semaphore_mem>>)
    %c32_i32 = arith.constant 32 : i32
    %161 = arith.addi %0, %c32_i32 : i32
    %162 = arith.index_cast %161 : i32 to index
    %163 = memref.load %arg1[%162] : memref<64xi32, #tpu.memory_space<smem>>
    %c0_i32_96 = arith.constant 0 : i32
    %164 = tpu.memref_slice %arg3[%163, %c0_i32_96] : memref<64x128xf32, #tpu.memory_space<any>> -> memref<1x128xf32, #tpu.memory_space<any>>
    %c32_i32_97 = arith.constant 32 : i32
    %c0_i32_98 = arith.constant 0 : i32
    %165 = tpu.memref_slice %arg7[%c32_i32_97, %c0_i32_98] : memref<64x128xf32, #tpu.memory_space<vmem>> -> memref<1x128xf32, #tpu.memory_space<vmem>>
    tpu.enqueue_dma source(%164 : memref<1x128xf32, #tpu.memory_space<any>>) target(%165 : memref<1x128xf32, #tpu.memory_space<vmem>>) target_semaphore(%arg8 : memref<!tpu.dma_semaphore, #tpu.memory_space<semaphore_mem>>)
    %c33_i32 = arith.constant 33 : i32
    %166 = arith.addi %0, %c33_i32 : i32
    %167 = arith.index_cast %166 : i32 to index
    %168 = memref.load %arg1[%167] : memref<64xi32, #tpu.memory_space<smem>>
    %c0_i32_99 = arith.constant 0 : i32
    %169 = tpu.memref_slice %arg3[%168, %c0_i32_99] : memref<64x128xf32, #tpu.memory_space<any>> -> memref<1x128xf32, #tpu.memory_space<any>>
    %c33_i32_100 = arith.constant 33 : i32
    %c0_i32_101 = arith.constant 0 : i32
    %170 = tpu.memref_slice %arg7[%c33_i32_100, %c0_i32_101] : memref<64x128xf32, #tpu.memory_space<vmem>> -> memref<1x128xf32, #tpu.memory_space<vmem>>
    tpu.enqueue_dma source(%169 : memref<1x128xf32, #tpu.memory_space<any>>) target(%170 : memref<1x128xf32, #tpu.memory_space<vmem>>) target_semaphore(%arg8 : memref<!tpu.dma_semaphore, #tpu.memory_space<semaphore_mem>>)
    %c34_i32 = arith.constant 34 : i32
    %171 = arith.addi %0, %c34_i32 : i32
    %172 = arith.index_cast %171 : i32 to index
    %173 = memref.load %arg1[%172] : memref<64xi32, #tpu.memory_space<smem>>
    %c0_i32_102 = arith.constant 0 : i32
    %174 = tpu.memref_slice %arg3[%173, %c0_i32_102] : memref<64x128xf32, #tpu.memory_space<any>> -> memref<1x128xf32, #tpu.memory_space<any>>
    %c34_i32_103 = arith.constant 34 : i32
    %c0_i32_104 = arith.constant 0 : i32
    %175 = tpu.memref_slice %arg7[%c34_i32_103, %c0_i32_104] : memref<64x128xf32, #tpu.memory_space<vmem>> -> memref<1x128xf32, #tpu.memory_space<vmem>>
    tpu.enqueue_dma source(%174 : memref<1x128xf32, #tpu.memory_space<any>>) target(%175 : memref<1x128xf32, #tpu.memory_space<vmem>>) target_semaphore(%arg8 : memref<!tpu.dma_semaphore, #tpu.memory_space<semaphore_mem>>)
    %c35_i32 = arith.constant 35 : i32
    %176 = arith.addi %0, %c35_i32 : i32
    %177 = arith.index_cast %176 : i32 to index
    %178 = memref.load %arg1[%177] : memref<64xi32, #tpu.memory_space<smem>>
    %c0_i32_105 = arith.constant 0 : i32
    %179 = tpu.memref_slice %arg3[%178, %c0_i32_105] : memref<64x128xf32, #tpu.memory_space<any>> -> memref<1x128xf32, #tpu.memory_space<any>>
    %c35_i32_106 = arith.constant 35 : i32
    %c0_i32_107 = arith.constant 0 : i32
    %180 = tpu.memref_slice %arg7[%c35_i32_106, %c0_i32_107] : memref<64x128xf32, #tpu.memory_space<vmem>> -> memref<1x128xf32, #tpu.memory_space<vmem>>
    tpu.enqueue_dma source(%179 : memref<1x128xf32, #tpu.memory_space<any>>) target(%180 : memref<1x128xf32, #tpu.memory_space<vmem>>) target_semaphore(%arg8 : memref<!tpu.dma_semaphore, #tpu.memory_space<semaphore_mem>>)
    %c36_i32 = arith.constant 36 : i32
    %181 = arith.addi %0, %c36_i32 : i32
    %182 = arith.index_cast %181 : i32 to index
    %183 = memref.load %arg1[%182] : memref<64xi32, #tpu.memory_space<smem>>
    %c0_i32_108 = arith.constant 0 : i32
    %184 = tpu.memref_slice %arg3[%183, %c0_i32_108] : memref<64x128xf32, #tpu.memory_space<any>> -> memref<1x128xf32, #tpu.memory_space<any>>
    %c36_i32_109 = arith.constant 36 : i32
    %c0_i32_110 = arith.constant 0 : i32
    %185 = tpu.memref_slice %arg7[%c36_i32_109, %c0_i32_110] : memref<64x128xf32, #tpu.memory_space<vmem>> -> memref<1x128xf32, #tpu.memory_space<vmem>>
    tpu.enqueue_dma source(%184 : memref<1x128xf32, #tpu.memory_space<any>>) target(%185 : memref<1x128xf32, #tpu.memory_space<vmem>>) target_semaphore(%arg8 : memref<!tpu.dma_semaphore, #tpu.memory_space<semaphore_mem>>)
    %c37_i32 = arith.constant 37 : i32
    %186 = arith.addi %0, %c37_i32 : i32
    %187 = arith.index_cast %186 : i32 to index
    %188 = memref.load %arg1[%187] : memref<64xi32, #tpu.memory_space<smem>>
    %c0_i32_111 = arith.constant 0 : i32
    %189 = tpu.memref_slice %arg3[%188, %c0_i32_111] : memref<64x128xf32, #tpu.memory_space<any>> -> memref<1x128xf32, #tpu.memory_space<any>>
    %c37_i32_112 = arith.constant 37 : i32
    %c0_i32_113 = arith.constant 0 : i32
    %190 = tpu.memref_slice %arg7[%c37_i32_112, %c0_i32_113] : memref<64x128xf32, #tpu.memory_space<vmem>> -> memref<1x128xf32, #tpu.memory_space<vmem>>
    tpu.enqueue_dma source(%189 : memref<1x128xf32, #tpu.memory_space<any>>) target(%190 : memref<1x128xf32, #tpu.memory_space<vmem>>) target_semaphore(%arg8 : memref<!tpu.dma_semaphore, #tpu.memory_space<semaphore_mem>>)
    %c38_i32 = arith.constant 38 : i32
    %191 = arith.addi %0, %c38_i32 : i32
    %192 = arith.index_cast %191 : i32 to index
    %193 = memref.load %arg1[%192] : memref<64xi32, #tpu.memory_space<smem>>
    %c0_i32_114 = arith.constant 0 : i32
    %194 = tpu.memref_slice %arg3[%193, %c0_i32_114] : memref<64x128xf32, #tpu.memory_space<any>> -> memref<1x128xf32, #tpu.memory_space<any>>
    %c38_i32_115 = arith.constant 38 : i32
    %c0_i32_116 = arith.constant 0 : i32
    %195 = tpu.memref_slice %arg7[%c38_i32_115, %c0_i32_116] : memref<64x128xf32, #tpu.memory_space<vmem>> -> memref<1x128xf32, #tpu.memory_space<vmem>>
    tpu.enqueue_dma source(%194 : memref<1x128xf32, #tpu.memory_space<any>>) target(%195 : memref<1x128xf32, #tpu.memory_space<vmem>>) target_semaphore(%arg8 : memref<!tpu.dma_semaphore, #tpu.memory_space<semaphore_mem>>)
    %c39_i32 = arith.constant 39 : i32
    %196 = arith.addi %0, %c39_i32 : i32
    %197 = arith.index_cast %196 : i32 to index
    %198 = memref.load %arg1[%197] : memref<64xi32, #tpu.memory_space<smem>>
    %c0_i32_117 = arith.constant 0 : i32
    %199 = tpu.memref_slice %arg3[%198, %c0_i32_117] : memref<64x128xf32, #tpu.memory_space<any>> -> memref<1x128xf32, #tpu.memory_space<any>>
    %c39_i32_118 = arith.constant 39 : i32
    %c0_i32_119 = arith.constant 0 : i32
    %200 = tpu.memref_slice %arg7[%c39_i32_118, %c0_i32_119] : memref<64x128xf32, #tpu.memory_space<vmem>> -> memref<1x128xf32, #tpu.memory_space<vmem>>
    tpu.enqueue_dma source(%199 : memref<1x128xf32, #tpu.memory_space<any>>) target(%200 : memref<1x128xf32, #tpu.memory_space<vmem>>) target_semaphore(%arg8 : memref<!tpu.dma_semaphore, #tpu.memory_space<semaphore_mem>>)
    %c40_i32 = arith.constant 40 : i32
    %201 = arith.addi %0, %c40_i32 : i32
    %202 = arith.index_cast %201 : i32 to index
    %203 = memref.load %arg1[%202] : memref<64xi32, #tpu.memory_space<smem>>
    %c0_i32_120 = arith.constant 0 : i32
    %204 = tpu.memref_slice %arg3[%203, %c0_i32_120] : memref<64x128xf32, #tpu.memory_space<any>> -> memref<1x128xf32, #tpu.memory_space<any>>
    %c40_i32_121 = arith.constant 40 : i32
    %c0_i32_122 = arith.constant 0 : i32
    %205 = tpu.memref_slice %arg7[%c40_i32_121, %c0_i32_122] : memref<64x128xf32, #tpu.memory_space<vmem>> -> memref<1x128xf32, #tpu.memory_space<vmem>>
    tpu.enqueue_dma source(%204 : memref<1x128xf32, #tpu.memory_space<any>>) target(%205 : memref<1x128xf32, #tpu.memory_space<vmem>>) target_semaphore(%arg8 : memref<!tpu.dma_semaphore, #tpu.memory_space<semaphore_mem>>)
    %c41_i32 = arith.constant 41 : i32
    %206 = arith.addi %0, %c41_i32 : i32
    %207 = arith.index_cast %206 : i32 to index
    %208 = memref.load %arg1[%207] : memref<64xi32, #tpu.memory_space<smem>>
    %c0_i32_123 = arith.constant 0 : i32
    %209 = tpu.memref_slice %arg3[%208, %c0_i32_123] : memref<64x128xf32, #tpu.memory_space<any>> -> memref<1x128xf32, #tpu.memory_space<any>>
    %c41_i32_124 = arith.constant 41 : i32
    %c0_i32_125 = arith.constant 0 : i32
    %210 = tpu.memref_slice %arg7[%c41_i32_124, %c0_i32_125] : memref<64x128xf32, #tpu.memory_space<vmem>> -> memref<1x128xf32, #tpu.memory_space<vmem>>
    tpu.enqueue_dma source(%209 : memref<1x128xf32, #tpu.memory_space<any>>) target(%210 : memref<1x128xf32, #tpu.memory_space<vmem>>) target_semaphore(%arg8 : memref<!tpu.dma_semaphore, #tpu.memory_space<semaphore_mem>>)
    %c42_i32 = arith.constant 42 : i32
    %211 = arith.addi %0, %c42_i32 : i32
    %212 = arith.index_cast %211 : i32 to index
    %213 = memref.load %arg1[%212] : memref<64xi32, #tpu.memory_space<smem>>
    %c0_i32_126 = arith.constant 0 : i32
    %214 = tpu.memref_slice %arg3[%213, %c0_i32_126] : memref<64x128xf32, #tpu.memory_space<any>> -> memref<1x128xf32, #tpu.memory_space<any>>
    %c42_i32_127 = arith.constant 42 : i32
    %c0_i32_128 = arith.constant 0 : i32
    %215 = tpu.memref_slice %arg7[%c42_i32_127, %c0_i32_128] : memref<64x128xf32, #tpu.memory_space<vmem>> -> memref<1x128xf32, #tpu.memory_space<vmem>>
    tpu.enqueue_dma source(%214 : memref<1x128xf32, #tpu.memory_space<any>>) target(%215 : memref<1x128xf32, #tpu.memory_space<vmem>>) target_semaphore(%arg8 : memref<!tpu.dma_semaphore, #tpu.memory_space<semaphore_mem>>)
    %c43_i32 = arith.constant 43 : i32
    %216 = arith.addi %0, %c43_i32 : i32
    %217 = arith.index_cast %216 : i32 to index
    %218 = memref.load %arg1[%217] : memref<64xi32, #tpu.memory_space<smem>>
    %c0_i32_129 = arith.constant 0 : i32
    %219 = tpu.memref_slice %arg3[%218, %c0_i32_129] : memref<64x128xf32, #tpu.memory_space<any>> -> memref<1x128xf32, #tpu.memory_space<any>>
    %c43_i32_130 = arith.constant 43 : i32
    %c0_i32_131 = arith.constant 0 : i32
    %220 = tpu.memref_slice %arg7[%c43_i32_130, %c0_i32_131] : memref<64x128xf32, #tpu.memory_space<vmem>> -> memref<1x128xf32, #tpu.memory_space<vmem>>
    tpu.enqueue_dma source(%219 : memref<1x128xf32, #tpu.memory_space<any>>) target(%220 : memref<1x128xf32, #tpu.memory_space<vmem>>) target_semaphore(%arg8 : memref<!tpu.dma_semaphore, #tpu.memory_space<semaphore_mem>>)
    %c44_i32 = arith.constant 44 : i32
    %221 = arith.addi %0, %c44_i32 : i32
    %222 = arith.index_cast %221 : i32 to index
    %223 = memref.load %arg1[%222] : memref<64xi32, #tpu.memory_space<smem>>
    %c0_i32_132 = arith.constant 0 : i32
    %224 = tpu.memref_slice %arg3[%223, %c0_i32_132] : memref<64x128xf32, #tpu.memory_space<any>> -> memref<1x128xf32, #tpu.memory_space<any>>
    %c44_i32_133 = arith.constant 44 : i32
    %c0_i32_134 = arith.constant 0 : i32
    %225 = tpu.memref_slice %arg7[%c44_i32_133, %c0_i32_134] : memref<64x128xf32, #tpu.memory_space<vmem>> -> memref<1x128xf32, #tpu.memory_space<vmem>>
    tpu.enqueue_dma source(%224 : memref<1x128xf32, #tpu.memory_space<any>>) target(%225 : memref<1x128xf32, #tpu.memory_space<vmem>>) target_semaphore(%arg8 : memref<!tpu.dma_semaphore, #tpu.memory_space<semaphore_mem>>)
    %c45_i32 = arith.constant 45 : i32
    %226 = arith.addi %0, %c45_i32 : i32
    %227 = arith.index_cast %226 : i32 to index
    %228 = memref.load %arg1[%227] : memref<64xi32, #tpu.memory_space<smem>>
    %c0_i32_135 = arith.constant 0 : i32
    %229 = tpu.memref_slice %arg3[%228, %c0_i32_135] : memref<64x128xf32, #tpu.memory_space<any>> -> memref<1x128xf32, #tpu.memory_space<any>>
    %c45_i32_136 = arith.constant 45 : i32
    %c0_i32_137 = arith.constant 0 : i32
    %230 = tpu.memref_slice %arg7[%c45_i32_136, %c0_i32_137] : memref<64x128xf32, #tpu.memory_space<vmem>> -> memref<1x128xf32, #tpu.memory_space<vmem>>
    tpu.enqueue_dma source(%229 : memref<1x128xf32, #tpu.memory_space<any>>) target(%230 : memref<1x128xf32, #tpu.memory_space<vmem>>) target_semaphore(%arg8 : memref<!tpu.dma_semaphore, #tpu.memory_space<semaphore_mem>>)
    %c46_i32 = arith.constant 46 : i32
    %231 = arith.addi %0, %c46_i32 : i32
    %232 = arith.index_cast %231 : i32 to index
    %233 = memref.load %arg1[%232] : memref<64xi32, #tpu.memory_space<smem>>
    %c0_i32_138 = arith.constant 0 : i32
    %234 = tpu.memref_slice %arg3[%233, %c0_i32_138] : memref<64x128xf32, #tpu.memory_space<any>> -> memref<1x128xf32, #tpu.memory_space<any>>
    %c46_i32_139 = arith.constant 46 : i32
    %c0_i32_140 = arith.constant 0 : i32
    %235 = tpu.memref_slice %arg7[%c46_i32_139, %c0_i32_140] : memref<64x128xf32, #tpu.memory_space<vmem>> -> memref<1x128xf32, #tpu.memory_space<vmem>>
    tpu.enqueue_dma source(%234 : memref<1x128xf32, #tpu.memory_space<any>>) target(%235 : memref<1x128xf32, #tpu.memory_space<vmem>>) target_semaphore(%arg8 : memref<!tpu.dma_semaphore, #tpu.memory_space<semaphore_mem>>)
    %c47_i32 = arith.constant 47 : i32
    %236 = arith.addi %0, %c47_i32 : i32
    %237 = arith.index_cast %236 : i32 to index
    %238 = memref.load %arg1[%237] : memref<64xi32, #tpu.memory_space<smem>>
    %c0_i32_141 = arith.constant 0 : i32
    %239 = tpu.memref_slice %arg3[%238, %c0_i32_141] : memref<64x128xf32, #tpu.memory_space<any>> -> memref<1x128xf32, #tpu.memory_space<any>>
    %c47_i32_142 = arith.constant 47 : i32
    %c0_i32_143 = arith.constant 0 : i32
    %240 = tpu.memref_slice %arg7[%c47_i32_142, %c0_i32_143] : memref<64x128xf32, #tpu.memory_space<vmem>> -> memref<1x128xf32, #tpu.memory_space<vmem>>
    tpu.enqueue_dma source(%239 : memref<1x128xf32, #tpu.memory_space<any>>) target(%240 : memref<1x128xf32, #tpu.memory_space<vmem>>) target_semaphore(%arg8 : memref<!tpu.dma_semaphore, #tpu.memory_space<semaphore_mem>>)
    %c48_i32 = arith.constant 48 : i32
    %241 = arith.addi %0, %c48_i32 : i32
    %242 = arith.index_cast %241 : i32 to index
    %243 = memref.load %arg1[%242] : memref<64xi32, #tpu.memory_space<smem>>
    %c0_i32_144 = arith.constant 0 : i32
    %244 = tpu.memref_slice %arg3[%243, %c0_i32_144] : memref<64x128xf32, #tpu.memory_space<any>> -> memref<1x128xf32, #tpu.memory_space<any>>
    %c48_i32_145 = arith.constant 48 : i32
    %c0_i32_146 = arith.constant 0 : i32
    %245 = tpu.memref_slice %arg7[%c48_i32_145, %c0_i32_146] : memref<64x128xf32, #tpu.memory_space<vmem>> -> memref<1x128xf32, #tpu.memory_space<vmem>>
    tpu.enqueue_dma source(%244 : memref<1x128xf32, #tpu.memory_space<any>>) target(%245 : memref<1x128xf32, #tpu.memory_space<vmem>>) target_semaphore(%arg8 : memref<!tpu.dma_semaphore, #tpu.memory_space<semaphore_mem>>)
    %c49_i32 = arith.constant 49 : i32
    %246 = arith.addi %0, %c49_i32 : i32
    %247 = arith.index_cast %246 : i32 to index
    %248 = memref.load %arg1[%247] : memref<64xi32, #tpu.memory_space<smem>>
    %c0_i32_147 = arith.constant 0 : i32
    %249 = tpu.memref_slice %arg3[%248, %c0_i32_147] : memref<64x128xf32, #tpu.memory_space<any>> -> memref<1x128xf32, #tpu.memory_space<any>>
    %c49_i32_148 = arith.constant 49 : i32
    %c0_i32_149 = arith.constant 0 : i32
    %250 = tpu.memref_slice %arg7[%c49_i32_148, %c0_i32_149] : memref<64x128xf32, #tpu.memory_space<vmem>> -> memref<1x128xf32, #tpu.memory_space<vmem>>
    tpu.enqueue_dma source(%249 : memref<1x128xf32, #tpu.memory_space<any>>) target(%250 : memref<1x128xf32, #tpu.memory_space<vmem>>) target_semaphore(%arg8 : memref<!tpu.dma_semaphore, #tpu.memory_space<semaphore_mem>>)
    %c50_i32 = arith.constant 50 : i32
    %251 = arith.addi %0, %c50_i32 : i32
    %252 = arith.index_cast %251 : i32 to index
    %253 = memref.load %arg1[%252] : memref<64xi32, #tpu.memory_space<smem>>
    %c0_i32_150 = arith.constant 0 : i32
    %254 = tpu.memref_slice %arg3[%253, %c0_i32_150] : memref<64x128xf32, #tpu.memory_space<any>> -> memref<1x128xf32, #tpu.memory_space<any>>
    %c50_i32_151 = arith.constant 50 : i32
    %c0_i32_152 = arith.constant 0 : i32
    %255 = tpu.memref_slice %arg7[%c50_i32_151, %c0_i32_152] : memref<64x128xf32, #tpu.memory_space<vmem>> -> memref<1x128xf32, #tpu.memory_space<vmem>>
    tpu.enqueue_dma source(%254 : memref<1x128xf32, #tpu.memory_space<any>>) target(%255 : memref<1x128xf32, #tpu.memory_space<vmem>>) target_semaphore(%arg8 : memref<!tpu.dma_semaphore, #tpu.memory_space<semaphore_mem>>)
    %c51_i32 = arith.constant 51 : i32
    %256 = arith.addi %0, %c51_i32 : i32
    %257 = arith.index_cast %256 : i32 to index
    %258 = memref.load %arg1[%257] : memref<64xi32, #tpu.memory_space<smem>>
    %c0_i32_153 = arith.constant 0 : i32
    %259 = tpu.memref_slice %arg3[%258, %c0_i32_153] : memref<64x128xf32, #tpu.memory_space<any>> -> memref<1x128xf32, #tpu.memory_space<any>>
    %c51_i32_154 = arith.constant 51 : i32
    %c0_i32_155 = arith.constant 0 : i32
    %260 = tpu.memref_slice %arg7[%c51_i32_154, %c0_i32_155] : memref<64x128xf32, #tpu.memory_space<vmem>> -> memref<1x128xf32, #tpu.memory_space<vmem>>
    tpu.enqueue_dma source(%259 : memref<1x128xf32, #tpu.memory_space<any>>) target(%260 : memref<1x128xf32, #tpu.memory_space<vmem>>) target_semaphore(%arg8 : memref<!tpu.dma_semaphore, #tpu.memory_space<semaphore_mem>>)
    %c52_i32 = arith.constant 52 : i32
    %261 = arith.addi %0, %c52_i32 : i32
    %262 = arith.index_cast %261 : i32 to index
    %263 = memref.load %arg1[%262] : memref<64xi32, #tpu.memory_space<smem>>
    %c0_i32_156 = arith.constant 0 : i32
    %264 = tpu.memref_slice %arg3[%263, %c0_i32_156] : memref<64x128xf32, #tpu.memory_space<any>> -> memref<1x128xf32, #tpu.memory_space<any>>
    %c52_i32_157 = arith.constant 52 : i32
    %c0_i32_158 = arith.constant 0 : i32
    %265 = tpu.memref_slice %arg7[%c52_i32_157, %c0_i32_158] : memref<64x128xf32, #tpu.memory_space<vmem>> -> memref<1x128xf32, #tpu.memory_space<vmem>>
    tpu.enqueue_dma source(%264 : memref<1x128xf32, #tpu.memory_space<any>>) target(%265 : memref<1x128xf32, #tpu.memory_space<vmem>>) target_semaphore(%arg8 : memref<!tpu.dma_semaphore, #tpu.memory_space<semaphore_mem>>)
    %c53_i32 = arith.constant 53 : i32
    %266 = arith.addi %0, %c53_i32 : i32
    %267 = arith.index_cast %266 : i32 to index
    %268 = memref.load %arg1[%267] : memref<64xi32, #tpu.memory_space<smem>>
    %c0_i32_159 = arith.constant 0 : i32
    %269 = tpu.memref_slice %arg3[%268, %c0_i32_159] : memref<64x128xf32, #tpu.memory_space<any>> -> memref<1x128xf32, #tpu.memory_space<any>>
    %c53_i32_160 = arith.constant 53 : i32
    %c0_i32_161 = arith.constant 0 : i32
    %270 = tpu.memref_slice %arg7[%c53_i32_160, %c0_i32_161] : memref<64x128xf32, #tpu.memory_space<vmem>> -> memref<1x128xf32, #tpu.memory_space<vmem>>
    tpu.enqueue_dma source(%269 : memref<1x128xf32, #tpu.memory_space<any>>) target(%270 : memref<1x128xf32, #tpu.memory_space<vmem>>) target_semaphore(%arg8 : memref<!tpu.dma_semaphore, #tpu.memory_space<semaphore_mem>>)
    %c54_i32 = arith.constant 54 : i32
    %271 = arith.addi %0, %c54_i32 : i32
    %272 = arith.index_cast %271 : i32 to index
    %273 = memref.load %arg1[%272] : memref<64xi32, #tpu.memory_space<smem>>
    %c0_i32_162 = arith.constant 0 : i32
    %274 = tpu.memref_slice %arg3[%273, %c0_i32_162] : memref<64x128xf32, #tpu.memory_space<any>> -> memref<1x128xf32, #tpu.memory_space<any>>
    %c54_i32_163 = arith.constant 54 : i32
    %c0_i32_164 = arith.constant 0 : i32
    %275 = tpu.memref_slice %arg7[%c54_i32_163, %c0_i32_164] : memref<64x128xf32, #tpu.memory_space<vmem>> -> memref<1x128xf32, #tpu.memory_space<vmem>>
    tpu.enqueue_dma source(%274 : memref<1x128xf32, #tpu.memory_space<any>>) target(%275 : memref<1x128xf32, #tpu.memory_space<vmem>>) target_semaphore(%arg8 : memref<!tpu.dma_semaphore, #tpu.memory_space<semaphore_mem>>)
    %c55_i32 = arith.constant 55 : i32
    %276 = arith.addi %0, %c55_i32 : i32
    %277 = arith.index_cast %276 : i32 to index
    %278 = memref.load %arg1[%277] : memref<64xi32, #tpu.memory_space<smem>>
    %c0_i32_165 = arith.constant 0 : i32
    %279 = tpu.memref_slice %arg3[%278, %c0_i32_165] : memref<64x128xf32, #tpu.memory_space<any>> -> memref<1x128xf32, #tpu.memory_space<any>>
    %c55_i32_166 = arith.constant 55 : i32
    %c0_i32_167 = arith.constant 0 : i32
    %280 = tpu.memref_slice %arg7[%c55_i32_166, %c0_i32_167] : memref<64x128xf32, #tpu.memory_space<vmem>> -> memref<1x128xf32, #tpu.memory_space<vmem>>
    tpu.enqueue_dma source(%279 : memref<1x128xf32, #tpu.memory_space<any>>) target(%280 : memref<1x128xf32, #tpu.memory_space<vmem>>) target_semaphore(%arg8 : memref<!tpu.dma_semaphore, #tpu.memory_space<semaphore_mem>>)
    %c56_i32 = arith.constant 56 : i32
    %281 = arith.addi %0, %c56_i32 : i32
    %282 = arith.index_cast %281 : i32 to index
    %283 = memref.load %arg1[%282] : memref<64xi32, #tpu.memory_space<smem>>
    %c0_i32_168 = arith.constant 0 : i32
    %284 = tpu.memref_slice %arg3[%283, %c0_i32_168] : memref<64x128xf32, #tpu.memory_space<any>> -> memref<1x128xf32, #tpu.memory_space<any>>
    %c56_i32_169 = arith.constant 56 : i32
    %c0_i32_170 = arith.constant 0 : i32
    %285 = tpu.memref_slice %arg7[%c56_i32_169, %c0_i32_170] : memref<64x128xf32, #tpu.memory_space<vmem>> -> memref<1x128xf32, #tpu.memory_space<vmem>>
    tpu.enqueue_dma source(%284 : memref<1x128xf32, #tpu.memory_space<any>>) target(%285 : memref<1x128xf32, #tpu.memory_space<vmem>>) target_semaphore(%arg8 : memref<!tpu.dma_semaphore, #tpu.memory_space<semaphore_mem>>)
    %c57_i32 = arith.constant 57 : i32
    %286 = arith.addi %0, %c57_i32 : i32
    %287 = arith.index_cast %286 : i32 to index
    %288 = memref.load %arg1[%287] : memref<64xi32, #tpu.memory_space<smem>>
    %c0_i32_171 = arith.constant 0 : i32
    %289 = tpu.memref_slice %arg3[%288, %c0_i32_171] : memref<64x128xf32, #tpu.memory_space<any>> -> memref<1x128xf32, #tpu.memory_space<any>>
    %c57_i32_172 = arith.constant 57 : i32
    %c0_i32_173 = arith.constant 0 : i32
    %290 = tpu.memref_slice %arg7[%c57_i32_172, %c0_i32_173] : memref<64x128xf32, #tpu.memory_space<vmem>> -> memref<1x128xf32, #tpu.memory_space<vmem>>
    tpu.enqueue_dma source(%289 : memref<1x128xf32, #tpu.memory_space<any>>) target(%290 : memref<1x128xf32, #tpu.memory_space<vmem>>) target_semaphore(%arg8 : memref<!tpu.dma_semaphore, #tpu.memory_space<semaphore_mem>>)
    %c58_i32 = arith.constant 58 : i32
    %291 = arith.addi %0, %c58_i32 : i32
    %292 = arith.index_cast %291 : i32 to index
    %293 = memref.load %arg1[%292] : memref<64xi32, #tpu.memory_space<smem>>
    %c0_i32_174 = arith.constant 0 : i32
    %294 = tpu.memref_slice %arg3[%293, %c0_i32_174] : memref<64x128xf32, #tpu.memory_space<any>> -> memref<1x128xf32, #tpu.memory_space<any>>
    %c58_i32_175 = arith.constant 58 : i32
    %c0_i32_176 = arith.constant 0 : i32
    %295 = tpu.memref_slice %arg7[%c58_i32_175, %c0_i32_176] : memref<64x128xf32, #tpu.memory_space<vmem>> -> memref<1x128xf32, #tpu.memory_space<vmem>>
    tpu.enqueue_dma source(%294 : memref<1x128xf32, #tpu.memory_space<any>>) target(%295 : memref<1x128xf32, #tpu.memory_space<vmem>>) target_semaphore(%arg8 : memref<!tpu.dma_semaphore, #tpu.memory_space<semaphore_mem>>)
    %c59_i32 = arith.constant 59 : i32
    %296 = arith.addi %0, %c59_i32 : i32
    %297 = arith.index_cast %296 : i32 to index
    %298 = memref.load %arg1[%297] : memref<64xi32, #tpu.memory_space<smem>>
    %c0_i32_177 = arith.constant 0 : i32
    %299 = tpu.memref_slice %arg3[%298, %c0_i32_177] : memref<64x128xf32, #tpu.memory_space<any>> -> memref<1x128xf32, #tpu.memory_space<any>>
    %c59_i32_178 = arith.constant 59 : i32
    %c0_i32_179 = arith.constant 0 : i32
    %300 = tpu.memref_slice %arg7[%c59_i32_178, %c0_i32_179] : memref<64x128xf32, #tpu.memory_space<vmem>> -> memref<1x128xf32, #tpu.memory_space<vmem>>
    tpu.enqueue_dma source(%299 : memref<1x128xf32, #tpu.memory_space<any>>) target(%300 : memref<1x128xf32, #tpu.memory_space<vmem>>) target_semaphore(%arg8 : memref<!tpu.dma_semaphore, #tpu.memory_space<semaphore_mem>>)
    %c60_i32 = arith.constant 60 : i32
    %301 = arith.addi %0, %c60_i32 : i32
    %302 = arith.index_cast %301 : i32 to index
    %303 = memref.load %arg1[%302] : memref<64xi32, #tpu.memory_space<smem>>
    %c0_i32_180 = arith.constant 0 : i32
    %304 = tpu.memref_slice %arg3[%303, %c0_i32_180] : memref<64x128xf32, #tpu.memory_space<any>> -> memref<1x128xf32, #tpu.memory_space<any>>
    %c60_i32_181 = arith.constant 60 : i32
    %c0_i32_182 = arith.constant 0 : i32
    %305 = tpu.memref_slice %arg7[%c60_i32_181, %c0_i32_182] : memref<64x128xf32, #tpu.memory_space<vmem>> -> memref<1x128xf32, #tpu.memory_space<vmem>>
    tpu.enqueue_dma source(%304 : memref<1x128xf32, #tpu.memory_space<any>>) target(%305 : memref<1x128xf32, #tpu.memory_space<vmem>>) target_semaphore(%arg8 : memref<!tpu.dma_semaphore, #tpu.memory_space<semaphore_mem>>)
    %c61_i32 = arith.constant 61 : i32
    %306 = arith.addi %0, %c61_i32 : i32
    %307 = arith.index_cast %306 : i32 to index
    %308 = memref.load %arg1[%307] : memref<64xi32, #tpu.memory_space<smem>>
    %c0_i32_183 = arith.constant 0 : i32
    %309 = tpu.memref_slice %arg3[%308, %c0_i32_183] : memref<64x128xf32, #tpu.memory_space<any>> -> memref<1x128xf32, #tpu.memory_space<any>>
    %c61_i32_184 = arith.constant 61 : i32
    %c0_i32_185 = arith.constant 0 : i32
    %310 = tpu.memref_slice %arg7[%c61_i32_184, %c0_i32_185] : memref<64x128xf32, #tpu.memory_space<vmem>> -> memref<1x128xf32, #tpu.memory_space<vmem>>
    tpu.enqueue_dma source(%309 : memref<1x128xf32, #tpu.memory_space<any>>) target(%310 : memref<1x128xf32, #tpu.memory_space<vmem>>) target_semaphore(%arg8 : memref<!tpu.dma_semaphore, #tpu.memory_space<semaphore_mem>>)
    %c62_i32 = arith.constant 62 : i32
    %311 = arith.addi %0, %c62_i32 : i32
    %312 = arith.index_cast %311 : i32 to index
    %313 = memref.load %arg1[%312] : memref<64xi32, #tpu.memory_space<smem>>
    %c0_i32_186 = arith.constant 0 : i32
    %314 = tpu.memref_slice %arg3[%313, %c0_i32_186] : memref<64x128xf32, #tpu.memory_space<any>> -> memref<1x128xf32, #tpu.memory_space<any>>
    %c62_i32_187 = arith.constant 62 : i32
    %c0_i32_188 = arith.constant 0 : i32
    %315 = tpu.memref_slice %arg7[%c62_i32_187, %c0_i32_188] : memref<64x128xf32, #tpu.memory_space<vmem>> -> memref<1x128xf32, #tpu.memory_space<vmem>>
    tpu.enqueue_dma source(%314 : memref<1x128xf32, #tpu.memory_space<any>>) target(%315 : memref<1x128xf32, #tpu.memory_space<vmem>>) target_semaphore(%arg8 : memref<!tpu.dma_semaphore, #tpu.memory_space<semaphore_mem>>)
    %c63_i32 = arith.constant 63 : i32
    %316 = arith.addi %0, %c63_i32 : i32
    %317 = arith.index_cast %316 : i32 to index
    %318 = memref.load %arg1[%317] : memref<64xi32, #tpu.memory_space<smem>>
    %c0_i32_189 = arith.constant 0 : i32
    %319 = tpu.memref_slice %arg3[%318, %c0_i32_189] : memref<64x128xf32, #tpu.memory_space<any>> -> memref<1x128xf32, #tpu.memory_space<any>>
    %c63_i32_190 = arith.constant 63 : i32
    %c0_i32_191 = arith.constant 0 : i32
    %320 = tpu.memref_slice %arg7[%c63_i32_190, %c0_i32_191] : memref<64x128xf32, #tpu.memory_space<vmem>> -> memref<1x128xf32, #tpu.memory_space<vmem>>
    tpu.enqueue_dma source(%319 : memref<1x128xf32, #tpu.memory_space<any>>) target(%320 : memref<1x128xf32, #tpu.memory_space<vmem>>) target_semaphore(%arg8 : memref<!tpu.dma_semaphore, #tpu.memory_space<semaphore_mem>>)
    %c0_i32_192 = arith.constant 0 : i32
    %321 = tpu.memref_slice %arg3[%3, %c0_i32_192] : memref<64x128xf32, #tpu.memory_space<any>> -> memref<1x128xf32, #tpu.memory_space<any>>
    %c0_i32_193 = arith.constant 0 : i32
    %c0_i32_194 = arith.constant 0 : i32
    %322 = tpu.memref_slice %arg7[%c0_i32_193, %c0_i32_194] : memref<64x128xf32, #tpu.memory_space<vmem>> -> memref<1x128xf32, #tpu.memory_space<vmem>>
    tpu.wait_dma2 semaphore(%arg8 : memref<!tpu.dma_semaphore, #tpu.memory_space<semaphore_mem>>) src(%321 : memref<1x128xf32, #tpu.memory_space<any>>) dst(%322 : memref<1x128xf32, #tpu.memory_space<vmem>>)
    %c0_i32_195 = arith.constant 0 : i32
    %323 = tpu.memref_slice %arg3[%8, %c0_i32_195] : memref<64x128xf32, #tpu.memory_space<any>> -> memref<1x128xf32, #tpu.memory_space<any>>
    %c1_i32_196 = arith.constant 1 : i32
    %c0_i32_197 = arith.constant 0 : i32
    %324 = tpu.memref_slice %arg7[%c1_i32_196, %c0_i32_197] : memref<64x128xf32, #tpu.memory_space<vmem>> -> memref<1x128xf32, #tpu.memory_space<vmem>>
    tpu.wait_dma2 semaphore(%arg8 : memref<!tpu.dma_semaphore, #tpu.memory_space<semaphore_mem>>) src(%323 : memref<1x128xf32, #tpu.memory_space<any>>) dst(%324 : memref<1x128xf32, #tpu.memory_space<vmem>>)
    %c0_i32_198 = arith.constant 0 : i32
    %325 = tpu.memref_slice %arg3[%13, %c0_i32_198] : memref<64x128xf32, #tpu.memory_space<any>> -> memref<1x128xf32, #tpu.memory_space<any>>
    %c2_i32_199 = arith.constant 2 : i32
    %c0_i32_200 = arith.constant 0 : i32
    %326 = tpu.memref_slice %arg7[%c2_i32_199, %c0_i32_200] : memref<64x128xf32, #tpu.memory_space<vmem>> -> memref<1x128xf32, #tpu.memory_space<vmem>>
    tpu.wait_dma2 semaphore(%arg8 : memref<!tpu.dma_semaphore, #tpu.memory_space<semaphore_mem>>) src(%325 : memref<1x128xf32, #tpu.memory_space<any>>) dst(%326 : memref<1x128xf32, #tpu.memory_space<vmem>>)
    %c0_i32_201 = arith.constant 0 : i32
    %327 = tpu.memref_slice %arg3[%18, %c0_i32_201] : memref<64x128xf32, #tpu.memory_space<any>> -> memref<1x128xf32, #tpu.memory_space<any>>
    %c3_i32_202 = arith.constant 3 : i32
    %c0_i32_203 = arith.constant 0 : i32
    %328 = tpu.memref_slice %arg7[%c3_i32_202, %c0_i32_203] : memref<64x128xf32, #tpu.memory_space<vmem>> -> memref<1x128xf32, #tpu.memory_space<vmem>>
    tpu.wait_dma2 semaphore(%arg8 : memref<!tpu.dma_semaphore, #tpu.memory_space<semaphore_mem>>) src(%327 : memref<1x128xf32, #tpu.memory_space<any>>) dst(%328 : memref<1x128xf32, #tpu.memory_space<vmem>>)
    %c0_i32_204 = arith.constant 0 : i32
    %329 = tpu.memref_slice %arg3[%23, %c0_i32_204] : memref<64x128xf32, #tpu.memory_space<any>> -> memref<1x128xf32, #tpu.memory_space<any>>
    %c4_i32_205 = arith.constant 4 : i32
    %c0_i32_206 = arith.constant 0 : i32
    %330 = tpu.memref_slice %arg7[%c4_i32_205, %c0_i32_206] : memref<64x128xf32, #tpu.memory_space<vmem>> -> memref<1x128xf32, #tpu.memory_space<vmem>>
    tpu.wait_dma2 semaphore(%arg8 : memref<!tpu.dma_semaphore, #tpu.memory_space<semaphore_mem>>) src(%329 : memref<1x128xf32, #tpu.memory_space<any>>) dst(%330 : memref<1x128xf32, #tpu.memory_space<vmem>>)
    %c0_i32_207 = arith.constant 0 : i32
    %331 = tpu.memref_slice %arg3[%28, %c0_i32_207] : memref<64x128xf32, #tpu.memory_space<any>> -> memref<1x128xf32, #tpu.memory_space<any>>
    %c5_i32_208 = arith.constant 5 : i32
    %c0_i32_209 = arith.constant 0 : i32
    %332 = tpu.memref_slice %arg7[%c5_i32_208, %c0_i32_209] : memref<64x128xf32, #tpu.memory_space<vmem>> -> memref<1x128xf32, #tpu.memory_space<vmem>>
    tpu.wait_dma2 semaphore(%arg8 : memref<!tpu.dma_semaphore, #tpu.memory_space<semaphore_mem>>) src(%331 : memref<1x128xf32, #tpu.memory_space<any>>) dst(%332 : memref<1x128xf32, #tpu.memory_space<vmem>>)
    %c0_i32_210 = arith.constant 0 : i32
    %333 = tpu.memref_slice %arg3[%33, %c0_i32_210] : memref<64x128xf32, #tpu.memory_space<any>> -> memref<1x128xf32, #tpu.memory_space<any>>
    %c6_i32_211 = arith.constant 6 : i32
    %c0_i32_212 = arith.constant 0 : i32
    %334 = tpu.memref_slice %arg7[%c6_i32_211, %c0_i32_212] : memref<64x128xf32, #tpu.memory_space<vmem>> -> memref<1x128xf32, #tpu.memory_space<vmem>>
    tpu.wait_dma2 semaphore(%arg8 : memref<!tpu.dma_semaphore, #tpu.memory_space<semaphore_mem>>) src(%333 : memref<1x128xf32, #tpu.memory_space<any>>) dst(%334 : memref<1x128xf32, #tpu.memory_space<vmem>>)
    %c0_i32_213 = arith.constant 0 : i32
    %335 = tpu.memref_slice %arg3[%38, %c0_i32_213] : memref<64x128xf32, #tpu.memory_space<any>> -> memref<1x128xf32, #tpu.memory_space<any>>
    %c7_i32_214 = arith.constant 7 : i32
    %c0_i32_215 = arith.constant 0 : i32
    %336 = tpu.memref_slice %arg7[%c7_i32_214, %c0_i32_215] : memref<64x128xf32, #tpu.memory_space<vmem>> -> memref<1x128xf32, #tpu.memory_space<vmem>>
    tpu.wait_dma2 semaphore(%arg8 : memref<!tpu.dma_semaphore, #tpu.memory_space<semaphore_mem>>) src(%335 : memref<1x128xf32, #tpu.memory_space<any>>) dst(%336 : memref<1x128xf32, #tpu.memory_space<vmem>>)
    %c0_i32_216 = arith.constant 0 : i32
    %337 = tpu.memref_slice %arg3[%43, %c0_i32_216] : memref<64x128xf32, #tpu.memory_space<any>> -> memref<1x128xf32, #tpu.memory_space<any>>
    %c8_i32_217 = arith.constant 8 : i32
    %c0_i32_218 = arith.constant 0 : i32
    %338 = tpu.memref_slice %arg7[%c8_i32_217, %c0_i32_218] : memref<64x128xf32, #tpu.memory_space<vmem>> -> memref<1x128xf32, #tpu.memory_space<vmem>>
    tpu.wait_dma2 semaphore(%arg8 : memref<!tpu.dma_semaphore, #tpu.memory_space<semaphore_mem>>) src(%337 : memref<1x128xf32, #tpu.memory_space<any>>) dst(%338 : memref<1x128xf32, #tpu.memory_space<vmem>>)
    %c0_i32_219 = arith.constant 0 : i32
    %339 = tpu.memref_slice %arg3[%48, %c0_i32_219] : memref<64x128xf32, #tpu.memory_space<any>> -> memref<1x128xf32, #tpu.memory_space<any>>
    %c9_i32_220 = arith.constant 9 : i32
    %c0_i32_221 = arith.constant 0 : i32
    %340 = tpu.memref_slice %arg7[%c9_i32_220, %c0_i32_221] : memref<64x128xf32, #tpu.memory_space<vmem>> -> memref<1x128xf32, #tpu.memory_space<vmem>>
    tpu.wait_dma2 semaphore(%arg8 : memref<!tpu.dma_semaphore, #tpu.memory_space<semaphore_mem>>) src(%339 : memref<1x128xf32, #tpu.memory_space<any>>) dst(%340 : memref<1x128xf32, #tpu.memory_space<vmem>>)
    %c0_i32_222 = arith.constant 0 : i32
    %341 = tpu.memref_slice %arg3[%53, %c0_i32_222] : memref<64x128xf32, #tpu.memory_space<any>> -> memref<1x128xf32, #tpu.memory_space<any>>
    %c10_i32_223 = arith.constant 10 : i32
    %c0_i32_224 = arith.constant 0 : i32
    %342 = tpu.memref_slice %arg7[%c10_i32_223, %c0_i32_224] : memref<64x128xf32, #tpu.memory_space<vmem>> -> memref<1x128xf32, #tpu.memory_space<vmem>>
    tpu.wait_dma2 semaphore(%arg8 : memref<!tpu.dma_semaphore, #tpu.memory_space<semaphore_mem>>) src(%341 : memref<1x128xf32, #tpu.memory_space<any>>) dst(%342 : memref<1x128xf32, #tpu.memory_space<vmem>>)
    %c0_i32_225 = arith.constant 0 : i32
    %343 = tpu.memref_slice %arg3[%58, %c0_i32_225] : memref<64x128xf32, #tpu.memory_space<any>> -> memref<1x128xf32, #tpu.memory_space<any>>
    %c11_i32_226 = arith.constant 11 : i32
    %c0_i32_227 = arith.constant 0 : i32
    %344 = tpu.memref_slice %arg7[%c11_i32_226, %c0_i32_227] : memref<64x128xf32, #tpu.memory_space<vmem>> -> memref<1x128xf32, #tpu.memory_space<vmem>>
    tpu.wait_dma2 semaphore(%arg8 : memref<!tpu.dma_semaphore, #tpu.memory_space<semaphore_mem>>) src(%343 : memref<1x128xf32, #tpu.memory_space<any>>) dst(%344 : memref<1x128xf32, #tpu.memory_space<vmem>>)
    %c0_i32_228 = arith.constant 0 : i32
    %345 = tpu.memref_slice %arg3[%63, %c0_i32_228] : memref<64x128xf32, #tpu.memory_space<any>> -> memref<1x128xf32, #tpu.memory_space<any>>
    %c12_i32_229 = arith.constant 12 : i32
    %c0_i32_230 = arith.constant 0 : i32
    %346 = tpu.memref_slice %arg7[%c12_i32_229, %c0_i32_230] : memref<64x128xf32, #tpu.memory_space<vmem>> -> memref<1x128xf32, #tpu.memory_space<vmem>>
    tpu.wait_dma2 semaphore(%arg8 : memref<!tpu.dma_semaphore, #tpu.memory_space<semaphore_mem>>) src(%345 : memref<1x128xf32, #tpu.memory_space<any>>) dst(%346 : memref<1x128xf32, #tpu.memory_space<vmem>>)
    %c0_i32_231 = arith.constant 0 : i32
    %347 = tpu.memref_slice %arg3[%68, %c0_i32_231] : memref<64x128xf32, #tpu.memory_space<any>> -> memref<1x128xf32, #tpu.memory_space<any>>
    %c13_i32_232 = arith.constant 13 : i32
    %c0_i32_233 = arith.constant 0 : i32
    %348 = tpu.memref_slice %arg7[%c13_i32_232, %c0_i32_233] : memref<64x128xf32, #tpu.memory_space<vmem>> -> memref<1x128xf32, #tpu.memory_space<vmem>>
    tpu.wait_dma2 semaphore(%arg8 : memref<!tpu.dma_semaphore, #tpu.memory_space<semaphore_mem>>) src(%347 : memref<1x128xf32, #tpu.memory_space<any>>) dst(%348 : memref<1x128xf32, #tpu.memory_space<vmem>>)
    %c0_i32_234 = arith.constant 0 : i32
    %349 = tpu.memref_slice %arg3[%73, %c0_i32_234] : memref<64x128xf32, #tpu.memory_space<any>> -> memref<1x128xf32, #tpu.memory_space<any>>
    %c14_i32_235 = arith.constant 14 : i32
    %c0_i32_236 = arith.constant 0 : i32
    %350 = tpu.memref_slice %arg7[%c14_i32_235, %c0_i32_236] : memref<64x128xf32, #tpu.memory_space<vmem>> -> memref<1x128xf32, #tpu.memory_space<vmem>>
    tpu.wait_dma2 semaphore(%arg8 : memref<!tpu.dma_semaphore, #tpu.memory_space<semaphore_mem>>) src(%349 : memref<1x128xf32, #tpu.memory_space<any>>) dst(%350 : memref<1x128xf32, #tpu.memory_space<vmem>>)
    %c0_i32_237 = arith.constant 0 : i32
    %351 = tpu.memref_slice %arg3[%78, %c0_i32_237] : memref<64x128xf32, #tpu.memory_space<any>> -> memref<1x128xf32, #tpu.memory_space<any>>
    %c15_i32_238 = arith.constant 15 : i32
    %c0_i32_239 = arith.constant 0 : i32
    %352 = tpu.memref_slice %arg7[%c15_i32_238, %c0_i32_239] : memref<64x128xf32, #tpu.memory_space<vmem>> -> memref<1x128xf32, #tpu.memory_space<vmem>>
    tpu.wait_dma2 semaphore(%arg8 : memref<!tpu.dma_semaphore, #tpu.memory_space<semaphore_mem>>) src(%351 : memref<1x128xf32, #tpu.memory_space<any>>) dst(%352 : memref<1x128xf32, #tpu.memory_space<vmem>>)
    %c0_i32_240 = arith.constant 0 : i32
    %353 = tpu.memref_slice %arg3[%83, %c0_i32_240] : memref<64x128xf32, #tpu.memory_space<any>> -> memref<1x128xf32, #tpu.memory_space<any>>
    %c16_i32_241 = arith.constant 16 : i32
    %c0_i32_242 = arith.constant 0 : i32
    %354 = tpu.memref_slice %arg7[%c16_i32_241, %c0_i32_242] : memref<64x128xf32, #tpu.memory_space<vmem>> -> memref<1x128xf32, #tpu.memory_space<vmem>>
    tpu.wait_dma2 semaphore(%arg8 : memref<!tpu.dma_semaphore, #tpu.memory_space<semaphore_mem>>) src(%353 : memref<1x128xf32, #tpu.memory_space<any>>) dst(%354 : memref<1x128xf32, #tpu.memory_space<vmem>>)
    %c0_i32_243 = arith.constant 0 : i32
    %355 = tpu.memref_slice %arg3[%88, %c0_i32_243] : memref<64x128xf32, #tpu.memory_space<any>> -> memref<1x128xf32, #tpu.memory_space<any>>
    %c17_i32_244 = arith.constant 17 : i32
    %c0_i32_245 = arith.constant 0 : i32
    %356 = tpu.memref_slice %arg7[%c17_i32_244, %c0_i32_245] : memref<64x128xf32, #tpu.memory_space<vmem>> -> memref<1x128xf32, #tpu.memory_space<vmem>>
    tpu.wait_dma2 semaphore(%arg8 : memref<!tpu.dma_semaphore, #tpu.memory_space<semaphore_mem>>) src(%355 : memref<1x128xf32, #tpu.memory_space<any>>) dst(%356 : memref<1x128xf32, #tpu.memory_space<vmem>>)
    %c0_i32_246 = arith.constant 0 : i32
    %357 = tpu.memref_slice %arg3[%93, %c0_i32_246] : memref<64x128xf32, #tpu.memory_space<any>> -> memref<1x128xf32, #tpu.memory_space<any>>
    %c18_i32_247 = arith.constant 18 : i32
    %c0_i32_248 = arith.constant 0 : i32
    %358 = tpu.memref_slice %arg7[%c18_i32_247, %c0_i32_248] : memref<64x128xf32, #tpu.memory_space<vmem>> -> memref<1x128xf32, #tpu.memory_space<vmem>>
    tpu.wait_dma2 semaphore(%arg8 : memref<!tpu.dma_semaphore, #tpu.memory_space<semaphore_mem>>) src(%357 : memref<1x128xf32, #tpu.memory_space<any>>) dst(%358 : memref<1x128xf32, #tpu.memory_space<vmem>>)
    %c0_i32_249 = arith.constant 0 : i32
    %359 = tpu.memref_slice %arg3[%98, %c0_i32_249] : memref<64x128xf32, #tpu.memory_space<any>> -> memref<1x128xf32, #tpu.memory_space<any>>
    %c19_i32_250 = arith.constant 19 : i32
    %c0_i32_251 = arith.constant 0 : i32
    %360 = tpu.memref_slice %arg7[%c19_i32_250, %c0_i32_251] : memref<64x128xf32, #tpu.memory_space<vmem>> -> memref<1x128xf32, #tpu.memory_space<vmem>>
    tpu.wait_dma2 semaphore(%arg8 : memref<!tpu.dma_semaphore, #tpu.memory_space<semaphore_mem>>) src(%359 : memref<1x128xf32, #tpu.memory_space<any>>) dst(%360 : memref<1x128xf32, #tpu.memory_space<vmem>>)
    %c0_i32_252 = arith.constant 0 : i32
    %361 = tpu.memref_slice %arg3[%103, %c0_i32_252] : memref<64x128xf32, #tpu.memory_space<any>> -> memref<1x128xf32, #tpu.memory_space<any>>
    %c20_i32_253 = arith.constant 20 : i32
    %c0_i32_254 = arith.constant 0 : i32
    %362 = tpu.memref_slice %arg7[%c20_i32_253, %c0_i32_254] : memref<64x128xf32, #tpu.memory_space<vmem>> -> memref<1x128xf32, #tpu.memory_space<vmem>>
    tpu.wait_dma2 semaphore(%arg8 : memref<!tpu.dma_semaphore, #tpu.memory_space<semaphore_mem>>) src(%361 : memref<1x128xf32, #tpu.memory_space<any>>) dst(%362 : memref<1x128xf32, #tpu.memory_space<vmem>>)
    %c0_i32_255 = arith.constant 0 : i32
    %363 = tpu.memref_slice %arg3[%108, %c0_i32_255] : memref<64x128xf32, #tpu.memory_space<any>> -> memref<1x128xf32, #tpu.memory_space<any>>
    %c21_i32_256 = arith.constant 21 : i32
    %c0_i32_257 = arith.constant 0 : i32
    %364 = tpu.memref_slice %arg7[%c21_i32_256, %c0_i32_257] : memref<64x128xf32, #tpu.memory_space<vmem>> -> memref<1x128xf32, #tpu.memory_space<vmem>>
    tpu.wait_dma2 semaphore(%arg8 : memref<!tpu.dma_semaphore, #tpu.memory_space<semaphore_mem>>) src(%363 : memref<1x128xf32, #tpu.memory_space<any>>) dst(%364 : memref<1x128xf32, #tpu.memory_space<vmem>>)
    %c0_i32_258 = arith.constant 0 : i32
    %365 = tpu.memref_slice %arg3[%113, %c0_i32_258] : memref<64x128xf32, #tpu.memory_space<any>> -> memref<1x128xf32, #tpu.memory_space<any>>
    %c22_i32_259 = arith.constant 22 : i32
    %c0_i32_260 = arith.constant 0 : i32
    %366 = tpu.memref_slice %arg7[%c22_i32_259, %c0_i32_260] : memref<64x128xf32, #tpu.memory_space<vmem>> -> memref<1x128xf32, #tpu.memory_space<vmem>>
    tpu.wait_dma2 semaphore(%arg8 : memref<!tpu.dma_semaphore, #tpu.memory_space<semaphore_mem>>) src(%365 : memref<1x128xf32, #tpu.memory_space<any>>) dst(%366 : memref<1x128xf32, #tpu.memory_space<vmem>>)
    %c0_i32_261 = arith.constant 0 : i32
    %367 = tpu.memref_slice %arg3[%118, %c0_i32_261] : memref<64x128xf32, #tpu.memory_space<any>> -> memref<1x128xf32, #tpu.memory_space<any>>
    %c23_i32_262 = arith.constant 23 : i32
    %c0_i32_263 = arith.constant 0 : i32
    %368 = tpu.memref_slice %arg7[%c23_i32_262, %c0_i32_263] : memref<64x128xf32, #tpu.memory_space<vmem>> -> memref<1x128xf32, #tpu.memory_space<vmem>>
    tpu.wait_dma2 semaphore(%arg8 : memref<!tpu.dma_semaphore, #tpu.memory_space<semaphore_mem>>) src(%367 : memref<1x128xf32, #tpu.memory_space<any>>) dst(%368 : memref<1x128xf32, #tpu.memory_space<vmem>>)
    %c0_i32_264 = arith.constant 0 : i32
    %369 = tpu.memref_slice %arg3[%123, %c0_i32_264] : memref<64x128xf32, #tpu.memory_space<any>> -> memref<1x128xf32, #tpu.memory_space<any>>
    %c24_i32_265 = arith.constant 24 : i32
    %c0_i32_266 = arith.constant 0 : i32
    %370 = tpu.memref_slice %arg7[%c24_i32_265, %c0_i32_266] : memref<64x128xf32, #tpu.memory_space<vmem>> -> memref<1x128xf32, #tpu.memory_space<vmem>>
    tpu.wait_dma2 semaphore(%arg8 : memref<!tpu.dma_semaphore, #tpu.memory_space<semaphore_mem>>) src(%369 : memref<1x128xf32, #tpu.memory_space<any>>) dst(%370 : memref<1x128xf32, #tpu.memory_space<vmem>>)
    %c0_i32_267 = arith.constant 0 : i32
    %371 = tpu.memref_slice %arg3[%128, %c0_i32_267] : memref<64x128xf32, #tpu.memory_space<any>> -> memref<1x128xf32, #tpu.memory_space<any>>
    %c25_i32_268 = arith.constant 25 : i32
    %c0_i32_269 = arith.constant 0 : i32
    %372 = tpu.memref_slice %arg7[%c25_i32_268, %c0_i32_269] : memref<64x128xf32, #tpu.memory_space<vmem>> -> memref<1x128xf32, #tpu.memory_space<vmem>>
    tpu.wait_dma2 semaphore(%arg8 : memref<!tpu.dma_semaphore, #tpu.memory_space<semaphore_mem>>) src(%371 : memref<1x128xf32, #tpu.memory_space<any>>) dst(%372 : memref<1x128xf32, #tpu.memory_space<vmem>>)
    %c0_i32_270 = arith.constant 0 : i32
    %373 = tpu.memref_slice %arg3[%133, %c0_i32_270] : memref<64x128xf32, #tpu.memory_space<any>> -> memref<1x128xf32, #tpu.memory_space<any>>
    %c26_i32_271 = arith.constant 26 : i32
    %c0_i32_272 = arith.constant 0 : i32
    %374 = tpu.memref_slice %arg7[%c26_i32_271, %c0_i32_272] : memref<64x128xf32, #tpu.memory_space<vmem>> -> memref<1x128xf32, #tpu.memory_space<vmem>>
    tpu.wait_dma2 semaphore(%arg8 : memref<!tpu.dma_semaphore, #tpu.memory_space<semaphore_mem>>) src(%373 : memref<1x128xf32, #tpu.memory_space<any>>) dst(%374 : memref<1x128xf32, #tpu.memory_space<vmem>>)
    %c0_i32_273 = arith.constant 0 : i32
    %375 = tpu.memref_slice %arg3[%138, %c0_i32_273] : memref<64x128xf32, #tpu.memory_space<any>> -> memref<1x128xf32, #tpu.memory_space<any>>
    %c27_i32_274 = arith.constant 27 : i32
    %c0_i32_275 = arith.constant 0 : i32
    %376 = tpu.memref_slice %arg7[%c27_i32_274, %c0_i32_275] : memref<64x128xf32, #tpu.memory_space<vmem>> -> memref<1x128xf32, #tpu.memory_space<vmem>>
    tpu.wait_dma2 semaphore(%arg8 : memref<!tpu.dma_semaphore, #tpu.memory_space<semaphore_mem>>) src(%375 : memref<1x128xf32, #tpu.memory_space<any>>) dst(%376 : memref<1x128xf32, #tpu.memory_space<vmem>>)
    %c0_i32_276 = arith.constant 0 : i32
    %377 = tpu.memref_slice %arg3[%143, %c0_i32_276] : memref<64x128xf32, #tpu.memory_space<any>> -> memref<1x128xf32, #tpu.memory_space<any>>
    %c28_i32_277 = arith.constant 28 : i32
    %c0_i32_278 = arith.constant 0 : i32
    %378 = tpu.memref_slice %arg7[%c28_i32_277, %c0_i32_278] : memref<64x128xf32, #tpu.memory_space<vmem>> -> memref<1x128xf32, #tpu.memory_space<vmem>>
    tpu.wait_dma2 semaphore(%arg8 : memref<!tpu.dma_semaphore, #tpu.memory_space<semaphore_mem>>) src(%377 : memref<1x128xf32, #tpu.memory_space<any>>) dst(%378 : memref<1x128xf32, #tpu.memory_space<vmem>>)
    %c0_i32_279 = arith.constant 0 : i32
    %379 = tpu.memref_slice %arg3[%148, %c0_i32_279] : memref<64x128xf32, #tpu.memory_space<any>> -> memref<1x128xf32, #tpu.memory_space<any>>
    %c29_i32_280 = arith.constant 29 : i32
    %c0_i32_281 = arith.constant 0 : i32
    %380 = tpu.memref_slice %arg7[%c29_i32_280, %c0_i32_281] : memref<64x128xf32, #tpu.memory_space<vmem>> -> memref<1x128xf32, #tpu.memory_space<vmem>>
    tpu.wait_dma2 semaphore(%arg8 : memref<!tpu.dma_semaphore, #tpu.memory_space<semaphore_mem>>) src(%379 : memref<1x128xf32, #tpu.memory_space<any>>) dst(%380 : memref<1x128xf32, #tpu.memory_space<vmem>>)
    %c0_i32_282 = arith.constant 0 : i32
    %381 = tpu.memref_slice %arg3[%153, %c0_i32_282] : memref<64x128xf32, #tpu.memory_space<any>> -> memref<1x128xf32, #tpu.memory_space<any>>
    %c30_i32_283 = arith.constant 30 : i32
    %c0_i32_284 = arith.constant 0 : i32
    %382 = tpu.memref_slice %arg7[%c30_i32_283, %c0_i32_284] : memref<64x128xf32, #tpu.memory_space<vmem>> -> memref<1x128xf32, #tpu.memory_space<vmem>>
    tpu.wait_dma2 semaphore(%arg8 : memref<!tpu.dma_semaphore, #tpu.memory_space<semaphore_mem>>) src(%381 : memref<1x128xf32, #tpu.memory_space<any>>) dst(%382 : memref<1x128xf32, #tpu.memory_space<vmem>>)
    %c0_i32_285 = arith.constant 0 : i32
    %383 = tpu.memref_slice %arg3[%158, %c0_i32_285] : memref<64x128xf32, #tpu.memory_space<any>> -> memref<1x128xf32, #tpu.memory_space<any>>
    %c31_i32_286 = arith.constant 31 : i32
    %c0_i32_287 = arith.constant 0 : i32
    %384 = tpu.memref_slice %arg7[%c31_i32_286, %c0_i32_287] : memref<64x128xf32, #tpu.memory_space<vmem>> -> memref<1x128xf32, #tpu.memory_space<vmem>>
    tpu.wait_dma2 semaphore(%arg8 : memref<!tpu.dma_semaphore, #tpu.memory_space<semaphore_mem>>) src(%383 : memref<1x128xf32, #tpu.memory_space<any>>) dst(%384 : memref<1x128xf32, #tpu.memory_space<vmem>>)
    %c0_i32_288 = arith.constant 0 : i32
    %385 = tpu.memref_slice %arg3[%163, %c0_i32_288] : memref<64x128xf32, #tpu.memory_space<any>> -> memref<1x128xf32, #tpu.memory_space<any>>
    %c32_i32_289 = arith.constant 32 : i32
    %c0_i32_290 = arith.constant 0 : i32
    %386 = tpu.memref_slice %arg7[%c32_i32_289, %c0_i32_290] : memref<64x128xf32, #tpu.memory_space<vmem>> -> memref<1x128xf32, #tpu.memory_space<vmem>>
    tpu.wait_dma2 semaphore(%arg8 : memref<!tpu.dma_semaphore, #tpu.memory_space<semaphore_mem>>) src(%385 : memref<1x128xf32, #tpu.memory_space<any>>) dst(%386 : memref<1x128xf32, #tpu.memory_space<vmem>>)
    %c0_i32_291 = arith.constant 0 : i32
    %387 = tpu.memref_slice %arg3[%168, %c0_i32_291] : memref<64x128xf32, #tpu.memory_space<any>> -> memref<1x128xf32, #tpu.memory_space<any>>
    %c33_i32_292 = arith.constant 33 : i32
    %c0_i32_293 = arith.constant 0 : i32
    %388 = tpu.memref_slice %arg7[%c33_i32_292, %c0_i32_293] : memref<64x128xf32, #tpu.memory_space<vmem>> -> memref<1x128xf32, #tpu.memory_space<vmem>>
    tpu.wait_dma2 semaphore(%arg8 : memref<!tpu.dma_semaphore, #tpu.memory_space<semaphore_mem>>) src(%387 : memref<1x128xf32, #tpu.memory_space<any>>) dst(%388 : memref<1x128xf32, #tpu.memory_space<vmem>>)
    %c0_i32_294 = arith.constant 0 : i32
    %389 = tpu.memref_slice %arg3[%173, %c0_i32_294] : memref<64x128xf32, #tpu.memory_space<any>> -> memref<1x128xf32, #tpu.memory_space<any>>
    %c34_i32_295 = arith.constant 34 : i32
    %c0_i32_296 = arith.constant 0 : i32
    %390 = tpu.memref_slice %arg7[%c34_i32_295, %c0_i32_296] : memref<64x128xf32, #tpu.memory_space<vmem>> -> memref<1x128xf32, #tpu.memory_space<vmem>>
    tpu.wait_dma2 semaphore(%arg8 : memref<!tpu.dma_semaphore, #tpu.memory_space<semaphore_mem>>) src(%389 : memref<1x128xf32, #tpu.memory_space<any>>) dst(%390 : memref<1x128xf32, #tpu.memory_space<vmem>>)
    %c0_i32_297 = arith.constant 0 : i32
    %391 = tpu.memref_slice %arg3[%178, %c0_i32_297] : memref<64x128xf32, #tpu.memory_space<any>> -> memref<1x128xf32, #tpu.memory_space<any>>
    %c35_i32_298 = arith.constant 35 : i32
    %c0_i32_299 = arith.constant 0 : i32
    %392 = tpu.memref_slice %arg7[%c35_i32_298, %c0_i32_299] : memref<64x128xf32, #tpu.memory_space<vmem>> -> memref<1x128xf32, #tpu.memory_space<vmem>>
    tpu.wait_dma2 semaphore(%arg8 : memref<!tpu.dma_semaphore, #tpu.memory_space<semaphore_mem>>) src(%391 : memref<1x128xf32, #tpu.memory_space<any>>) dst(%392 : memref<1x128xf32, #tpu.memory_space<vmem>>)
    %c0_i32_300 = arith.constant 0 : i32
    %393 = tpu.memref_slice %arg3[%183, %c0_i32_300] : memref<64x128xf32, #tpu.memory_space<any>> -> memref<1x128xf32, #tpu.memory_space<any>>
    %c36_i32_301 = arith.constant 36 : i32
    %c0_i32_302 = arith.constant 0 : i32
    %394 = tpu.memref_slice %arg7[%c36_i32_301, %c0_i32_302] : memref<64x128xf32, #tpu.memory_space<vmem>> -> memref<1x128xf32, #tpu.memory_space<vmem>>
    tpu.wait_dma2 semaphore(%arg8 : memref<!tpu.dma_semaphore, #tpu.memory_space<semaphore_mem>>) src(%393 : memref<1x128xf32, #tpu.memory_space<any>>) dst(%394 : memref<1x128xf32, #tpu.memory_space<vmem>>)
    %c0_i32_303 = arith.constant 0 : i32
    %395 = tpu.memref_slice %arg3[%188, %c0_i32_303] : memref<64x128xf32, #tpu.memory_space<any>> -> memref<1x128xf32, #tpu.memory_space<any>>
    %c37_i32_304 = arith.constant 37 : i32
    %c0_i32_305 = arith.constant 0 : i32
    %396 = tpu.memref_slice %arg7[%c37_i32_304, %c0_i32_305] : memref<64x128xf32, #tpu.memory_space<vmem>> -> memref<1x128xf32, #tpu.memory_space<vmem>>
    tpu.wait_dma2 semaphore(%arg8 : memref<!tpu.dma_semaphore, #tpu.memory_space<semaphore_mem>>) src(%395 : memref<1x128xf32, #tpu.memory_space<any>>) dst(%396 : memref<1x128xf32, #tpu.memory_space<vmem>>)
    %c0_i32_306 = arith.constant 0 : i32
    %397 = tpu.memref_slice %arg3[%193, %c0_i32_306] : memref<64x128xf32, #tpu.memory_space<any>> -> memref<1x128xf32, #tpu.memory_space<any>>
    %c38_i32_307 = arith.constant 38 : i32
    %c0_i32_308 = arith.constant 0 : i32
    %398 = tpu.memref_slice %arg7[%c38_i32_307, %c0_i32_308] : memref<64x128xf32, #tpu.memory_space<vmem>> -> memref<1x128xf32, #tpu.memory_space<vmem>>
    tpu.wait_dma2 semaphore(%arg8 : memref<!tpu.dma_semaphore, #tpu.memory_space<semaphore_mem>>) src(%397 : memref<1x128xf32, #tpu.memory_space<any>>) dst(%398 : memref<1x128xf32, #tpu.memory_space<vmem>>)
    %c0_i32_309 = arith.constant 0 : i32
    %399 = tpu.memref_slice %arg3[%198, %c0_i32_309] : memref<64x128xf32, #tpu.memory_space<any>> -> memref<1x128xf32, #tpu.memory_space<any>>
    %c39_i32_310 = arith.constant 39 : i32
    %c0_i32_311 = arith.constant 0 : i32
    %400 = tpu.memref_slice %arg7[%c39_i32_310, %c0_i32_311] : memref<64x128xf32, #tpu.memory_space<vmem>> -> memref<1x128xf32, #tpu.memory_space<vmem>>
    tpu.wait_dma2 semaphore(%arg8 : memref<!tpu.dma_semaphore, #tpu.memory_space<semaphore_mem>>) src(%399 : memref<1x128xf32, #tpu.memory_space<any>>) dst(%400 : memref<1x128xf32, #tpu.memory_space<vmem>>)
    %c0_i32_312 = arith.constant 0 : i32
    %401 = tpu.memref_slice %arg3[%203, %c0_i32_312] : memref<64x128xf32, #tpu.memory_space<any>> -> memref<1x128xf32, #tpu.memory_space<any>>
    %c40_i32_313 = arith.constant 40 : i32
    %c0_i32_314 = arith.constant 0 : i32
    %402 = tpu.memref_slice %arg7[%c40_i32_313, %c0_i32_314] : memref<64x128xf32, #tpu.memory_space<vmem>> -> memref<1x128xf32, #tpu.memory_space<vmem>>
    tpu.wait_dma2 semaphore(%arg8 : memref<!tpu.dma_semaphore, #tpu.memory_space<semaphore_mem>>) src(%401 : memref<1x128xf32, #tpu.memory_space<any>>) dst(%402 : memref<1x128xf32, #tpu.memory_space<vmem>>)
    %c0_i32_315 = arith.constant 0 : i32
    %403 = tpu.memref_slice %arg3[%208, %c0_i32_315] : memref<64x128xf32, #tpu.memory_space<any>> -> memref<1x128xf32, #tpu.memory_space<any>>
    %c41_i32_316 = arith.constant 41 : i32
    %c0_i32_317 = arith.constant 0 : i32
    %404 = tpu.memref_slice %arg7[%c41_i32_316, %c0_i32_317] : memref<64x128xf32, #tpu.memory_space<vmem>> -> memref<1x128xf32, #tpu.memory_space<vmem>>
    tpu.wait_dma2 semaphore(%arg8 : memref<!tpu.dma_semaphore, #tpu.memory_space<semaphore_mem>>) src(%403 : memref<1x128xf32, #tpu.memory_space<any>>) dst(%404 : memref<1x128xf32, #tpu.memory_space<vmem>>)
    %c0_i32_318 = arith.constant 0 : i32
    %405 = tpu.memref_slice %arg3[%213, %c0_i32_318] : memref<64x128xf32, #tpu.memory_space<any>> -> memref<1x128xf32, #tpu.memory_space<any>>
    %c42_i32_319 = arith.constant 42 : i32
    %c0_i32_320 = arith.constant 0 : i32
    %406 = tpu.memref_slice %arg7[%c42_i32_319, %c0_i32_320] : memref<64x128xf32, #tpu.memory_space<vmem>> -> memref<1x128xf32, #tpu.memory_space<vmem>>
    tpu.wait_dma2 semaphore(%arg8 : memref<!tpu.dma_semaphore, #tpu.memory_space<semaphore_mem>>) src(%405 : memref<1x128xf32, #tpu.memory_space<any>>) dst(%406 : memref<1x128xf32, #tpu.memory_space<vmem>>)
    %c0_i32_321 = arith.constant 0 : i32
    %407 = tpu.memref_slice %arg3[%218, %c0_i32_321] : memref<64x128xf32, #tpu.memory_space<any>> -> memref<1x128xf32, #tpu.memory_space<any>>
    %c43_i32_322 = arith.constant 43 : i32
    %c0_i32_323 = arith.constant 0 : i32
    %408 = tpu.memref_slice %arg7[%c43_i32_322, %c0_i32_323] : memref<64x128xf32, #tpu.memory_space<vmem>> -> memref<1x128xf32, #tpu.memory_space<vmem>>
    tpu.wait_dma2 semaphore(%arg8 : memref<!tpu.dma_semaphore, #tpu.memory_space<semaphore_mem>>) src(%407 : memref<1x128xf32, #tpu.memory_space<any>>) dst(%408 : memref<1x128xf32, #tpu.memory_space<vmem>>)
    %c0_i32_324 = arith.constant 0 : i32
    %409 = tpu.memref_slice %arg3[%223, %c0_i32_324] : memref<64x128xf32, #tpu.memory_space<any>> -> memref<1x128xf32, #tpu.memory_space<any>>
    %c44_i32_325 = arith.constant 44 : i32
    %c0_i32_326 = arith.constant 0 : i32
    %410 = tpu.memref_slice %arg7[%c44_i32_325, %c0_i32_326] : memref<64x128xf32, #tpu.memory_space<vmem>> -> memref<1x128xf32, #tpu.memory_space<vmem>>
    tpu.wait_dma2 semaphore(%arg8 : memref<!tpu.dma_semaphore, #tpu.memory_space<semaphore_mem>>) src(%409 : memref<1x128xf32, #tpu.memory_space<any>>) dst(%410 : memref<1x128xf32, #tpu.memory_space<vmem>>)
    %c0_i32_327 = arith.constant 0 : i32
    %411 = tpu.memref_slice %arg3[%228, %c0_i32_327] : memref<64x128xf32, #tpu.memory_space<any>> -> memref<1x128xf32, #tpu.memory_space<any>>
    %c45_i32_328 = arith.constant 45 : i32
    %c0_i32_329 = arith.constant 0 : i32
    %412 = tpu.memref_slice %arg7[%c45_i32_328, %c0_i32_329] : memref<64x128xf32, #tpu.memory_space<vmem>> -> memref<1x128xf32, #tpu.memory_space<vmem>>
    tpu.wait_dma2 semaphore(%arg8 : memref<!tpu.dma_semaphore, #tpu.memory_space<semaphore_mem>>) src(%411 : memref<1x128xf32, #tpu.memory_space<any>>) dst(%412 : memref<1x128xf32, #tpu.memory_space<vmem>>)
    %c0_i32_330 = arith.constant 0 : i32
    %413 = tpu.memref_slice %arg3[%233, %c0_i32_330] : memref<64x128xf32, #tpu.memory_space<any>> -> memref<1x128xf32, #tpu.memory_space<any>>
    %c46_i32_331 = arith.constant 46 : i32
    %c0_i32_332 = arith.constant 0 : i32
    %414 = tpu.memref_slice %arg7[%c46_i32_331, %c0_i32_332] : memref<64x128xf32, #tpu.memory_space<vmem>> -> memref<1x128xf32, #tpu.memory_space<vmem>>
    tpu.wait_dma2 semaphore(%arg8 : memref<!tpu.dma_semaphore, #tpu.memory_space<semaphore_mem>>) src(%413 : memref<1x128xf32, #tpu.memory_space<any>>) dst(%414 : memref<1x128xf32, #tpu.memory_space<vmem>>)
    %c0_i32_333 = arith.constant 0 : i32
    %415 = tpu.memref_slice %arg3[%238, %c0_i32_333] : memref<64x128xf32, #tpu.memory_space<any>> -> memref<1x128xf32, #tpu.memory_space<any>>
    %c47_i32_334 = arith.constant 47 : i32
    %c0_i32_335 = arith.constant 0 : i32
    %416 = tpu.memref_slice %arg7[%c47_i32_334, %c0_i32_335] : memref<64x128xf32, #tpu.memory_space<vmem>> -> memref<1x128xf32, #tpu.memory_space<vmem>>
    tpu.wait_dma2 semaphore(%arg8 : memref<!tpu.dma_semaphore, #tpu.memory_space<semaphore_mem>>) src(%415 : memref<1x128xf32, #tpu.memory_space<any>>) dst(%416 : memref<1x128xf32, #tpu.memory_space<vmem>>)
    %c0_i32_336 = arith.constant 0 : i32
    %417 = tpu.memref_slice %arg3[%243, %c0_i32_336] : memref<64x128xf32, #tpu.memory_space<any>> -> memref<1x128xf32, #tpu.memory_space<any>>
    %c48_i32_337 = arith.constant 48 : i32
    %c0_i32_338 = arith.constant 0 : i32
    %418 = tpu.memref_slice %arg7[%c48_i32_337, %c0_i32_338] : memref<64x128xf32, #tpu.memory_space<vmem>> -> memref<1x128xf32, #tpu.memory_space<vmem>>
    tpu.wait_dma2 semaphore(%arg8 : memref<!tpu.dma_semaphore, #tpu.memory_space<semaphore_mem>>) src(%417 : memref<1x128xf32, #tpu.memory_space<any>>) dst(%418 : memref<1x128xf32, #tpu.memory_space<vmem>>)
    %c0_i32_339 = arith.constant 0 : i32
    %419 = tpu.memref_slice %arg3[%248, %c0_i32_339] : memref<64x128xf32, #tpu.memory_space<any>> -> memref<1x128xf32, #tpu.memory_space<any>>
    %c49_i32_340 = arith.constant 49 : i32
    %c0_i32_341 = arith.constant 0 : i32
    %420 = tpu.memref_slice %arg7[%c49_i32_340, %c0_i32_341] : memref<64x128xf32, #tpu.memory_space<vmem>> -> memref<1x128xf32, #tpu.memory_space<vmem>>
    tpu.wait_dma2 semaphore(%arg8 : memref<!tpu.dma_semaphore, #tpu.memory_space<semaphore_mem>>) src(%419 : memref<1x128xf32, #tpu.memory_space<any>>) dst(%420 : memref<1x128xf32, #tpu.memory_space<vmem>>)
    %c0_i32_342 = arith.constant 0 : i32
    %421 = tpu.memref_slice %arg3[%253, %c0_i32_342] : memref<64x128xf32, #tpu.memory_space<any>> -> memref<1x128xf32, #tpu.memory_space<any>>
    %c50_i32_343 = arith.constant 50 : i32
    %c0_i32_344 = arith.constant 0 : i32
    %422 = tpu.memref_slice %arg7[%c50_i32_343, %c0_i32_344] : memref<64x128xf32, #tpu.memory_space<vmem>> -> memref<1x128xf32, #tpu.memory_space<vmem>>
    tpu.wait_dma2 semaphore(%arg8 : memref<!tpu.dma_semaphore, #tpu.memory_space<semaphore_mem>>) src(%421 : memref<1x128xf32, #tpu.memory_space<any>>) dst(%422 : memref<1x128xf32, #tpu.memory_space<vmem>>)
    %c0_i32_345 = arith.constant 0 : i32
    %423 = tpu.memref_slice %arg3[%258, %c0_i32_345] : memref<64x128xf32, #tpu.memory_space<any>> -> memref<1x128xf32, #tpu.memory_space<any>>
    %c51_i32_346 = arith.constant 51 : i32
    %c0_i32_347 = arith.constant 0 : i32
    %424 = tpu.memref_slice %arg7[%c51_i32_346, %c0_i32_347] : memref<64x128xf32, #tpu.memory_space<vmem>> -> memref<1x128xf32, #tpu.memory_space<vmem>>
    tpu.wait_dma2 semaphore(%arg8 : memref<!tpu.dma_semaphore, #tpu.memory_space<semaphore_mem>>) src(%423 : memref<1x128xf32, #tpu.memory_space<any>>) dst(%424 : memref<1x128xf32, #tpu.memory_space<vmem>>)
    %c0_i32_348 = arith.constant 0 : i32
    %425 = tpu.memref_slice %arg3[%263, %c0_i32_348] : memref<64x128xf32, #tpu.memory_space<any>> -> memref<1x128xf32, #tpu.memory_space<any>>
    %c52_i32_349 = arith.constant 52 : i32
    %c0_i32_350 = arith.constant 0 : i32
    %426 = tpu.memref_slice %arg7[%c52_i32_349, %c0_i32_350] : memref<64x128xf32, #tpu.memory_space<vmem>> -> memref<1x128xf32, #tpu.memory_space<vmem>>
    tpu.wait_dma2 semaphore(%arg8 : memref<!tpu.dma_semaphore, #tpu.memory_space<semaphore_mem>>) src(%425 : memref<1x128xf32, #tpu.memory_space<any>>) dst(%426 : memref<1x128xf32, #tpu.memory_space<vmem>>)
    %c0_i32_351 = arith.constant 0 : i32
    %427 = tpu.memref_slice %arg3[%268, %c0_i32_351] : memref<64x128xf32, #tpu.memory_space<any>> -> memref<1x128xf32, #tpu.memory_space<any>>
    %c53_i32_352 = arith.constant 53 : i32
    %c0_i32_353 = arith.constant 0 : i32
    %428 = tpu.memref_slice %arg7[%c53_i32_352, %c0_i32_353] : memref<64x128xf32, #tpu.memory_space<vmem>> -> memref<1x128xf32, #tpu.memory_space<vmem>>
    tpu.wait_dma2 semaphore(%arg8 : memref<!tpu.dma_semaphore, #tpu.memory_space<semaphore_mem>>) src(%427 : memref<1x128xf32, #tpu.memory_space<any>>) dst(%428 : memref<1x128xf32, #tpu.memory_space<vmem>>)
    %c0_i32_354 = arith.constant 0 : i32
    %429 = tpu.memref_slice %arg3[%273, %c0_i32_354] : memref<64x128xf32, #tpu.memory_space<any>> -> memref<1x128xf32, #tpu.memory_space<any>>
    %c54_i32_355 = arith.constant 54 : i32
    %c0_i32_356 = arith.constant 0 : i32
    %430 = tpu.memref_slice %arg7[%c54_i32_355, %c0_i32_356] : memref<64x128xf32, #tpu.memory_space<vmem>> -> memref<1x128xf32, #tpu.memory_space<vmem>>
    tpu.wait_dma2 semaphore(%arg8 : memref<!tpu.dma_semaphore, #tpu.memory_space<semaphore_mem>>) src(%429 : memref<1x128xf32, #tpu.memory_space<any>>) dst(%430 : memref<1x128xf32, #tpu.memory_space<vmem>>)
    %c0_i32_357 = arith.constant 0 : i32
    %431 = tpu.memref_slice %arg3[%278, %c0_i32_357] : memref<64x128xf32, #tpu.memory_space<any>> -> memref<1x128xf32, #tpu.memory_space<any>>
    %c55_i32_358 = arith.constant 55 : i32
    %c0_i32_359 = arith.constant 0 : i32
    %432 = tpu.memref_slice %arg7[%c55_i32_358, %c0_i32_359] : memref<64x128xf32, #tpu.memory_space<vmem>> -> memref<1x128xf32, #tpu.memory_space<vmem>>
    tpu.wait_dma2 semaphore(%arg8 : memref<!tpu.dma_semaphore, #tpu.memory_space<semaphore_mem>>) src(%431 : memref<1x128xf32, #tpu.memory_space<any>>) dst(%432 : memref<1x128xf32, #tpu.memory_space<vmem>>)
    %c0_i32_360 = arith.constant 0 : i32
    %433 = tpu.memref_slice %arg3[%283, %c0_i32_360] : memref<64x128xf32, #tpu.memory_space<any>> -> memref<1x128xf32, #tpu.memory_space<any>>
    %c56_i32_361 = arith.constant 56 : i32
    %c0_i32_362 = arith.constant 0 : i32
    %434 = tpu.memref_slice %arg7[%c56_i32_361, %c0_i32_362] : memref<64x128xf32, #tpu.memory_space<vmem>> -> memref<1x128xf32, #tpu.memory_space<vmem>>
    tpu.wait_dma2 semaphore(%arg8 : memref<!tpu.dma_semaphore, #tpu.memory_space<semaphore_mem>>) src(%433 : memref<1x128xf32, #tpu.memory_space<any>>) dst(%434 : memref<1x128xf32, #tpu.memory_space<vmem>>)
    %c0_i32_363 = arith.constant 0 : i32
    %435 = tpu.memref_slice %arg3[%288, %c0_i32_363] : memref<64x128xf32, #tpu.memory_space<any>> -> memref<1x128xf32, #tpu.memory_space<any>>
    %c57_i32_364 = arith.constant 57 : i32
    %c0_i32_365 = arith.constant 0 : i32
    %436 = tpu.memref_slice %arg7[%c57_i32_364, %c0_i32_365] : memref<64x128xf32, #tpu.memory_space<vmem>> -> memref<1x128xf32, #tpu.memory_space<vmem>>
    tpu.wait_dma2 semaphore(%arg8 : memref<!tpu.dma_semaphore, #tpu.memory_space<semaphore_mem>>) src(%435 : memref<1x128xf32, #tpu.memory_space<any>>) dst(%436 : memref<1x128xf32, #tpu.memory_space<vmem>>)
    %c0_i32_366 = arith.constant 0 : i32
    %437 = tpu.memref_slice %arg3[%293, %c0_i32_366] : memref<64x128xf32, #tpu.memory_space<any>> -> memref<1x128xf32, #tpu.memory_space<any>>
    %c58_i32_367 = arith.constant 58 : i32
    %c0_i32_368 = arith.constant 0 : i32
    %438 = tpu.memref_slice %arg7[%c58_i32_367, %c0_i32_368] : memref<64x128xf32, #tpu.memory_space<vmem>> -> memref<1x128xf32, #tpu.memory_space<vmem>>
    tpu.wait_dma2 semaphore(%arg8 : memref<!tpu.dma_semaphore, #tpu.memory_space<semaphore_mem>>) src(%437 : memref<1x128xf32, #tpu.memory_space<any>>) dst(%438 : memref<1x128xf32, #tpu.memory_space<vmem>>)
    %c0_i32_369 = arith.constant 0 : i32
    %439 = tpu.memref_slice %arg3[%298, %c0_i32_369] : memref<64x128xf32, #tpu.memory_space<any>> -> memref<1x128xf32, #tpu.memory_space<any>>
    %c59_i32_370 = arith.constant 59 : i32
    %c0_i32_371 = arith.constant 0 : i32
    %440 = tpu.memref_slice %arg7[%c59_i32_370, %c0_i32_371] : memref<64x128xf32, #tpu.memory_space<vmem>> -> memref<1x128xf32, #tpu.memory_space<vmem>>
    tpu.wait_dma2 semaphore(%arg8 : memref<!tpu.dma_semaphore, #tpu.memory_space<semaphore_mem>>) src(%439 : memref<1x128xf32, #tpu.memory_space<any>>) dst(%440 : memref<1x128xf32, #tpu.memory_space<vmem>>)
    %c0_i32_372 = arith.constant 0 : i32
    %441 = tpu.memref_slice %arg3[%303, %c0_i32_372] : memref<64x128xf32, #tpu.memory_space<any>> -> memref<1x128xf32, #tpu.memory_space<any>>
    %c60_i32_373 = arith.constant 60 : i32
    %c0_i32_374 = arith.constant 0 : i32
    %442 = tpu.memref_slice %arg7[%c60_i32_373, %c0_i32_374] : memref<64x128xf32, #tpu.memory_space<vmem>> -> memref<1x128xf32, #tpu.memory_space<vmem>>
    tpu.wait_dma2 semaphore(%arg8 : memref<!tpu.dma_semaphore, #tpu.memory_space<semaphore_mem>>) src(%441 : memref<1x128xf32, #tpu.memory_space<any>>) dst(%442 : memref<1x128xf32, #tpu.memory_space<vmem>>)
    %c0_i32_375 = arith.constant 0 : i32
    %443 = tpu.memref_slice %arg3[%308, %c0_i32_375] : memref<64x128xf32, #tpu.memory_space<any>> -> memref<1x128xf32, #tpu.memory_space<any>>
    %c61_i32_376 = arith.constant 61 : i32
    %c0_i32_377 = arith.constant 0 : i32
    %444 = tpu.memref_slice %arg7[%c61_i32_376, %c0_i32_377] : memref<64x128xf32, #tpu.memory_space<vmem>> -> memref<1x128xf32, #tpu.memory_space<vmem>>
    tpu.wait_dma2 semaphore(%arg8 : memref<!tpu.dma_semaphore, #tpu.memory_space<semaphore_mem>>) src(%443 : memref<1x128xf32, #tpu.memory_space<any>>) dst(%444 : memref<1x128xf32, #tpu.memory_space<vmem>>)
    %c0_i32_378 = arith.constant 0 : i32
    %445 = tpu.memref_slice %arg3[%313, %c0_i32_378] : memref<64x128xf32, #tpu.memory_space<any>> -> memref<1x128xf32, #tpu.memory_space<any>>
    %c62_i32_379 = arith.constant 62 : i32
    %c0_i32_380 = arith.constant 0 : i32
    %446 = tpu.memref_slice %arg7[%c62_i32_379, %c0_i32_380] : memref<64x128xf32, #tpu.memory_space<vmem>> -> memref<1x128xf32, #tpu.memory_space<vmem>>
    tpu.wait_dma2 semaphore(%arg8 : memref<!tpu.dma_semaphore, #tpu.memory_space<semaphore_mem>>) src(%445 : memref<1x128xf32, #tpu.memory_space<any>>) dst(%446 : memref<1x128xf32, #tpu.memory_space<vmem>>)
    %c0_i32_381 = arith.constant 0 : i32
    %447 = tpu.memref_slice %arg3[%318, %c0_i32_381] : memref<64x128xf32, #tpu.memory_space<any>> -> memref<1x128xf32, #tpu.memory_space<any>>
    %c63_i32_382 = arith.constant 63 : i32
    %c0_i32_383 = arith.constant 0 : i32
    %448 = tpu.memref_slice %arg7[%c63_i32_382, %c0_i32_383] : memref<64x128xf32, #tpu.memory_space<vmem>> -> memref<1x128xf32, #tpu.memory_space<vmem>>
    tpu.wait_dma2 semaphore(%arg8 : memref<!tpu.dma_semaphore, #tpu.memory_space<semaphore_mem>>) src(%447 : memref<1x128xf32, #tpu.memory_space<any>>) dst(%448 : memref<1x128xf32, #tpu.memory_space<vmem>>)
    %c0 = arith.constant 0 : index
    %c0_384 = arith.constant 0 : index
    %449 = vector.load %arg7[%c0, %c0_384] : memref<64x128xf32, #tpu.memory_space<vmem>>, vector<64x128xf32>
    %450 = vector.shape_cast %449 : vector<64x128xf32> to vector<8x8x128xf32>
    %c0_385 = arith.constant 0 : index
    %c0_386 = arith.constant 0 : index
    %451 = vector.load %arg2[%c0_385, %c0_386] : memref<8x8xi32, #tpu.memory_space<vmem>>, vector<8x8xi32>
    %c0_i32_387 = arith.constant 0 : i32
    %452 = vector.broadcast %c0_i32_387 : i32 to vector<8x8xi32>
    %453 = arith.cmpi ne, %451, %452 : vector<8x8xi32>
    %454 = vector.extract_strided_slice %450 {offsets = [0, 0, 0], sizes = [8, 1, 128], strides = [1, 1, 1]} : vector<8x8x128xf32> to vector<8x1x128xf32>
    %455 = vector.broadcast %454 : vector<8x1x128xf32> to vector<8x8x128xf32>
    %456 = arith.mulf %450, %455 : vector<8x8x128xf32>
    %cst = arith.constant dense<0.000000e+00> : vector<8x8xf32>
    %457 = vector.multi_reduction <add>, %456, %cst [2] : vector<8x8x128xf32> to vector<8x8xf32>
    %cst_388 = arith.constant 0.0883883461 : f32
    %458 = vector.broadcast %cst_388 : f32 to vector<8x8xf32>
    %459 = arith.mulf %457, %458 : vector<8x8xf32>
    %cst_389 = arith.constant -1.000000e+30 : f32
    %460 = vector.broadcast %cst_389 : f32 to vector<8x8xf32>
    %461 = arith.select %453, %459, %460 : vector<8x8xi1>, vector<8x8xf32>
    %cst_390 = arith.constant dense<0xFF800000> : vector<8xf32>
    %462 = vector.multi_reduction <maximumf>, %461, %cst_390 [1] : vector<8x8xf32> to vector<8xf32>
    %463 = vector.shape_cast %462 : vector<8xf32> to vector<8x1xf32>
    %464 = vector.broadcast %463 : vector<8x1xf32> to vector<8x8xf32>
    %465 = arith.subf %461, %464 : vector<8x8xf32>
    %466 = math.exp %465 : vector<8x8xf32>
    %cst_391 = arith.constant dense<0.000000e+00> : vector<8xf32>
    %467 = vector.multi_reduction <add>, %466, %cst_391 [1] : vector<8x8xf32> to vector<8xf32>
    %468 = vector.shape_cast %467 : vector<8xf32> to vector<8x1xf32>
    %469 = tpu.reciprocal %468 {approx = true} : vector<8x1xf32> -> vector<8x1xf32>
    %470 = vector.broadcast %469 : vector<8x1xf32> to vector<8x8xf32>
    %471 = arith.mulf %466, %470 : vector<8x8xf32>
    %472 = vector.shape_cast %471 : vector<8x8xf32> to vector<8x8x1xf32>
    %473 = vector.broadcast %472 : vector<8x8x1xf32> to vector<8x8x128xf32>
    %474 = arith.mulf %450, %473 : vector<8x8x128xf32>
    %cst_392 = arith.constant dense<0.000000e+00> : vector<8x128xf32>
    %475 = vector.multi_reduction <add>, %474, %cst_392 [1] : vector<8x8x128xf32> to vector<8x128xf32>
    %476 = arith.truncf %475 : vector<8x128xf32> to vector<8x128xbf16>
    %c0_393 = arith.constant 0 : index
    %c0_394 = arith.constant 0 : index
    %477 = vector.load %arg4[%c0_393, %c0_394] : memref<128x128xbf16, #tpu.memory_space<vmem>>, vector<128x128xbf16>
    %cst_395 = arith.constant dense<0.000000e+00> : vector<8x128xf32>
    %478 = tpu.matmul %476, %477, %cst_395 {dimension_numbers = #tpu.dot_dimension_numbers<[1], [0], [0], [1], [0, 0, 1, 1], [], []>} : vector<8x128xbf16>, vector<128x128xbf16>, vector<8x128xf32> -> vector<8x128xf32>
    %c0_396 = arith.constant 0 : index
    %c0_397 = arith.constant 0 : index
    %479 = vector.load %arg5[%c0_396, %c0_397] : memref<1x128xf32, #tpu.memory_space<vmem>>, vector<1x128xf32>
    %480 = vector.broadcast %479 : vector<1x128xf32> to vector<8x128xf32>
    %481 = arith.addf %478, %480 : vector<8x128xf32>
    %482 = math.tanh %481 : vector<8x128xf32>
    %483 = arith.truncf %482 : vector<8x128xf32> to vector<8x128xbf16>
    %c0_398 = arith.constant 0 : index
    %c0_399 = arith.constant 0 : index
    %484 = vector.load %arg6[%c0_398, %c0_399] : memref<8x128xbf16, #tpu.memory_space<vmem>>, vector<8x128xbf16>
    tpu.vector_store %arg6[%c0_398, %c0_399], %483 {strides = array<i32>} : memref<8x128xbf16, #tpu.memory_space<vmem>>, vector<8x128xbf16>,
    return
  }
  func.func @transform_0(%arg0: i32, %arg1: memref<64xi32, #tpu.memory_space<smem>>) -> (i32, i32) {
    %c0_i32 = arith.constant 0 : i32
    %c0_i32_0 = arith.constant 0 : i32
    return %arg0, %c0_i32 : i32, i32
  }
  func.func @transform_2(%arg0: i32, %arg1: memref<64xi32, #tpu.memory_space<smem>>) -> (i32, i32) {
    %c0_i32 = arith.constant 0 : i32
    %c0_i32_0 = arith.constant 0 : i32
    %c0_i32_1 = arith.constant 0 : i32
    return %c0_i32, %c0_i32_0 : i32, i32
  }
  func.func @transform_3(%arg0: i32, %arg1: memref<64xi32, #tpu.memory_space<smem>>) -> (i32, i32) {
    %c0_i32 = arith.constant 0 : i32
    %c0_i32_0 = arith.constant 0 : i32
    %c0_i32_1 = arith.constant 0 : i32
    return %c0_i32, %c0_i32_0 : i32, i32
  }
  func.func @transform_4(%arg0: i32, %arg1: memref<64xi32, #tpu.memory_space<smem>>) -> (i32, i32) {
    %c0_i32 = arith.constant 0 : i32
    %c0_i32_0 = arith.constant 0 : i32
    return %arg0, %c0_i32 : i32, i32
  }
}

</mosaic_0001>

<bundles_post_ra>
// kernel: tpu_custom_call.1
= control target key start
LH: loop header
LB: loop body
LE: loop exit
PB: predicated region body
PF: predicated region fallthrough
CT: control target
= control target key end

     0   :  { %s3498_s21 = smov [#allocation5]   ;;  %s4329_s0 = inlined_call_operand.hbm [shape: s32[64], index: 0, kind: input, shape index: {}]   ;;  %s4330_s1 = inlined_call_operand.hbm [shape: s32[8,8], index: 1, kind: input, shape index: {}]   ;;  %s4331_s2 = inlined_call_operand.hbm [shape: f32[64,128], index: 2, kind: input, shape index: {}]   ;;  %s4332_s3 = inlined_call_operand.hbm [shape: bf16[128,128], index: 3, kind: input, shape index: {}]   ;;  %s4333_s4 = inlined_call_operand.vmem [shape: f32[1,128], index: 4, kind: input, shape index: {}]   ;;  %s4334_s5 = inlined_call_operand.hbm [shape: bf16[8,128], index: 5, kind: output, shape index: {}]  }
   0x1   :  { %s11_s20 = sshll.u32 %s4329_s0, 4  ;;  %s12_s20 = int_to_ptr.hbm [resolvable:$true] %s11_s20 }
   0x2   :  { %14 = dma.hbm_to_smem %s12_s20, 16, %s3498_s21, [#allocation4] }
   0x3   :  { %3488 = dma.done.wait [#allocation4], 16 }
   0x4   :  { %3489 = vsyncadd [#allocation4], 4294967280 }
   0x5   :  { %17 = sfence }
   0x6   :  { %18 = vsyncpa [#allocation7], 0 }
   0x7   :  { %19 = vsyncpa [#allocation10], 0 }
   0x8   :  { %20 = vsyncpa [#allocation8], 0  ;;  %s26_s24 = sshll.u32 %s4330_s1, 4  ;;  %s3499_s25 = smov [#allocation6]   ;;  %s27_s24 = int_to_ptr.hbm [resolvable:$true] %s26_s24 }
   0x9   :  { %s28_s26 = sshll.u32 %s3499_s25, 4  ;;  %s36_s0 = sshll.u32 %s4332_s3, 4  ;;  %s29_s26 = int_to_ptr.vmem [resolvable:$true] %s28_s26  ;;  %s37_s0 = int_to_ptr.hbm [resolvable:$true] %s36_s0 }
   0xa   :  { %31 = dma.hbm_to_vmem [thread:$0]  %s27_s24, 128, %s29_s26, [#allocation7]  }
   0xb   :  { %s3500_s29 = smov [#allocation9]   ;;  %s3501_s6 = smov 64  }
   0xc   :  { %s38_s30 = sshll.u32 %s3500_s29, 4  ;;  %s3502_s7 = smov 4   ;;  %s39_s30 = int_to_ptr.vmem [resolvable:$true] %s38_s30 }
   0xd   :  { %44 = dma.hbm_to_vmem [thread:$0]  %s37_s0, 1024, %s39_s30, [#allocation10], %s3501_s6, %s3501_s6, %s3502_s7  }
   0xe   :  { %3490 = dma.done.wait [#allocation7], 128  }
   0xf   :  { %3491 = vsyncadd [#allocation7], 4294967168 }
  0x10   :  { %3492 = dma.done.wait [#allocation10], 1024  }
  0x11   :  { %3493 = vsyncadd [#allocation10], 4294966272  ;;  %s56_s1 = sld [smem:[#allocation5]]  ;;  %s3503_s8 = smov [#allocation2]  }
  0x12   :  { %s3607_s9 = sshll.u32 %s3503_s8, 4  ;;  %s1684_s10 = sld [smem:[#allocation5 + $0x1]]  ;;  %s68_s9 = int_to_ptr.vmem [resolvable:$true] %s3607_s9 }
  0x13   :  { %s3504_s3 = smov [#allocation2 + $0x1]   ;;  %s3612_s12 = sld [smem:[#allocation5 + $0x2]] }
  0x14   :  { %s3610_s11 = sshll.u32 %s3504_s3, 4  ;;  %s3505_s13 = smov [#allocation2 + $0x2]   ;;  %s85_s11 = int_to_ptr.vmem [resolvable:$true] %s3610_s11 }
  0x15   :  { %s3615_s14 = sshll.u32 %s3505_s13, 4  ;;  %s3617_s15 = sld [smem:[#allocation5 + $0x3]]  ;;  %s102_s14 = int_to_ptr.vmem [resolvable:$true] %s3615_s14 }
  0x16   :  { %s3506_s19 = smov [#allocation2 + $0x3]   ;;  %s3631_s29 = scalar_lea.hbm %s4331_s2, 64 }
  0x17   :  { %s57_s18 = scalar_lea.hbm %s4331_s2, %s56_s1  ;;  %s3623_s20 = sshll.u32 %s3506_s19, 4  ;;  %s119_s20 = int_to_ptr.vmem [resolvable:$true] %s3623_s20 }
  0x18   :  { %s65_s21 = sshll.u32 %s57_s18, 4  ;;  %s73_s24 = scalar_lea.hbm %s4331_s2, %s1684_s10  ;;  %s66_s21 = int_to_ptr.hbm [resolvable:$true] %s65_s21 }
  0x19   :  { %s82_s25 = sshll.u32 %s73_s24, 4  ;;  %s1928_s26 = sshra.s32 %s66_s21, 4  ;;  %s1929_s26 = int_to_ptr.hbm [resolvable:$true] %s1928_s26  ;;  %s83_s25 = int_to_ptr.hbm [resolvable:$true] %s82_s25 }
  0x1a   :  { %s1930_s27 = scalar_lea.hbm %s1929_s26, 1  ;;  %p1933_p1 = scmp.lt.s32.totalorder %s1929_s26, %s4331_s2 }
  0x1b   :  { %p1931_p0 = scmp.ne.s32.totalorder %s1929_s26, %s1930_s27  ;;  %p1934_p2 = scmp.lt.s32.totalorder %s3631_s29, %s1930_s27 }
  0x1d   :  { %p1935_p3 = por %p1934_p2, %p1933_p1 }
  0x1f   :  { %p1936_p4 = pnand %p1935_p3, %p1931_p0 }
  0x21   :  { %1939 = shalt.err (!%p1936_p4)  }
  0x22   :  { %70 = dma.hbm_to_vmem [thread:$0]  %s66_s21, 16, %s68_s9, [#allocation3] }
  0x23   :  { %s90_s8 = scalar_lea.hbm %s4331_s2, %s3612_s12  ;;  %s1952_s10 = sshra.s32 %s83_s25, 4  ;;  %s1953_s10 = int_to_ptr.hbm [resolvable:$true] %s1952_s10 }
  0x24   :  { %s1954_s3 = scalar_lea.hbm %s1953_s10, 1  ;;  %p1957_p6 = scmp.lt.s32.totalorder %s1953_s10, %s4331_s2 }
  0x25   :  { %p1955_p5 = scmp.ne.s32.totalorder %s1953_s10, %s1954_s3  ;;  %p1958_p7 = scmp.lt.s32.totalorder %s3631_s29, %s1954_s3 }
  0x27   :  { %p1959_p8 = por %p1958_p7, %p1957_p6 }
  0x29   :  { %p1960_p9 = pnand %p1959_p8, %p1955_p5 }
  0x2b   :  { %1963 = shalt.err (!%p1960_p9)  }
  0x2c   :  { %87 = dma.hbm_to_vmem [thread:$0]  %s83_s25, 16, %s85_s11, [#allocation3] }
  0x2d   :  { %s99_s9 = sshll.u32 %s90_s8, 4  ;;  %s107_s18 = scalar_lea.hbm %s4331_s2, %s3617_s15  ;;  %s100_s9 = int_to_ptr.hbm [resolvable:$true] %s99_s9 }
  0x2e   :  { %s116_s19 = sshll.u32 %s107_s18, 4  ;;  %s1976_s21 = sshra.s32 %s100_s9, 4  ;;  %s1977_s21 = int_to_ptr.hbm [resolvable:$true] %s1976_s21  ;;  %s117_s19 = int_to_ptr.hbm [resolvable:$true] %s116_s19 }
  0x2f   :  { %s1978_s22 = scalar_lea.hbm %s1977_s21, 1  ;;  %p1981_p11 = scmp.lt.s32.totalorder %s1977_s21, %s4331_s2 }
  0x30   :  { %p1979_p10 = scmp.ne.s32.totalorder %s1977_s21, %s1978_s22  ;;  %p1982_p12 = scmp.lt.s32.totalorder %s3631_s29, %s1978_s22 }
  0x32   :  { %p1983_p13 = por %p1982_p12, %p1981_p11 }
  0x34   :  { %p1984_p0 = pnand %p1983_p13, %p1979_p10 }
  0x36   :  { %1987 = shalt.err (!%p1984_p0)  }
  0x37   :  { %104 = dma.hbm_to_vmem [thread:$0]  %s100_s9, 16, %s102_s14, [#allocation3] }
  0x38   :  { %s2000_s11 = sshra.s32 %s117_s19, 4  ;;  %s2001_s11 = int_to_ptr.hbm [resolvable:$true] %s2000_s11 }
  0x39   :  { %s2002_s15 = scalar_lea.hbm %s2001_s11, 1  ;;  %p2005_p2 = scmp.lt.s32.totalorder %s2001_s11, %s4331_s2 }
  0x3a   :  { %p2003_p1 = scmp.ne.s32.totalorder %s2001_s11, %s2002_s15  ;;  %p2006_p3 = scmp.lt.s32.totalorder %s3631_s29, %s2002_s15 }
  0x3c   :  { %p2007_p4 = por %p2006_p3, %p2005_p2 }
  0x3e   :  { %p2008_p5 = pnand %p2007_p4, %p2003_p1 }
  0x40   :  { %2011 = shalt.err (!%p2008_p5)  }
  0x41   :  { %121 = dma.hbm_to_vmem [thread:$0]  %s117_s19, 16, %s119_s20, [#allocation3] }
  0x42   :  { %s1687_s27 = sld [smem:[#allocation5 + $0x4]]  ;;  %s3507_s28 = smov [#allocation2 + $0x4]  }
  0x43   :  { %s135_s0 = sshll.u32 %s3507_s28, 4  ;;  %s1688_s30 = sld [smem:[#allocation5 + $0x5]]  ;;  %s136_s0 = int_to_ptr.vmem [resolvable:$true] %s135_s0 }
  0x44   :  { %s3508_s14 = smov [#allocation2 + $0x5]   ;;  %s3664_s7 = sld [smem:[#allocation5 + $0x6]] }
  0x45   :  { %s3662_s6 = sshll.u32 %s3508_s14, 4  ;;  %s3509_s1 = smov [#allocation2 + $0x6]   ;;  %s153_s6 = int_to_ptr.vmem [resolvable:$true] %s3662_s6 }
  0x46   :  { %s3667_s8 = sshll.u32 %s3509_s1, 4  ;;  %s3669_s10 = sld [smem:[#allocation5 + $0x7]]  ;;  %s170_s8 = int_to_ptr.vmem [resolvable:$true] %s3667_s8 }
  0x48   :  { %s124_s13 = scalar_lea.hbm %s4331_s2, %s1687_s27 }
  0x49   :  { %s133_s16 = sshll.u32 %s124_s13, 4  ;;  %s141_s12 = scalar_lea.hbm %s4331_s2, %s1688_s30  ;;  %s134_s16 = int_to_ptr.hbm [resolvable:$true] %s133_s16 }
  0x4a   :  { %s150_s18 = sshll.u32 %s141_s12, 4  ;;  %s2024_s19 = sshra.s32 %s134_s16, 4  ;;  %s2025_s19 = int_to_ptr.hbm [resolvable:$true] %s2024_s19  ;;  %s151_s18 = int_to_ptr.hbm [resolvable:$true] %s150_s18 }
  0x4b   :  { %s2026_s21 = scalar_lea.hbm %s2025_s19, 1  ;;  %p2029_p7 = scmp.lt.s32.totalorder %s2025_s19, %s4331_s2 }
  0x4c   :  { %p2027_p6 = scmp.ne.s32.totalorder %s2025_s19, %s2026_s21  ;;  %p2030_p8 = scmp.lt.s32.totalorder %s3631_s29, %s2026_s21 }
  0x4e   :  { %p2031_p9 = por %p2030_p8, %p2029_p7 }
  0x50   :  { %p2032_p10 = pnand %p2031_p9, %p2027_p6 }
  0x52   :  { %2035 = shalt.err (!%p2032_p10)  }
  0x53   :  { %138 = dma.hbm_to_vmem [thread:$0]  %s134_s16, 16, %s136_s0, [#allocation3] }
  0x54   :  { %s158_s15 = scalar_lea.hbm %s4331_s2, %s3664_s7  ;;  %s2048_s25 = sshra.s32 %s151_s18, 4  ;;  %s2049_s25 = int_to_ptr.hbm [resolvable:$true] %s2048_s25 }
  0x55   :  { %s2050_s26 = scalar_lea.hbm %s2049_s25, 1  ;;  %p2053_p12 = scmp.lt.s32.totalorder %s2049_s25, %s4331_s2 }
  0x56   :  { %p2051_p11 = scmp.ne.s32.totalorder %s2049_s25, %s2050_s26  ;;  %p2054_p13 = scmp.lt.s32.totalorder %s3631_s29, %s2050_s26 }
  0x58   :  { %p2055_p0 = por %p2054_p13, %p2053_p12 }
  0x5a   :  { %p2056_p1 = pnand %p2055_p0, %p2051_p11 }
  0x5c   :  { %2059 = shalt.err (!%p2056_p1)  }
  0x5d   :  { %155 = dma.hbm_to_vmem [thread:$0]  %s151_s18, 16, %s153_s6, [#allocation3] }
  0x5e   :  { %s167_s0 = sshll.u32 %s158_s15, 4  ;;  %s175_s7 = scalar_lea.hbm %s4331_s2, %s3669_s10  ;;  %s168_s0 = int_to_ptr.hbm [resolvable:$true] %s167_s0 }
  0x5f   :  { %s184_s1 = sshll.u32 %s175_s7, 4  ;;  %s2072_s20 = sshra.s32 %s168_s0, 4  ;;  %s2073_s20 = int_to_ptr.hbm [resolvable:$true] %s2072_s20  ;;  %s185_s1 = int_to_ptr.hbm [resolvable:$true] %s184_s1 }
  0x60   :  { %s2074_s3 = scalar_lea.hbm %s2073_s20, 1  ;;  %p2077_p3 = scmp.lt.s32.totalorder %s2073_s20, %s4331_s2 }
  0x61   :  { %p2075_p2 = scmp.ne.s32.totalorder %s2073_s20, %s2074_s3  ;;  %p2078_p4 = scmp.lt.s32.totalorder %s3631_s29, %s2074_s3 }
  0x63   :  { %p2079_p5 = por %p2078_p4, %p2077_p3 }
  0x65   :  { %p2080_p6 = pnand %p2079_p5, %p2075_p2 }
  0x67   :  { %2083 = shalt.err (!%p2080_p6)  }
  0x68   :  { %172 = dma.hbm_to_vmem [thread:$0]  %s168_s0, 16, %s170_s8, [#allocation3] }
  0x69   :  { %s3510_s6 = smov [#allocation2 + $0x7]   ;;  %s1691_s9 = sld [smem:[#allocation5 + $0x8]] }
  0x6a   :  { %s186_s10 = sshll.u32 %s3510_s6, 4  ;;  %s2096_s17 = sshra.s32 %s185_s1, 4  ;;  %s187_s10 = int_to_ptr.vmem [resolvable:$true] %s186_s10  ;;  %s2097_s17 = int_to_ptr.hbm [resolvable:$true] %s2096_s17 }
  0x6b   :  { %s2098_s12 = scalar_lea.hbm %s2097_s17, 1  ;;  %p2101_p8 = scmp.lt.s32.totalorder %s2097_s17, %s4331_s2 }
  0x6c   :  { %p2099_p7 = scmp.ne.s32.totalorder %s2097_s17, %s2098_s12  ;;  %p2102_p9 = scmp.lt.s32.totalorder %s3631_s29, %s2098_s12 }
  0x6e   :  { %p2103_p10 = por %p2102_p9, %p2101_p8 }
  0x70   :  { %p2104_p11 = pnand %p2103_p10, %p2099_p7 }
  0x72   :  { %2107 = shalt.err (!%p2104_p11)  }
  0x73   :  { %189 = dma.hbm_to_vmem [thread:$0]  %s185_s1, 16, %s187_s10, [#allocation3] }
  0x74   :  { %s3511_s21 = smov [#allocation2 + $0x8]   ;;  %s1692_s22 = sld [smem:[#allocation5 + $0x9]] }
  0x75   :  { %s203_s8 = sshll.u32 %s3511_s21, 4  ;;  %s3512_s23 = smov [#allocation2 + $0x9]   ;;  %s204_s8 = int_to_ptr.vmem [resolvable:$true] %s203_s8 }
  0x76   :  { %s3706_s24 = sshll.u32 %s3512_s23, 4  ;;  %s1693_s11 = sld [smem:[#allocation5 + $0xa]]  ;;  %s221_s24 = int_to_ptr.vmem [resolvable:$true] %s3706_s24 }
  0x77   :  { %s192_s26 = scalar_lea.hbm %s4331_s2, %s1691_s9  ;;  %s3513_s28 = smov [#allocation2 + $0xa]  }
  0x78   :  { %s201_s27 = sshll.u32 %s192_s26, 4  ;;  %s3712_s0 = sshll.u32 %s3513_s28, 4  ;;  %s202_s27 = int_to_ptr.hbm [resolvable:$true] %s201_s27  ;;  %s238_s0 = int_to_ptr.vmem [resolvable:$true] %s3712_s0 }
  0x79   :  { %s2120_s30 = sshra.s32 %s202_s27, 4  ;;  %s2121_s30 = int_to_ptr.hbm [resolvable:$true] %s2120_s30 }
  0x7a   :  { %s2122_s14 = scalar_lea.hbm %s2121_s30, 1  ;;  %p2125_p13 = scmp.lt.s32.totalorder %s2121_s30, %s4331_s2 }
  0x7b   :  { %p2123_p12 = scmp.ne.s32.totalorder %s2121_s30, %s2122_s14  ;;  %p2126_p0 = scmp.lt.s32.totalorder %s3631_s29, %s2122_s14 }
  0x7d   :  { %p2127_p1 = por %p2126_p0, %p2125_p13 }
  0x7f   :  { %p2128_p2 = pnand %p2127_p1, %p2123_p12 }
  0x81   :  { %2131 = shalt.err (!%p2128_p2)  }
  0x82   :  { %206 = dma.hbm_to_vmem [thread:$0]  %s202_s27, 16, %s204_s8, [#allocation3] }
  0x83   :  { %s209_s13 = scalar_lea.hbm %s4331_s2, %s1692_s22  ;;  %s226_s9 = scalar_lea.hbm %s4331_s2, %s1693_s11 }
  0x84   :  { %s218_s16 = sshll.u32 %s209_s13, 4  ;;  %s235_s17 = sshll.u32 %s226_s9, 4  ;;  %s219_s16 = int_to_ptr.hbm [resolvable:$true] %s218_s16  ;;  %s236_s17 = int_to_ptr.hbm [resolvable:$true] %s235_s17 }
  0x85   :  { %s2144_s12 = sshra.s32 %s219_s16, 4  ;;  %s2145_s12 = int_to_ptr.hbm [resolvable:$true] %s2144_s12 }
  0x86   :  { %s2146_s18 = scalar_lea.hbm %s2145_s12, 1  ;;  %p2149_p4 = scmp.lt.s32.totalorder %s2145_s12, %s4331_s2 }
  0x87   :  { %p2147_p3 = scmp.ne.s32.totalorder %s2145_s12, %s2146_s18  ;;  %p2150_p5 = scmp.lt.s32.totalorder %s3631_s29, %s2146_s18 }
  0x89   :  { %p2151_p6 = por %p2150_p5, %p2149_p4 }
  0x8b   :  { %p2152_p7 = pnand %p2151_p6, %p2147_p3 }
  0x8d   :  { %2155 = shalt.err (!%p2152_p7)  }
  0x8e   :  { %223 = dma.hbm_to_vmem [thread:$0]  %s219_s16, 16, %s221_s24, [#allocation3] }
  0x8f   :  { %s1694_s8 = sld [smem:[#allocation5 + $0xb]]  ;;  %s2168_s22 = sshra.s32 %s236_s17, 4  ;;  %s2169_s22 = int_to_ptr.hbm [resolvable:$true] %s2168_s22 }
  0x90   :  { %s2170_s23 = scalar_lea.hbm %s2169_s22, 1  ;;  %p2173_p9 = scmp.lt.s32.totalorder %s2169_s22, %s4331_s2 }
  0x91   :  { %p2171_p8 = scmp.ne.s32.totalorder %s2169_s22, %s2170_s23  ;;  %p2174_p10 = scmp.lt.s32.totalorder %s3631_s29, %s2170_s23 }
  0x93   :  { %p2175_p11 = por %p2174_p10, %p2173_p9 }
  0x95   :  { %p2176_p12 = pnand %p2175_p11, %p2171_p8 }
  0x97   :  { %2179 = shalt.err (!%p2176_p12)  }
  0x98   :  { %240 = dma.hbm_to_vmem [thread:$0]  %s236_s17, 16, %s238_s0, [#allocation3] }
  0x99   :  { %s1695_s25 = sld [smem:[#allocation5 + $0xc]]  ;;  %s3514_s26 = smov [#allocation2 + $0xb]  }
  0x9a   :  { %s254_s27 = sshll.u32 %s3514_s26, 4  ;;  %s3515_s24 = smov [#allocation2 + $0xc]   ;;  %s255_s27 = int_to_ptr.vmem [resolvable:$true] %s254_s27 }
  0x9b   :  { %s3735_s28 = sshll.u32 %s3515_s24, 4  ;;  %s3738_s30 = sld [smem:[#allocation5 + $0xd]]  ;;  %s272_s28 = int_to_ptr.vmem [resolvable:$true] %s3735_s28 }
  0x9c   :  { %s243_s1 = scalar_lea.hbm %s4331_s2, %s1694_s8  ;;  %s3516_s3 = smov [#allocation2 + $0xd]  }
  0x9d   :  { %s252_s20 = sshll.u32 %s243_s1, 4  ;;  %s3743_s13 = sshll.u32 %s3516_s3, 4  ;;  %s253_s20 = int_to_ptr.hbm [resolvable:$true] %s252_s20  ;;  %s289_s13 = int_to_ptr.vmem [resolvable:$true] %s3743_s13 }
  0x9e   :  { %s2192_s10 = sshra.s32 %s253_s20, 4  ;;  %s2193_s10 = int_to_ptr.hbm [resolvable:$true] %s2192_s10 }
  0x9f   :  { %s260_s6 = scalar_lea.hbm %s4331_s2, %s1695_s25  ;;  %s2194_s9 = scalar_lea.hbm %s2193_s10, 1 }
  0xa0   :  { %p2195_p13 = scmp.ne.s32.totalorder %s2193_s10, %s2194_s9  ;;  %p2197_p0 = scmp.lt.s32.totalorder %s2193_s10, %s4331_s2 }
  0xa1   :  { %p2198_p1 = scmp.lt.s32.totalorder %s3631_s29, %s2194_s9 }
  0xa3   :  { %p2199_p2 = por %p2198_p1, %p2197_p0 }
  0xa5   :  { %p2200_p3 = pnand %p2199_p2, %p2195_p13 }
  0xa7   :  { %2203 = shalt.err (!%p2200_p3)  }
  0xa8   :  { %257 = dma.hbm_to_vmem [thread:$0]  %s253_s20, 16, %s255_s27, [#allocation3] }
  0xa9   :  { %s269_s18 = sshll.u32 %s260_s6, 4  ;;  %s277_s8 = scalar_lea.hbm %s4331_s2, %s3738_s30  ;;  %s270_s18 = int_to_ptr.hbm [resolvable:$true] %s269_s18 }
  0xaa   :  { %s2216_s22 = sshra.s32 %s270_s18, 4  ;;  %s2217_s22 = int_to_ptr.hbm [resolvable:$true] %s2216_s22 }
  0xab   :  { %s2218_s23 = scalar_lea.hbm %s2217_s22, 1  ;;  %p2221_p5 = scmp.lt.s32.totalorder %s2217_s22, %s4331_s2 }
  0xac   :  { %p2219_p4 = scmp.ne.s32.totalorder %s2217_s22, %s2218_s23  ;;  %p2222_p6 = scmp.lt.s32.totalorder %s3631_s29, %s2218_s23 }
  0xae   :  { %p2223_p7 = por %p2222_p6, %p2221_p5 }
  0xb0   :  { %p2224_p8 = pnand %p2223_p7, %p2219_p4 }
  0xb2   :  { %2227 = shalt.err (!%p2224_p8)  }
  0xb3   :  { %274 = dma.hbm_to_vmem [thread:$0]  %s270_s18, 16, %s272_s28, [#allocation3] }
  0xb4   :  { %s286_s25 = sshll.u32 %s277_s8, 4  ;;  %s1697_s26 = sld [smem:[#allocation5 + $0xe]]  ;;  %s287_s25 = int_to_ptr.hbm [resolvable:$true] %s286_s25 }
  0xb5   :  { %s2240_s27 = sshra.s32 %s287_s25, 4  ;;  %s2241_s27 = int_to_ptr.hbm [resolvable:$true] %s2240_s27 }
  0xb6   :  { %s2242_s24 = scalar_lea.hbm %s2241_s27, 1  ;;  %p2245_p10 = scmp.lt.s32.totalorder %s2241_s27, %s4331_s2 }
  0xb7   :  { %p2243_p9 = scmp.ne.s32.totalorder %s2241_s27, %s2242_s24  ;;  %p2246_p11 = scmp.lt.s32.totalorder %s3631_s29, %s2242_s24 }
  0xb9   :  { %p2247_p12 = por %p2246_p11, %p2245_p10 }
  0xbb   :  { %p2248_p13 = pnand %p2247_p12, %p2243_p9 }
  0xbd   :  { %2251 = shalt.err (!%p2248_p13)  }
  0xbe   :  { %291 = dma.hbm_to_vmem [thread:$0]  %s287_s25, 16, %s289_s13, [#allocation3] }
  0xbf   :  { %s3517_s7 = smov [#allocation2 + $0xe]   ;;  %s1698_s20 = sld [smem:[#allocation5 + $0xf]] }
  0xc0   :  { %s305_s1 = sshll.u32 %s3517_s7, 4  ;;  %s3518_s28 = smov [#allocation2 + $0xf]   ;;  %s306_s1 = int_to_ptr.vmem [resolvable:$true] %s305_s1 }
  0xc1   :  { %s3767_s3 = sshll.u32 %s3518_s28, 4  ;;  %s1699_s0 = sld [smem:[#allocation5 + $0x10]]  ;;  %s323_s3 = int_to_ptr.vmem [resolvable:$true] %s3767_s3 }
  0xc2   :  { %s294_s10 = scalar_lea.hbm %s4331_s2, %s1697_s26  ;;  %s3519_s17 = smov [#allocation2 + $0x10]  }
  0xc3   :  { %s303_s9 = sshll.u32 %s294_s10, 4  ;;  %s3773_s12 = sshll.u32 %s3519_s17, 4  ;;  %s304_s9 = int_to_ptr.hbm [resolvable:$true] %s303_s9  ;;  %s340_s12 = int_to_ptr.vmem [resolvable:$true] %s3773_s12 }
  0xc4   :  { %s2264_s13 = sshra.s32 %s304_s9, 4  ;;  %s2265_s13 = int_to_ptr.hbm [resolvable:$true] %s2264_s13 }
  0xc5   :  { %s2266_s18 = scalar_lea.hbm %s2265_s13, 1  ;;  %p2269_p1 = scmp.lt.s32.totalorder %s2265_s13, %s4331_s2 }
  0xc6   :  { %p2267_p0 = scmp.ne.s32.totalorder %s2265_s13, %s2266_s18  ;;  %p2270_p2 = scmp.lt.s32.totalorder %s3631_s29, %s2266_s18 }
  0xc8   :  { %p2271_p3 = por %p2270_p2, %p2269_p1 }
  0xca   :  { %p2272_p4 = pnand %p2271_p3, %p2267_p0 }
  0xcc   :  { %2275 = shalt.err (!%p2272_p4)  }
  0xcd   :  { %308 = dma.hbm_to_vmem [thread:$0]  %s304_s9, 16, %s306_s1, [#allocation3] }
  0xce   :  { %s311_s23 = scalar_lea.hbm %s4331_s2, %s1698_s20  ;;  %s328_s26 = scalar_lea.hbm %s4331_s2, %s1699_s0 }
  0xcf   :  { %s320_s11 = sshll.u32 %s311_s23, 4  ;;  %s337_s27 = sshll.u32 %s328_s26, 4  ;;  %s321_s11 = int_to_ptr.hbm [resolvable:$true] %s320_s11  ;;  %s338_s27 = int_to_ptr.hbm [resolvable:$true] %s337_s27 }
  0xd0   :  { %s2288_s24 = sshra.s32 %s321_s11, 4  ;;  %s2289_s24 = int_to_ptr.hbm [resolvable:$true] %s2288_s24 }
  0xd1   :  { %s2290_s30 = scalar_lea.hbm %s2289_s24, 1  ;;  %p2293_p6 = scmp.lt.s32.totalorder %s2289_s24, %s4331_s2 }
  0xd2   :  { %p2291_p5 = scmp.ne.s32.totalorder %s2289_s24, %s2290_s30  ;;  %p2294_p7 = scmp.lt.s32.totalorder %s3631_s29, %s2290_s30 }
  0xd4   :  { %p2295_p8 = por %p2294_p7, %p2293_p6 }
  0xd6   :  { %p2296_p9 = pnand %p2295_p8, %p2291_p5 }
  0xd8   :  { %2299 = shalt.err (!%p2296_p9)  }
  0xd9   :  { %325 = dma.hbm_to_vmem [thread:$0]  %s321_s11, 16, %s323_s3, [#allocation3] }
  0xda   :  { %s1700_s1 = sld [smem:[#allocation5 + $0x11]]  ;;  %s2312_s20 = sshra.s32 %s338_s27, 4  ;;  %s2313_s20 = int_to_ptr.hbm [resolvable:$true] %s2312_s20 }
  0xdb   :  { %s2314_s28 = scalar_lea.hbm %s2313_s20, 1  ;;  %p2317_p11 = scmp.lt.s32.totalorder %s2313_s20, %s4331_s2 }
  0xdc   :  { %p2315_p10 = scmp.ne.s32.totalorder %s2313_s20, %s2314_s28  ;;  %p2318_p12 = scmp.lt.s32.totalorder %s3631_s29, %s2314_s28 }
  0xde   :  { %p2319_p13 = por %p2318_p12, %p2317_p11 }
  0xe0   :  { %p2320_p0 = pnand %p2319_p13, %p2315_p10 }
  0xe2   :  { %2323 = shalt.err (!%p2320_p0)  }
  0xe3   :  { %342 = dma.hbm_to_vmem [thread:$0]  %s338_s27, 16, %s340_s12, [#allocation3] }
  0xe4   :  { %s1701_s6 = sld [smem:[#allocation5 + $0x12]]  ;;  %s3520_s10 = smov [#allocation2 + $0x11]  }
  0xe5   :  { %s356_s9 = sshll.u32 %s3520_s10, 4  ;;  %s3521_s3 = smov [#allocation2 + $0x12]   ;;  %s357_s9 = int_to_ptr.vmem [resolvable:$true] %s356_s9 }
  0xe6   :  { %s3796_s17 = sshll.u32 %s3521_s3, 4  ;;  %s3799_s13 = sld [smem:[#allocation5 + $0x13]]  ;;  %s374_s17 = int_to_ptr.vmem [resolvable:$true] %s3796_s17 }
  0xe7   :  { %s345_s21 = scalar_lea.hbm %s4331_s2, %s1700_s1  ;;  %s3522_s22 = smov [#allocation2 + $0x13]  }
  0xe8   :  { %s354_s8 = sshll.u32 %s345_s21, 4  ;;  %s3804_s23 = sshll.u32 %s3522_s22, 4  ;;  %s355_s8 = int_to_ptr.hbm [resolvable:$true] %s354_s8  ;;  %s391_s23 = int_to_ptr.vmem [resolvable:$true] %s3804_s23 }
  0xe9   :  { %s2336_s25 = sshra.s32 %s355_s8, 4  ;;  %s2337_s25 = int_to_ptr.hbm [resolvable:$true] %s2336_s25 }
  0xea   :  { %s362_s15 = scalar_lea.hbm %s4331_s2, %s1701_s6  ;;  %s2338_s26 = scalar_lea.hbm %s2337_s25, 1 }
  0xeb   :  { %p2339_p1 = scmp.ne.s32.totalorder %s2337_s25, %s2338_s26  ;;  %p2341_p2 = scmp.lt.s32.totalorder %s2337_s25, %s4331_s2 }
  0xec   :  { %p2342_p3 = scmp.lt.s32.totalorder %s3631_s29, %s2338_s26 }
  0xee   :  { %p2343_p4 = por %p2342_p3, %p2341_p2 }
  0xf0   :  { %p2344_p5 = pnand %p2343_p4, %p2339_p1 }
  0xf2   :  { %2347 = shalt.err (!%p2344_p5)  }
  0xf3   :  { %359 = dma.hbm_to_vmem [thread:$0]  %s355_s8, 16, %s357_s9, [#allocation3] }
  0xf4   :  { %s371_s30 = sshll.u32 %s362_s15, 4  ;;  %s379_s1 = scalar_lea.hbm %s4331_s2, %s3799_s13  ;;  %s372_s30 = int_to_ptr.hbm [resolvable:$true] %s371_s30 }
  0xf5   :  { %s2360_s20 = sshra.s32 %s372_s30, 4  ;;  %s2361_s20 = int_to_ptr.hbm [resolvable:$true] %s2360_s20 }
  0xf6   :  { %s2362_s28 = scalar_lea.hbm %s2361_s20, 1  ;;  %p2365_p7 = scmp.lt.s32.totalorder %s2361_s20, %s4331_s2 }
  0xf7   :  { %p2363_p6 = scmp.ne.s32.totalorder %s2361_s20, %s2362_s28  ;;  %p2366_p8 = scmp.lt.s32.totalorder %s3631_s29, %s2362_s28 }
  0xf9   :  { %p2367_p9 = por %p2366_p8, %p2365_p7 }
  0xfb   :  { %p2368_p10 = pnand %p2367_p9, %p2363_p6 }
  0xfd   :  { %2371 = shalt.err (!%p2368_p10)  }
  0xfe   :  { %376 = dma.hbm_to_vmem [thread:$0]  %s372_s30, 16, %s374_s17, [#allocation3] }
  0xff   :  { %s388_s6 = sshll.u32 %s379_s1, 4  ;;  %s1703_s10 = sld [smem:[#allocation5 + $0x14]]  ;;  %s389_s6 = int_to_ptr.hbm [resolvable:$true] %s388_s6 }
 0x100   :  { %s2384_s9 = sshra.s32 %s389_s6, 4  ;;  %s2385_s9 = int_to_ptr.hbm [resolvable:$true] %s2384_s9 }
 0x101   :  { %s2386_s3 = scalar_lea.hbm %s2385_s9, 1  ;;  %p2389_p12 = scmp.lt.s32.totalorder %s2385_s9, %s4331_s2 }
 0x102   :  { %p2387_p11 = scmp.ne.s32.totalorder %s2385_s9, %s2386_s3  ;;  %p2390_p13 = scmp.lt.s32.totalorder %s3631_s29, %s2386_s3 }
 0x104   :  { %p2391_p0 = por %p2390_p13, %p2389_p12 }
 0x106   :  { %p2392_p1 = pnand %p2391_p0, %p2387_p11 }
 0x108   :  { %2395 = shalt.err (!%p2392_p1)  }
 0x109   :  { %393 = dma.hbm_to_vmem [thread:$0]  %s389_s6, 16, %s391_s23, [#allocation3] }
 0x10a   :  { %s3523_s19 = smov [#allocation2 + $0x14]   ;;  %s1704_s8 = sld [smem:[#allocation5 + $0x15]] }
 0x10b   :  { %s407_s21 = sshll.u32 %s3523_s19, 4  ;;  %s3524_s17 = smov [#allocation2 + $0x15]   ;;  %s408_s21 = int_to_ptr.vmem [resolvable:$true] %s407_s21 }
 0x10c   :  { %s3828_s22 = sshll.u32 %s3524_s17, 4  ;;  %s1705_s12 = sld [smem:[#allocation5 + $0x16]]  ;;  %s425_s22 = int_to_ptr.vmem [resolvable:$true] %s3828_s22 }
 0x10d   :  { %s396_s25 = scalar_lea.hbm %s4331_s2, %s1703_s10  ;;  %s3525_s27 = smov [#allocation2 + $0x16]  }
 0x10e   :  { %s405_s26 = sshll.u32 %s396_s25, 4  ;;  %s3834_s24 = sshll.u32 %s3525_s27, 4  ;;  %s406_s26 = int_to_ptr.hbm [resolvable:$true] %s405_s26  ;;  %s442_s24 = int_to_ptr.vmem [resolvable:$true] %s3834_s24 }
 0x10f   :  { %s2408_s23 = sshra.s32 %s406_s26, 4  ;;  %s2409_s23 = int_to_ptr.hbm [resolvable:$true] %s2408_s23 }
 0x110   :  { %s2410_s30 = scalar_lea.hbm %s2409_s23, 1  ;;  %p2413_p3 = scmp.lt.s32.totalorder %s2409_s23, %s4331_s2 }
 0x111   :  { %p2411_p2 = scmp.ne.s32.totalorder %s2409_s23, %s2410_s30  ;;  %p2414_p4 = scmp.lt.s32.totalorder %s3631_s29, %s2410_s30 }
 0x113   :  { %p2415_p5 = por %p2414_p4, %p2413_p3 }
 0x115   :  { %p2416_p6 = pnand %p2415_p5, %p2411_p2 }
 0x117   :  { %2419 = shalt.err (!%p2416_p6)  }
 0x118   :  { %410 = dma.hbm_to_vmem [thread:$0]  %s406_s26, 16, %s408_s21, [#allocation3] }
 0x119   :  { %s413_s28 = scalar_lea.hbm %s4331_s2, %s1704_s8  ;;  %s430_s10 = scalar_lea.hbm %s4331_s2, %s1705_s12 }
 0x11a   :  { %s422_s0 = sshll.u32 %s413_s28, 4  ;;  %s439_s9 = sshll.u32 %s430_s10, 4  ;;  %s423_s0 = int_to_ptr.hbm [resolvable:$true] %s422_s0  ;;  %s440_s9 = int_to_ptr.hbm [resolvable:$true] %s439_s9 }
 0x11b   :  { %s2432_s3 = sshra.s32 %s423_s0, 4  ;;  %s2433_s3 = int_to_ptr.hbm [resolvable:$true] %s2432_s3 }
 0x11c   :  { %s2434_s13 = scalar_lea.hbm %s2433_s3, 1  ;;  %p2437_p8 = scmp.lt.s32.totalorder %s2433_s3, %s4331_s2 }
 0x11d   :  { %p2435_p7 = scmp.ne.s32.totalorder %s2433_s3, %s2434_s13  ;;  %p2438_p9 = scmp.lt.s32.totalorder %s3631_s29, %s2434_s13 }
 0x11f   :  { %p2439_p10 = por %p2438_p9, %p2437_p8 }
 0x121   :  { %p2440_p11 = pnand %p2439_p10, %p2435_p7 }
 0x123   :  { %2443 = shalt.err (!%p2440_p11)  }
 0x124   :  { %427 = dma.hbm_to_vmem [thread:$0]  %s423_s0, 16, %s425_s22, [#allocation3] }
 0x125   :  { %s1706_s21 = sld [smem:[#allocation5 + $0x17]]  ;;  %s2456_s8 = sshra.s32 %s440_s9, 4  ;;  %s2457_s8 = int_to_ptr.hbm [resolvable:$true] %s2456_s8 }
 0x126   :  { %s2458_s17 = scalar_lea.hbm %s2457_s8, 1  ;;  %p2461_p13 = scmp.lt.s32.totalorder %s2457_s8, %s4331_s2 }
 0x127   :  { %p2459_p12 = scmp.ne.s32.totalorder %s2457_s8, %s2458_s17  ;;  %p2462_p0 = scmp.lt.s32.totalorder %s3631_s29, %s2458_s17 }
 0x129   :  { %p2463_p1 = por %p2462_p0, %p2461_p13 }
 0x12b   :  { %p2464_p2 = pnand %p2463_p1, %p2459_p12 }
 0x12d   :  { %2467 = shalt.err (!%p2464_p2)  }
 0x12e   :  { %444 = dma.hbm_to_vmem [thread:$0]  %s440_s9, 16, %s442_s24, [#allocation3] }
 0x12f   :  { %s1707_s15 = sld [smem:[#allocation5 + $0x18]]  ;;  %s3526_s25 = smov [#allocation2 + $0x17]  }
 0x130   :  { %s458_s26 = sshll.u32 %s3526_s25, 4  ;;  %s3527_s22 = smov [#allocation2 + $0x18]   ;;  %s459_s26 = int_to_ptr.vmem [resolvable:$true] %s458_s26 }
 0x131   :  { %s3857_s27 = sshll.u32 %s3527_s22, 4  ;;  %s3860_s23 = sld [smem:[#allocation5 + $0x19]]  ;;  %s476_s27 = int_to_ptr.vmem [resolvable:$true] %s3857_s27 }
 0x132   :  { %s447_s7 = scalar_lea.hbm %s4331_s2, %s1706_s21  ;;  %s3528_s20 = smov [#allocation2 + $0x19]  }
 0x133   :  { %s456_s1 = sshll.u32 %s447_s7, 4  ;;  %s3865_s28 = sshll.u32 %s3528_s20, 4  ;;  %s457_s1 = int_to_ptr.hbm [resolvable:$true] %s456_s1  ;;  %s493_s28 = int_to_ptr.vmem [resolvable:$true] %s3865_s28 }
 0x134   :  { %s2480_s6 = sshra.s32 %s457_s1, 4  ;;  %s2481_s6 = int_to_ptr.hbm [resolvable:$true] %s2480_s6 }
 0x135   :  { %s464_s16 = scalar_lea.hbm %s4331_s2, %s1707_s15  ;;  %s2482_s10 = scalar_lea.hbm %s2481_s6, 1 }
 0x136   :  { %p2483_p3 = scmp.ne.s32.totalorder %s2481_s6, %s2482_s10  ;;  %p2485_p4 = scmp.lt.s32.totalorder %s2481_s6, %s4331_s2 }
 0x137   :  { %p2486_p5 = scmp.lt.s32.totalorder %s3631_s29, %s2482_s10 }
 0x139   :  { %p2487_p6 = por %p2486_p5, %p2485_p4 }
 0x13b   :  { %p2488_p7 = pnand %p2487_p6, %p2483_p3 }
 0x13d   :  { %2491 = shalt.err (!%p2488_p7)  }
 0x13e   :  { %461 = dma.hbm_to_vmem [thread:$0]  %s457_s1, 16, %s459_s26, [#allocation3] }
 0x13f   :  { %s473_s13 = sshll.u32 %s464_s16, 4  ;;  %s481_s21 = scalar_lea.hbm %s4331_s2, %s3860_s23  ;;  %s474_s13 = int_to_ptr.hbm [resolvable:$true] %s473_s13 }
 0x140   :  { %s2504_s8 = sshra.s32 %s474_s13, 4  ;;  %s2505_s8 = int_to_ptr.hbm [resolvable:$true] %s2504_s8 }
 0x141   :  { %s2506_s17 = scalar_lea.hbm %s2505_s8, 1  ;;  %p2509_p9 = scmp.lt.s32.totalorder %s2505_s8, %s4331_s2 }
 0x142   :  { %p2507_p8 = scmp.ne.s32.totalorder %s2505_s8, %s2506_s17  ;;  %p2510_p10 = scmp.lt.s32.totalorder %s3631_s29, %s2506_s17 }
 0x144   :  { %p2511_p11 = por %p2510_p10, %p2509_p9 }
 0x146   :  { %p2512_p12 = pnand %p2511_p11, %p2507_p8 }
 0x148   :  { %2515 = shalt.err (!%p2512_p12)  }
 0x149   :  { %478 = dma.hbm_to_vmem [thread:$0]  %s474_s13, 16, %s476_s27, [#allocation3] }
 0x14a   :  { %s490_s15 = sshll.u32 %s481_s21, 4  ;;  %s1709_s25 = sld [smem:[#allocation5 + $0x1a]]  ;;  %s491_s15 = int_to_ptr.hbm [resolvable:$true] %s490_s15 }
 0x14b   :  { %s2528_s26 = sshra.s32 %s491_s15, 4  ;;  %s2529_s26 = int_to_ptr.hbm [resolvable:$true] %s2528_s26 }
 0x14c   :  { %s2530_s22 = scalar_lea.hbm %s2529_s26, 1  ;;  %p2533_p0 = scmp.lt.s32.totalorder %s2529_s26, %s4331_s2 }
 0x14d   :  { %p2531_p13 = scmp.ne.s32.totalorder %s2529_s26, %s2530_s22  ;;  %p2534_p1 = scmp.lt.s32.totalorder %s3631_s29, %s2530_s22 }
 0x14f   :  { %p2535_p2 = por %p2534_p1, %p2533_p0 }
 0x151   :  { %p2536_p3 = pnand %p2535_p2, %p2531_p13 }
 0x153   :  { %2539 = shalt.err (!%p2536_p3)  }
 0x154   :  { %495 = dma.hbm_to_vmem [thread:$0]  %s491_s15, 16, %s493_s28, [#allocation3] }
 0x155   :  { %s3529_s14 = smov [#allocation2 + $0x1a]   ;;  %s1710_s1 = sld [smem:[#allocation5 + $0x1b]] }
 0x156   :  { %s509_s7 = sshll.u32 %s3529_s14, 4  ;;  %s3530_s27 = smov [#allocation2 + $0x1b]   ;;  %s510_s7 = int_to_ptr.vmem [resolvable:$true] %s509_s7 }
 0x157   :  { %s3889_s20 = sshll.u32 %s3530_s27, 4  ;;  %s1711_s24 = sld [smem:[#allocation5 + $0x1c]]  ;;  %s527_s20 = int_to_ptr.vmem [resolvable:$true] %s3889_s20 }
 0x158   :  { %s498_s6 = scalar_lea.hbm %s4331_s2, %s1709_s25  ;;  %s3531_s9 = smov [#allocation2 + $0x1c]  }
 0x159   :  { %s507_s10 = sshll.u32 %s498_s6, 4  ;;  %s3895_s3 = sshll.u32 %s3531_s9, 4  ;;  %s508_s10 = int_to_ptr.hbm [resolvable:$true] %s507_s10  ;;  %s544_s3 = int_to_ptr.vmem [resolvable:$true] %s3895_s3 }
 0x15a   :  { %s2552_s28 = sshra.s32 %s508_s10, 4  ;;  %s2553_s28 = int_to_ptr.hbm [resolvable:$true] %s2552_s28 }
 0x15b   :  { %s2554_s13 = scalar_lea.hbm %s2553_s28, 1  ;;  %p2557_p5 = scmp.lt.s32.totalorder %s2553_s28, %s4331_s2 }
 0x15c   :  { %p2555_p4 = scmp.ne.s32.totalorder %s2553_s28, %s2554_s13  ;;  %p2558_p6 = scmp.lt.s32.totalorder %s3631_s29, %s2554_s13 }
 0x15e   :  { %p2559_p7 = por %p2558_p6, %p2557_p5 }
 0x160   :  { %p2560_p8 = pnand %p2559_p7, %p2555_p4 }
 0x162   :  { %2563 = shalt.err (!%p2560_p8)  }
 0x163   :  { %512 = dma.hbm_to_vmem [thread:$0]  %s508_s10, 16, %s510_s7, [#allocation3] }
 0x164   :  { %s515_s17 = scalar_lea.hbm %s4331_s2, %s1710_s1  ;;  %s532_s25 = scalar_lea.hbm %s4331_s2, %s1711_s24 }
 0x165   :  { %s524_s12 = sshll.u32 %s515_s17, 4  ;;  %s541_s26 = sshll.u32 %s532_s25, 4  ;;  %s525_s12 = int_to_ptr.hbm [resolvable:$true] %s524_s12  ;;  %s542_s26 = int_to_ptr.hbm [resolvable:$true] %s541_s26 }
 0x166   :  { %s2576_s22 = sshra.s32 %s525_s12, 4  ;;  %s2577_s22 = int_to_ptr.hbm [resolvable:$true] %s2576_s22 }
 0x167   :  { %s2578_s23 = scalar_lea.hbm %s2577_s22, 1  ;;  %p2581_p10 = scmp.lt.s32.totalorder %s2577_s22, %s4331_s2 }
 0x168   :  { %p2579_p9 = scmp.ne.s32.totalorder %s2577_s22, %s2578_s23  ;;  %p2582_p11 = scmp.lt.s32.totalorder %s3631_s29, %s2578_s23 }
 0x16a   :  { %p2583_p12 = por %p2582_p11, %p2581_p10 }
 0x16c   :  { %p2584_p13 = pnand %p2583_p12, %p2579_p9 }
 0x16e   :  { %2587 = shalt.err (!%p2584_p13)  }
 0x16f   :  { %529 = dma.hbm_to_vmem [thread:$0]  %s525_s12, 16, %s527_s20, [#allocation3] }
 0x170   :  { %s1712_s7 = sld [smem:[#allocation5 + $0x1d]]  ;;  %s2600_s1 = sshra.s32 %s542_s26, 4  ;;  %s2601_s1 = int_to_ptr.hbm [resolvable:$true] %s2600_s1 }
 0x171   :  { %s2602_s27 = scalar_lea.hbm %s2601_s1, 1  ;;  %p2605_p1 = scmp.lt.s32.totalorder %s2601_s1, %s4331_s2 }
 0x172   :  { %p2603_p0 = scmp.ne.s32.totalorder %s2601_s1, %s2602_s27  ;;  %p2606_p2 = scmp.lt.s32.totalorder %s3631_s29, %s2602_s27 }
 0x174   :  { %p2607_p3 = por %p2606_p2, %p2605_p1 }
 0x176   :  { %p2608_p4 = pnand %p2607_p3, %p2603_p0 }
 0x178   :  { %2611 = shalt.err (!%p2608_p4)  }
 0x179   :  { %546 = dma.hbm_to_vmem [thread:$0]  %s542_s26, 16, %s544_s3, [#allocation3] }
 0x17a   :  { %s1713_s16 = sld [smem:[#allocation5 + $0x1e]]  ;;  %s3532_s6 = smov [#allocation2 + $0x1d]  }
 0x17b   :  { %s560_s10 = sshll.u32 %s3532_s6, 4  ;;  %s3533_s20 = smov [#allocation2 + $0x1e]   ;;  %s561_s10 = int_to_ptr.vmem [resolvable:$true] %s560_s10 }
 0x17c   :  { %s3918_s9 = sshll.u32 %s3533_s20, 4  ;;  %s3921_s28 = sld [smem:[#allocation5 + $0x1f]]  ;;  %s578_s9 = int_to_ptr.vmem [resolvable:$true] %s3918_s9 }
 0x17d   :  { %s549_s19 = scalar_lea.hbm %s4331_s2, %s1712_s7  ;;  %s3534_s8 = smov [#allocation2 + $0x1f]  }
 0x17e   :  { %s558_s21 = sshll.u32 %s549_s19, 4  ;;  %s3926_s17 = sshll.u32 %s3534_s8, 4  ;;  %s559_s21 = int_to_ptr.hbm [resolvable:$true] %s558_s21  ;;  %s595_s17 = int_to_ptr.vmem [resolvable:$true] %s3926_s17 }
 0x17f   :  { %s2624_s15 = sshra.s32 %s559_s21, 4  ;;  %s2625_s15 = int_to_ptr.hbm [resolvable:$true] %s2624_s15 }
 0x180   :  { %s566_s11 = scalar_lea.hbm %s4331_s2, %s1713_s16  ;;  %s2626_s25 = scalar_lea.hbm %s2625_s15, 1 }
 0x181   :  { %p2627_p5 = scmp.ne.s32.totalorder %s2625_s15, %s2626_s25  ;;  %p2629_p6 = scmp.lt.s32.totalorder %s2625_s15, %s4331_s2 }
 0x182   :  { %p2630_p7 = scmp.lt.s32.totalorder %s3631_s29, %s2626_s25 }
 0x184   :  { %p2631_p8 = por %p2630_p7, %p2629_p6 }
 0x186   :  { %p2632_p9 = pnand %p2631_p8, %p2627_p5 }
 0x188   :  { %2635 = shalt.err (!%p2632_p9)  }
 0x189   :  { %563 = dma.hbm_to_vmem [thread:$0]  %s559_s21, 16, %s561_s10, [#allocation3] }
 0x18a   :  { %s575_s23 = sshll.u32 %s566_s11, 4  ;;  %s583_s7 = scalar_lea.hbm %s4331_s2, %s3921_s28  ;;  %s576_s23 = int_to_ptr.hbm [resolvable:$true] %s575_s23 }
 0x18b   :  { %s2648_s1 = sshra.s32 %s576_s23, 4  ;;  %s2649_s1 = int_to_ptr.hbm [resolvable:$true] %s2648_s1 }
 0x18c   :  { %s2650_s27 = scalar_lea.hbm %s2649_s1, 1  ;;  %p2653_p11 = scmp.lt.s32.totalorder %s2649_s1, %s4331_s2 }
 0x18d   :  { %p2651_p10 = scmp.ne.s32.totalorder %s2649_s1, %s2650_s27  ;;  %p2654_p12 = scmp.lt.s32.totalorder %s3631_s29, %s2650_s27 }
 0x18f   :  { %p2655_p13 = por %p2654_p12, %p2653_p11 }
 0x191   :  { %p2656_p0 = pnand %p2655_p13, %p2651_p10 }
 0x193   :  { %2659 = shalt.err (!%p2656_p0)  }
 0x194   :  { %580 = dma.hbm_to_vmem [thread:$0]  %s576_s23, 16, %s578_s9, [#allocation3] }
 0x195   :  { %s592_s16 = sshll.u32 %s583_s7, 4  ;;  %s1715_s6 = sld [smem:[#allocation5 + $0x20]]  ;;  %s593_s16 = int_to_ptr.hbm [resolvable:$true] %s592_s16 }
 0x196   :  { %s2672_s10 = sshra.s32 %s593_s16, 4  ;;  %s2673_s10 = int_to_ptr.hbm [resolvable:$true] %s2672_s10 }
 0x197   :  { %s2674_s20 = scalar_lea.hbm %s2673_s10, 1  ;;  %p2677_p2 = scmp.lt.s32.totalorder %s2673_s10, %s4331_s2 }
 0x198   :  { %p2675_p1 = scmp.ne.s32.totalorder %s2673_s10, %s2674_s20  ;;  %p2678_p3 = scmp.lt.s32.totalorder %s3631_s29, %s2674_s20 }
 0x19a   :  { %p2679_p4 = por %p2678_p3, %p2677_p2 }
 0x19c   :  { %p2680_p5 = pnand %p2679_p4, %p2675_p1 }
 0x19e   :  { %2683 = shalt.err (!%p2680_p5)  }
 0x19f   :  { %597 = dma.hbm_to_vmem [thread:$0]  %s593_s16, 16, %s595_s17, [#allocation3] }
 0x1a0   :  { %s3535_s18 = smov [#allocation2 + $0x20]   ;;  %s1716_s21 = sld [smem:[#allocation5 + $0x21]] }
 0x1a1   :  { %s611_s19 = sshll.u32 %s3535_s18, 4  ;;  %s3536_s9 = smov [#allocation2 + $0x21]   ;;  %s612_s19 = int_to_ptr.vmem [resolvable:$true] %s611_s19 }
 0x1a2   :  { %s3950_s8 = sshll.u32 %s3536_s9, 4  ;;  %s1717_s3 = sld [smem:[#allocation5 + $0x22]]  ;;  %s629_s8 = int_to_ptr.vmem [resolvable:$true] %s3950_s8 }
 0x1a3   :  { %s600_s15 = scalar_lea.hbm %s4331_s2, %s1715_s6  ;;  %s3537_s26 = smov [#allocation2 + $0x22]  }
 0x1a4   :  { %s609_s25 = sshll.u32 %s600_s15, 4  ;;  %s3956_s22 = sshll.u32 %s3537_s26, 4  ;;  %s610_s25 = int_to_ptr.hbm [resolvable:$true] %s609_s25  ;;  %s646_s22 = int_to_ptr.vmem [resolvable:$true] %s3956_s22 }
 0x1a5   :  { %s2696_s17 = sshra.s32 %s610_s25, 4  ;;  %s2697_s17 = int_to_ptr.hbm [resolvable:$true] %s2696_s17 }
 0x1a6   :  { %s2698_s23 = scalar_lea.hbm %s2697_s17, 1  ;;  %p2701_p7 = scmp.lt.s32.totalorder %s2697_s17, %s4331_s2 }
 0x1a7   :  { %p2699_p6 = scmp.ne.s32.totalorder %s2697_s17, %s2698_s23  ;;  %p2702_p8 = scmp.lt.s32.totalorder %s3631_s29, %s2698_s23 }
 0x1a9   :  { %p2703_p9 = por %p2702_p8, %p2701_p7 }
 0x1ab   :  { %p2704_p10 = pnand %p2703_p9, %p2699_p6 }
 0x1ad   :  { %2707 = shalt.err (!%p2704_p10)  }
 0x1ae   :  { %614 = dma.hbm_to_vmem [thread:$0]  %s610_s25, 16, %s612_s19, [#allocation3] }
 0x1af   :  { %s617_s27 = scalar_lea.hbm %s4331_s2, %s1716_s21  ;;  %s634_s6 = scalar_lea.hbm %s4331_s2, %s1717_s3 }
 0x1b0   :  { %s626_s24 = sshll.u32 %s617_s27, 4  ;;  %s643_s10 = sshll.u32 %s634_s6, 4  ;;  %s627_s24 = int_to_ptr.hbm [resolvable:$true] %s626_s24  ;;  %s644_s10 = int_to_ptr.hbm [resolvable:$true] %s643_s10 }
 0x1b1   :  { %s2720_s20 = sshra.s32 %s627_s24, 4  ;;  %s2721_s20 = int_to_ptr.hbm [resolvable:$true] %s2720_s20 }
 0x1b2   :  { %s2722_s28 = scalar_lea.hbm %s2721_s20, 1  ;;  %p2725_p12 = scmp.lt.s32.totalorder %s2721_s20, %s4331_s2 }
 0x1b3   :  { %p2723_p11 = scmp.ne.s32.totalorder %s2721_s20, %s2722_s28  ;;  %p2726_p13 = scmp.lt.s32.totalorder %s3631_s29, %s2722_s28 }
 0x1b5   :  { %p2727_p0 = por %p2726_p13, %p2725_p12 }
 0x1b7   :  { %p2728_p1 = pnand %p2727_p0, %p2723_p11 }
 0x1b9   :  { %2731 = shalt.err (!%p2728_p1)  }
 0x1ba   :  { %631 = dma.hbm_to_vmem [thread:$0]  %s627_s24, 16, %s629_s8, [#allocation3] }
 0x1bb   :  { %s1718_s19 = sld [smem:[#allocation5 + $0x23]]  ;;  %s2744_s21 = sshra.s32 %s644_s10, 4  ;;  %s2745_s21 = int_to_ptr.hbm [resolvable:$true] %s2744_s21 }
 0x1bc   :  { %s2746_s9 = scalar_lea.hbm %s2745_s21, 1  ;;  %p2749_p3 = scmp.lt.s32.totalorder %s2745_s21, %s4331_s2 }
 0x1bd   :  { %p2747_p2 = scmp.ne.s32.totalorder %s2745_s21, %s2746_s9  ;;  %p2750_p4 = scmp.lt.s32.totalorder %s3631_s29, %s2746_s9 }
 0x1bf   :  { %p2751_p5 = por %p2750_p4, %p2749_p3 }
 0x1c1   :  { %p2752_p6 = pnand %p2751_p5, %p2747_p2 }
 0x1c3   :  { %2755 = shalt.err (!%p2752_p6)  }
 0x1c4   :  { %648 = dma.hbm_to_vmem [thread:$0]  %s644_s10, 16, %s646_s22, [#allocation3] }
 0x1c5   :  { %s1719_s11 = sld [smem:[#allocation5 + $0x24]]  ;;  %s3538_s15 = smov [#allocation2 + $0x23]  }
 0x1c6   :  { %s662_s25 = sshll.u32 %s3538_s15, 4  ;;  %s3539_s8 = smov [#allocation2 + $0x24]   ;;  %s663_s25 = int_to_ptr.vmem [resolvable:$true] %s662_s25 }
 0x1c7   :  { %s3979_s26 = sshll.u32 %s3539_s8, 4  ;;  %s3982_s17 = sld [smem:[#allocation5 + $0x25]]  ;;  %s680_s26 = int_to_ptr.vmem [resolvable:$true] %s3979_s26 }
 0x1c8   :  { %s651_s14 = scalar_lea.hbm %s4331_s2, %s1718_s19  ;;  %s3540_s1 = smov [#allocation2 + $0x25]  }
 0x1c9   :  { %s660_s7 = sshll.u32 %s651_s14, 4  ;;  %s3987_s27 = sshll.u32 %s3540_s1, 4  ;;  %s661_s7 = int_to_ptr.hbm [resolvable:$true] %s660_s7  ;;  %s697_s27 = int_to_ptr.vmem [resolvable:$true] %s3987_s27 }
 0x1ca   :  { %s2768_s16 = sshra.s32 %s661_s7, 4  ;;  %s2769_s16 = int_to_ptr.hbm [resolvable:$true] %s2768_s16 }
 0x1cb   :  { %s668_s0 = scalar_lea.hbm %s4331_s2, %s1719_s11  ;;  %s2770_s6 = scalar_lea.hbm %s2769_s16, 1 }
 0x1cc   :  { %p2771_p7 = scmp.ne.s32.totalorder %s2769_s16, %s2770_s6  ;;  %p2773_p8 = scmp.lt.s32.totalorder %s2769_s16, %s4331_s2 }
 0x1cd   :  { %p2774_p9 = scmp.lt.s32.totalorder %s3631_s29, %s2770_s6 }
 0x1cf   :  { %p2775_p10 = por %p2774_p9, %p2773_p8 }
 0x1d1   :  { %p2776_p11 = pnand %p2775_p10, %p2771_p7 }
 0x1d3   :  { %2779 = shalt.err (!%p2776_p11)  }
 0x1d4   :  { %665 = dma.hbm_to_vmem [thread:$0]  %s661_s7, 16, %s663_s25, [#allocation3] }
 0x1d5   :  { %s677_s28 = sshll.u32 %s668_s0, 4  ;;  %s685_s19 = scalar_lea.hbm %s4331_s2, %s3982_s17  ;;  %s678_s28 = int_to_ptr.hbm [resolvable:$true] %s677_s28 }
 0x1d6   :  { %s2792_s21 = sshra.s32 %s678_s28, 4  ;;  %s2793_s21 = int_to_ptr.hbm [resolvable:$true] %s2792_s21 }
 0x1d7   :  { %s2794_s9 = scalar_lea.hbm %s2793_s21, 1  ;;  %p2797_p13 = scmp.lt.s32.totalorder %s2793_s21, %s4331_s2 }
 0x1d8   :  { %p2795_p12 = scmp.ne.s32.totalorder %s2793_s21, %s2794_s9  ;;  %p2798_p0 = scmp.lt.s32.totalorder %s3631_s29, %s2794_s9 }
 0x1da   :  { %p2799_p1 = por %p2798_p0, %p2797_p13 }
 0x1dc   :  { %p2800_p2 = pnand %p2799_p1, %p2795_p12 }
 0x1de   :  { %2803 = shalt.err (!%p2800_p2)  }
 0x1df   :  { %682 = dma.hbm_to_vmem [thread:$0]  %s678_s28, 16, %s680_s26, [#allocation3] }
 0x1e0   :  { %s694_s11 = sshll.u32 %s685_s19, 4  ;;  %s1721_s15 = sld [smem:[#allocation5 + $0x26]]  ;;  %s695_s11 = int_to_ptr.hbm [resolvable:$true] %s694_s11 }
 0x1e1   :  { %s2816_s25 = sshra.s32 %s695_s11, 4  ;;  %s2817_s25 = int_to_ptr.hbm [resolvable:$true] %s2816_s25 }
 0x1e2   :  { %s2818_s8 = scalar_lea.hbm %s2817_s25, 1  ;;  %p2821_p4 = scmp.lt.s32.totalorder %s2817_s25, %s4331_s2 }
 0x1e3   :  { %p2819_p3 = scmp.ne.s32.totalorder %s2817_s25, %s2818_s8  ;;  %p2822_p5 = scmp.lt.s32.totalorder %s3631_s29, %s2818_s8 }
 0x1e5   :  { %p2823_p6 = por %p2822_p5, %p2821_p4 }
 0x1e7   :  { %p2824_p7 = pnand %p2823_p6, %p2819_p3 }
 0x1e9   :  { %2827 = shalt.err (!%p2824_p7)  }
 0x1ea   :  { %699 = dma.hbm_to_vmem [thread:$0]  %s695_s11, 16, %s697_s27, [#allocation3] }
 0x1eb   :  { %s3541_s30 = smov [#allocation2 + $0x26]   ;;  %s1722_s7 = sld [smem:[#allocation5 + $0x27]] }
 0x1ec   :  { %s713_s14 = sshll.u32 %s3541_s30, 4  ;;  %s3542_s26 = smov [#allocation2 + $0x27]   ;;  %s714_s14 = int_to_ptr.vmem [resolvable:$true] %s713_s14 }
 0x1ed   :  { %s4011_s1 = sshll.u32 %s3542_s26, 4  ;;  %s1723_s22 = sld [smem:[#allocation5 + $0x28]]  ;;  %s731_s1 = int_to_ptr.vmem [resolvable:$true] %s4011_s1 }
 0x1ee   :  { %s702_s16 = scalar_lea.hbm %s4331_s2, %s1721_s15  ;;  %s3543_s10 = smov [#allocation2 + $0x28]  }
 0x1ef   :  { %s711_s6 = sshll.u32 %s702_s16, 4  ;;  %s4017_s20 = sshll.u32 %s3543_s10, 4  ;;  %s712_s6 = int_to_ptr.hbm [resolvable:$true] %s711_s6  ;;  %s748_s20 = int_to_ptr.vmem [resolvable:$true] %s4017_s20 }
 0x1f0   :  { %s2840_s27 = sshra.s32 %s712_s6, 4  ;;  %s2841_s27 = int_to_ptr.hbm [resolvable:$true] %s2840_s27 }
 0x1f1   :  { %s2842_s28 = scalar_lea.hbm %s2841_s27, 1  ;;  %p2845_p9 = scmp.lt.s32.totalorder %s2841_s27, %s4331_s2 }
 0x1f2   :  { %p2843_p8 = scmp.ne.s32.totalorder %s2841_s27, %s2842_s28  ;;  %p2846_p10 = scmp.lt.s32.totalorder %s3631_s29, %s2842_s28 }
 0x1f4   :  { %p2847_p11 = por %p2846_p10, %p2845_p9 }
 0x1f6   :  { %p2848_p12 = pnand %p2847_p11, %p2843_p8 }
 0x1f8   :  { %2851 = shalt.err (!%p2848_p12)  }
 0x1f9   :  { %716 = dma.hbm_to_vmem [thread:$0]  %s712_s6, 16, %s714_s14, [#allocation3] }
 0x1fa   :  { %s719_s9 = scalar_lea.hbm %s4331_s2, %s1722_s7  ;;  %s736_s15 = scalar_lea.hbm %s4331_s2, %s1723_s22 }
 0x1fb   :  { %s728_s3 = sshll.u32 %s719_s9, 4  ;;  %s745_s25 = sshll.u32 %s736_s15, 4  ;;  %s729_s3 = int_to_ptr.hbm [resolvable:$true] %s728_s3  ;;  %s746_s25 = int_to_ptr.hbm [resolvable:$true] %s745_s25 }
 0x1fc   :  { %s2864_s8 = sshra.s32 %s729_s3, 4  ;;  %s2865_s8 = int_to_ptr.hbm [resolvable:$true] %s2864_s8 }
 0x1fd   :  { %s2866_s17 = scalar_lea.hbm %s2865_s8, 1  ;;  %p2869_p0 = scmp.lt.s32.totalorder %s2865_s8, %s4331_s2 }
 0x1fe   :  { %p2867_p13 = scmp.ne.s32.totalorder %s2865_s8, %s2866_s17  ;;  %p2870_p1 = scmp.lt.s32.totalorder %s3631_s29, %s2866_s17 }
 0x200   :  { %p2871_p2 = por %p2870_p1, %p2869_p0 }
 0x202   :  { %p2872_p3 = pnand %p2871_p2, %p2867_p13 }
 0x204   :  { %2875 = shalt.err (!%p2872_p3)  }
 0x205   :  { %733 = dma.hbm_to_vmem [thread:$0]  %s729_s3, 16, %s731_s1, [#allocation3] }
 0x206   :  { %s1724_s14 = sld [smem:[#allocation5 + $0x29]]  ;;  %s2888_s7 = sshra.s32 %s746_s25, 4  ;;  %s2889_s7 = int_to_ptr.hbm [resolvable:$true] %s2888_s7 }
 0x207   :  { %s2890_s26 = scalar_lea.hbm %s2889_s7, 1  ;;  %p2893_p5 = scmp.lt.s32.totalorder %s2889_s7, %s4331_s2 }
 0x208   :  { %p2891_p4 = scmp.ne.s32.totalorder %s2889_s7, %s2890_s26  ;;  %p2894_p6 = scmp.lt.s32.totalorder %s3631_s29, %s2890_s26 }
 0x20a   :  { %p2895_p7 = por %p2894_p6, %p2893_p5 }
 0x20c   :  { %p2896_p8 = pnand %p2895_p7, %p2891_p4 }
 0x20e   :  { %2899 = shalt.err (!%p2896_p8)  }
 0x20f   :  { %750 = dma.hbm_to_vmem [thread:$0]  %s746_s25, 16, %s748_s20, [#allocation3] }
 0x210   :  { %s1725_s0 = sld [smem:[#allocation5 + $0x2a]]  ;;  %s3544_s16 = smov [#allocation2 + $0x29]  }
 0x211   :  { %s764_s6 = sshll.u32 %s3544_s16, 4  ;;  %s3545_s1 = smov [#allocation2 + $0x2a]   ;;  %s765_s6 = int_to_ptr.vmem [resolvable:$true] %s764_s6 }
 0x212   :  { %s4040_s10 = sshll.u32 %s3545_s1, 4  ;;  %s4043_s27 = sld [smem:[#allocation5 + $0x2b]]  ;;  %s782_s10 = int_to_ptr.vmem [resolvable:$true] %s4040_s10 }
 0x213   :  { %s753_s18 = scalar_lea.hbm %s4331_s2, %s1724_s14  ;;  %s3546_s21 = smov [#allocation2 + $0x2b]  }
 0x214   :  { %s762_s19 = sshll.u32 %s753_s18, 4  ;;  %s4048_s9 = sshll.u32 %s3546_s21, 4  ;;  %s763_s19 = int_to_ptr.hbm [resolvable:$true] %s762_s19  ;;  %s799_s9 = int_to_ptr.vmem [resolvable:$true] %s4048_s9 }
 0x215   :  { %s2912_s11 = sshra.s32 %s763_s19, 4  ;;  %s2913_s11 = int_to_ptr.hbm [resolvable:$true] %s2912_s11 }
 0x216   :  { %s770_s12 = scalar_lea.hbm %s4331_s2, %s1725_s0  ;;  %s2914_s15 = scalar_lea.hbm %s2913_s11, 1 }
 0x217   :  { %p2915_p9 = scmp.ne.s32.totalorder %s2913_s11, %s2914_s15  ;;  %p2917_p10 = scmp.lt.s32.totalorder %s2913_s11, %s4331_s2 }
 0x218   :  { %p2918_p11 = scmp.lt.s32.totalorder %s3631_s29, %s2914_s15 }
 0x21a   :  { %p2919_p12 = por %p2918_p11, %p2917_p10 }
 0x21c   :  { %p2920_p13 = pnand %p2919_p12, %p2915_p9 }
 0x21e   :  { %2923 = shalt.err (!%p2920_p13)  }
 0x21f   :  { %767 = dma.hbm_to_vmem [thread:$0]  %s763_s19, 16, %s765_s6, [#allocation3] }
 0x220   :  { %s779_s17 = sshll.u32 %s770_s12, 4  ;;  %s787_s14 = scalar_lea.hbm %s4331_s2, %s4043_s27  ;;  %s780_s17 = int_to_ptr.hbm [resolvable:$true] %s779_s17 }
 0x221   :  { %s2936_s7 = sshra.s32 %s780_s17, 4  ;;  %s2937_s7 = int_to_ptr.hbm [resolvable:$true] %s2936_s7 }
 0x222   :  { %s2938_s26 = scalar_lea.hbm %s2937_s7, 1  ;;  %p2941_p1 = scmp.lt.s32.totalorder %s2937_s7, %s4331_s2 }
 0x223   :  { %p2939_p0 = scmp.ne.s32.totalorder %s2937_s7, %s2938_s26  ;;  %p2942_p2 = scmp.lt.s32.totalorder %s3631_s29, %s2938_s26 }
 0x225   :  { %p2943_p3 = por %p2942_p2, %p2941_p1 }
 0x227   :  { %p2944_p4 = pnand %p2943_p3, %p2939_p0 }
 0x229   :  { %2947 = shalt.err (!%p2944_p4)  }
 0x22a   :  { %784 = dma.hbm_to_vmem [thread:$0]  %s780_s17, 16, %s782_s10, [#allocation3] }
 0x22b   :  { %s796_s0 = sshll.u32 %s787_s14, 4  ;;  %s1727_s16 = sld [smem:[#allocation5 + $0x2c]]  ;;  %s797_s0 = int_to_ptr.hbm [resolvable:$true] %s796_s0 }
 0x22c   :  { %s2960_s6 = sshra.s32 %s797_s0, 4  ;;  %s2961_s6 = int_to_ptr.hbm [resolvable:$true] %s2960_s6 }
 0x22d   :  { %s2962_s1 = scalar_lea.hbm %s2961_s6, 1  ;;  %p2965_p6 = scmp.lt.s32.totalorder %s2961_s6, %s4331_s2 }
 0x22e   :  { %p2963_p5 = scmp.ne.s32.totalorder %s2961_s6, %s2962_s1  ;;  %p2966_p7 = scmp.lt.s32.totalorder %s3631_s29, %s2962_s1 }
 0x230   :  { %p2967_p8 = por %p2966_p7, %p2965_p6 }
 0x232   :  { %p2968_p9 = pnand %p2967_p8, %p2963_p5 }
 0x234   :  { %2971 = shalt.err (!%p2968_p9)  }
 0x235   :  { %801 = dma.hbm_to_vmem [thread:$0]  %s797_s0, 16, %s799_s9, [#allocation3] }
 0x236   :  { %s3547_s13 = smov [#allocation2 + $0x2c]   ;;  %s1728_s19 = sld [smem:[#allocation5 + $0x2d]] }
 0x237   :  { %s815_s18 = sshll.u32 %s3547_s13, 4  ;;  %s3548_s10 = smov [#allocation2 + $0x2d]   ;;  %s816_s18 = int_to_ptr.vmem [resolvable:$true] %s815_s18 }
 0x238   :  { %s4072_s21 = sshll.u32 %s3548_s10, 4  ;;  %s1729_s20 = sld [smem:[#allocation5 + $0x2e]]  ;;  %s833_s21 = int_to_ptr.vmem [resolvable:$true] %s4072_s21 }
 0x239   :  { %s804_s11 = scalar_lea.hbm %s4331_s2, %s1727_s16  ;;  %s3549_s25 = smov [#allocation2 + $0x2e]  }
 0x23a   :  { %s813_s15 = sshll.u32 %s804_s11, 4  ;;  %s4078_s8 = sshll.u32 %s3549_s25, 4  ;;  %s814_s15 = int_to_ptr.hbm [resolvable:$true] %s813_s15  ;;  %s850_s8 = int_to_ptr.vmem [resolvable:$true] %s4078_s8 }
 0x23b   :  { %s2984_s9 = sshra.s32 %s814_s15, 4  ;;  %s2985_s9 = int_to_ptr.hbm [resolvable:$true] %s2984_s9 }
 0x23c   :  { %s2986_s17 = scalar_lea.hbm %s2985_s9, 1  ;;  %p2989_p11 = scmp.lt.s32.totalorder %s2985_s9, %s4331_s2 }
 0x23d   :  { %p2987_p10 = scmp.ne.s32.totalorder %s2985_s9, %s2986_s17  ;;  %p2990_p12 = scmp.lt.s32.totalorder %s3631_s29, %s2986_s17 }
 0x23f   :  { %p2991_p13 = por %p2990_p12, %p2989_p11 }
 0x241   :  { %p2992_p0 = pnand %p2991_p13, %p2987_p10 }
 0x243   :  { %2995 = shalt.err (!%p2992_p0)  }
 0x244   :  { %818 = dma.hbm_to_vmem [thread:$0]  %s814_s15, 16, %s816_s18, [#allocation3] }
 0x245   :  { %s821_s26 = scalar_lea.hbm %s4331_s2, %s1728_s19  ;;  %s838_s16 = scalar_lea.hbm %s4331_s2, %s1729_s20 }
 0x246   :  { %s830_s22 = sshll.u32 %s821_s26, 4  ;;  %s847_s6 = sshll.u32 %s838_s16, 4  ;;  %s831_s22 = int_to_ptr.hbm [resolvable:$true] %s830_s22  ;;  %s848_s6 = int_to_ptr.hbm [resolvable:$true] %s847_s6 }
 0x247   :  { %s3008_s1 = sshra.s32 %s831_s22, 4  ;;  %s3009_s1 = int_to_ptr.hbm [resolvable:$true] %s3008_s1 }
 0x248   :  { %s3010_s27 = scalar_lea.hbm %s3009_s1, 1  ;;  %p3013_p2 = scmp.lt.s32.totalorder %s3009_s1, %s4331_s2 }
 0x249   :  { %p3011_p1 = scmp.ne.s32.totalorder %s3009_s1, %s3010_s27  ;;  %p3014_p3 = scmp.lt.s32.totalorder %s3631_s29, %s3010_s27 }
 0x24b   :  { %p3015_p4 = por %p3014_p3, %p3013_p2 }
 0x24d   :  { %p3016_p5 = pnand %p3015_p4, %p3011_p1 }
 0x24f   :  { %3019 = shalt.err (!%p3016_p5)  }
 0x250   :  { %835 = dma.hbm_to_vmem [thread:$0]  %s831_s22, 16, %s833_s21, [#allocation3] }
 0x251   :  { %s1730_s18 = sld [smem:[#allocation5 + $0x2f]]  ;;  %s3032_s19 = sshra.s32 %s848_s6, 4  ;;  %s3033_s19 = int_to_ptr.hbm [resolvable:$true] %s3032_s19 }
 0x252   :  { %s3034_s10 = scalar_lea.hbm %s3033_s19, 1  ;;  %p3037_p7 = scmp.lt.s32.totalorder %s3033_s19, %s4331_s2 }
 0x253   :  { %p3035_p6 = scmp.ne.s32.totalorder %s3033_s19, %s3034_s10  ;;  %p3038_p8 = scmp.lt.s32.totalorder %s3631_s29, %s3034_s10 }
 0x255   :  { %p3039_p9 = por %p3038_p8, %p3037_p7 }
 0x257   :  { %p3040_p10 = pnand %p3039_p9, %p3035_p6 }
 0x259   :  { %3043 = shalt.err (!%p3040_p10)  }
 0x25a   :  { %852 = dma.hbm_to_vmem [thread:$0]  %s848_s6, 16, %s850_s8, [#allocation3] }
 0x25b   :  { %s1731_s12 = sld [smem:[#allocation5 + $0x30]]  ;;  %s3550_s11 = smov [#allocation2 + $0x2f]  }
 0x25c   :  { %s866_s15 = sshll.u32 %s3550_s11, 4  ;;  %s3551_s21 = smov [#allocation2 + $0x30]   ;;  %s867_s15 = int_to_ptr.vmem [resolvable:$true] %s866_s15 }
 0x25d   :  { %s4101_s25 = sshll.u32 %s3551_s21, 4  ;;  %s4104_s9 = sld [smem:[#allocation5 + $0x31]]  ;;  %s884_s25 = int_to_ptr.vmem [resolvable:$true] %s4101_s25 }
 0x25e   :  { %s855_s30 = scalar_lea.hbm %s4331_s2, %s1730_s18  ;;  %s3552_s7 = smov [#allocation2 + $0x31]  }
 0x25f   :  { %s864_s14 = sshll.u32 %s855_s30, 4  ;;  %s4109_s26 = sshll.u32 %s3552_s7, 4  ;;  %s865_s14 = int_to_ptr.hbm [resolvable:$true] %s864_s14  ;;  %s901_s26 = int_to_ptr.vmem [resolvable:$true] %s4109_s26 }
 0x260   :  { %s3056_s0 = sshra.s32 %s865_s14, 4  ;;  %s3057_s0 = int_to_ptr.hbm [resolvable:$true] %s3056_s0 }
 0x261   :  { %s872_s24 = scalar_lea.hbm %s4331_s2, %s1731_s12  ;;  %s3058_s16 = scalar_lea.hbm %s3057_s0, 1 }
 0x262   :  { %p3059_p11 = scmp.ne.s32.totalorder %s3057_s0, %s3058_s16  ;;  %p3061_p12 = scmp.lt.s32.totalorder %s3057_s0, %s4331_s2 }
 0x263   :  { %p3062_p13 = scmp.lt.s32.totalorder %s3631_s29, %s3058_s16 }
 0x265   :  { %p3063_p0 = por %p3062_p13, %p3061_p12 }
 0x267   :  { %p3064_p1 = pnand %p3063_p0, %p3059_p11 }
 0x269   :  { %3067 = shalt.err (!%p3064_p1)  }
 0x26a   :  { %869 = dma.hbm_to_vmem [thread:$0]  %s865_s14, 16, %s867_s15, [#allocation3] }
 0x26b   :  { %s881_s27 = sshll.u32 %s872_s24, 4  ;;  %s889_s18 = scalar_lea.hbm %s4331_s2, %s4104_s9  ;;  %s882_s27 = int_to_ptr.hbm [resolvable:$true] %s881_s27 }
 0x26c   :  { %s3080_s19 = sshra.s32 %s882_s27, 4  ;;  %s3081_s19 = int_to_ptr.hbm [resolvable:$true] %s3080_s19 }
 0x26d   :  { %s3082_s10 = scalar_lea.hbm %s3081_s19, 1  ;;  %p3085_p3 = scmp.lt.s32.totalorder %s3081_s19, %s4331_s2 }
 0x26e   :  { %p3083_p2 = scmp.ne.s32.totalorder %s3081_s19, %s3082_s10  ;;  %p3086_p4 = scmp.lt.s32.totalorder %s3631_s29, %s3082_s10 }
 0x270   :  { %p3087_p5 = por %p3086_p4, %p3085_p3 }
 0x272   :  { %p3088_p6 = pnand %p3087_p5, %p3083_p2 }
 0x274   :  { %3091 = shalt.err (!%p3088_p6)  }
 0x275   :  { %886 = dma.hbm_to_vmem [thread:$0]  %s882_s27, 16, %s884_s25, [#allocation3] }
 0x276   :  { %s898_s12 = sshll.u32 %s889_s18, 4  ;;  %s1733_s11 = sld [smem:[#allocation5 + $0x32]]  ;;  %s899_s12 = int_to_ptr.hbm [resolvable:$true] %s898_s12 }
 0x277   :  { %s3104_s15 = sshra.s32 %s899_s12, 4  ;;  %s3105_s15 = int_to_ptr.hbm [resolvable:$true] %s3104_s15 }
 0x278   :  { %s3106_s21 = scalar_lea.hbm %s3105_s15, 1  ;;  %p3109_p8 = scmp.lt.s32.totalorder %s3105_s15, %s4331_s2 }
 0x279   :  { %p3107_p7 = scmp.ne.s32.totalorder %s3105_s15, %s3106_s21  ;;  %p3110_p9 = scmp.lt.s32.totalorder %s3631_s29, %s3106_s21 }
 0x27b   :  { %p3111_p10 = por %p3110_p9, %p3109_p8 }
 0x27d   :  { %p3112_p11 = pnand %p3111_p10, %p3107_p7 }
 0x27f   :  { %3115 = shalt.err (!%p3112_p11)  }
 0x280   :  { %903 = dma.hbm_to_vmem [thread:$0]  %s899_s12, 16, %s901_s26, [#allocation3] }
 0x281   :  { %s3553_s23 = smov [#allocation2 + $0x32]   ;;  %s1734_s14 = sld [smem:[#allocation5 + $0x33]] }
 0x282   :  { %s917_s30 = sshll.u32 %s3553_s23, 4  ;;  %s3554_s25 = smov [#allocation2 + $0x33]   ;;  %s918_s30 = int_to_ptr.vmem [resolvable:$true] %s917_s30 }
 0x283   :  { %s4133_s7 = sshll.u32 %s3554_s25, 4  ;;  %s1735_s8 = sld [smem:[#allocation5 + $0x34]]  ;;  %s935_s7 = int_to_ptr.vmem [resolvable:$true] %s4133_s7 }
 0x284   :  { %s906_s0 = scalar_lea.hbm %s4331_s2, %s1733_s11  ;;  %s3555_s6 = smov [#allocation2 + $0x34]  }
 0x285   :  { %s915_s16 = sshll.u32 %s906_s0, 4  ;;  %s4139_s1 = sshll.u32 %s3555_s6, 4  ;;  %s916_s16 = int_to_ptr.hbm [resolvable:$true] %s915_s16  ;;  %s952_s1 = int_to_ptr.vmem [resolvable:$true] %s4139_s1 }
 0x286   :  { %s3128_s26 = sshra.s32 %s916_s16, 4  ;;  %s3129_s26 = int_to_ptr.hbm [resolvable:$true] %s3128_s26 }
 0x287   :  { %s3130_s27 = scalar_lea.hbm %s3129_s26, 1  ;;  %p3133_p13 = scmp.lt.s32.totalorder %s3129_s26, %s4331_s2 }
 0x288   :  { %p3131_p12 = scmp.ne.s32.totalorder %s3129_s26, %s3130_s27  ;;  %p3134_p0 = scmp.lt.s32.totalorder %s3631_s29, %s3130_s27 }
 0x28a   :  { %p3135_p1 = por %p3134_p0, %p3133_p13 }
 0x28c   :  { %p3136_p2 = pnand %p3135_p1, %p3131_p12 }
 0x28e   :  { %3139 = shalt.err (!%p3136_p2)  }
 0x28f   :  { %920 = dma.hbm_to_vmem [thread:$0]  %s916_s16, 16, %s918_s30, [#allocation3] }
 0x290   :  { %s923_s10 = scalar_lea.hbm %s4331_s2, %s1734_s14  ;;  %s940_s11 = scalar_lea.hbm %s4331_s2, %s1735_s8 }
 0x291   :  { %s932_s20 = sshll.u32 %s923_s10, 4  ;;  %s949_s15 = sshll.u32 %s940_s11, 4  ;;  %s933_s20 = int_to_ptr.hbm [resolvable:$true] %s932_s20  ;;  %s950_s15 = int_to_ptr.hbm [resolvable:$true] %s949_s15 }
 0x292   :  { %s3152_s21 = sshra.s32 %s933_s20, 4  ;;  %s3153_s21 = int_to_ptr.hbm [resolvable:$true] %s3152_s21 }
 0x293   :  { %s3154_s9 = scalar_lea.hbm %s3153_s21, 1  ;;  %p3157_p4 = scmp.lt.s32.totalorder %s3153_s21, %s4331_s2 }
 0x294   :  { %p3155_p3 = scmp.ne.s32.totalorder %s3153_s21, %s3154_s9  ;;  %p3158_p5 = scmp.lt.s32.totalorder %s3631_s29, %s3154_s9 }
 0x296   :  { %p3159_p6 = por %p3158_p5, %p3157_p4 }
 0x298   :  { %p3160_p7 = pnand %p3159_p6, %p3155_p3 }
 0x29a   :  { %3163 = shalt.err (!%p3160_p7)  }
 0x29b   :  { %937 = dma.hbm_to_vmem [thread:$0]  %s933_s20, 16, %s935_s7, [#allocation3] }
 0x29c   :  { %s1736_s30 = sld [smem:[#allocation5 + $0x35]]  ;;  %s3176_s14 = sshra.s32 %s950_s15, 4  ;;  %s3177_s14 = int_to_ptr.hbm [resolvable:$true] %s3176_s14 }
 0x29d   :  { %s3178_s25 = scalar_lea.hbm %s3177_s14, 1  ;;  %p3181_p9 = scmp.lt.s32.totalorder %s3177_s14, %s4331_s2 }
 0x29e   :  { %p3179_p8 = scmp.ne.s32.totalorder %s3177_s14, %s3178_s25  ;;  %p3182_p10 = scmp.lt.s32.totalorder %s3631_s29, %s3178_s25 }
 0x2a0   :  { %p3183_p11 = por %p3182_p10, %p3181_p9 }
 0x2a2   :  { %p3184_p12 = pnand %p3183_p11, %p3179_p8 }
 0x2a4   :  { %3187 = shalt.err (!%p3184_p12)  }
 0x2a5   :  { %954 = dma.hbm_to_vmem [thread:$0]  %s950_s15, 16, %s952_s1, [#allocation3] }
 0x2a6   :  { %s1737_s24 = sld [smem:[#allocation5 + $0x36]]  ;;  %s3556_s0 = smov [#allocation2 + $0x35]  }
 0x2a7   :  { %s968_s16 = sshll.u32 %s3556_s0, 4  ;;  %s3557_s7 = smov [#allocation2 + $0x36]   ;;  %s969_s16 = int_to_ptr.vmem [resolvable:$true] %s968_s16 }
 0x2a8   :  { %s4162_s6 = sshll.u32 %s3557_s7, 4  ;;  %s4165_s26 = sld [smem:[#allocation5 + $0x37]]  ;;  %s986_s6 = int_to_ptr.vmem [resolvable:$true] %s4162_s6 }
 0x2a9   :  { %s957_s13 = scalar_lea.hbm %s4331_s2, %s1736_s30  ;;  %s3558_s19 = smov [#allocation2 + $0x37]  }
 0x2aa   :  { %s966_s18 = sshll.u32 %s957_s13, 4  ;;  %s4170_s10 = sshll.u32 %s3558_s19, 4  ;;  %s967_s18 = int_to_ptr.hbm [resolvable:$true] %s966_s18  ;;  %s1003_s10 = int_to_ptr.vmem [resolvable:$true] %s4170_s10 }
 0x2ab   :  { %s3200_s12 = sshra.s32 %s967_s18, 4  ;;  %s3201_s12 = int_to_ptr.hbm [resolvable:$true] %s3200_s12 }
 0x2ac   :  { %s974_s3 = scalar_lea.hbm %s4331_s2, %s1737_s24  ;;  %s3202_s11 = scalar_lea.hbm %s3201_s12, 1 }
 0x2ad   :  { %p3203_p13 = scmp.ne.s32.totalorder %s3201_s12, %s3202_s11  ;;  %p3205_p0 = scmp.lt.s32.totalorder %s3201_s12, %s4331_s2 }
 0x2ae   :  { %p3206_p1 = scmp.lt.s32.totalorder %s3631_s29, %s3202_s11 }
 0x2b0   :  { %p3207_p2 = por %p3206_p1, %p3205_p0 }
 0x2b2   :  { %p3208_p3 = pnand %p3207_p2, %p3203_p13 }
 0x2b4   :  { %3211 = shalt.err (!%p3208_p3)  }
 0x2b5   :  { %971 = dma.hbm_to_vmem [thread:$0]  %s967_s18, 16, %s969_s16, [#allocation3] }
 0x2b6   :  { %s983_s9 = sshll.u32 %s974_s3, 4  ;;  %s991_s30 = scalar_lea.hbm %s4331_s2, %s4165_s26  ;;  %s984_s9 = int_to_ptr.hbm [resolvable:$true] %s983_s9 }
 0x2b7   :  { %s3224_s14 = sshra.s32 %s984_s9, 4  ;;  %s3225_s14 = int_to_ptr.hbm [resolvable:$true] %s3224_s14 }
 0x2b8   :  { %s3226_s25 = scalar_lea.hbm %s3225_s14, 1  ;;  %p3229_p5 = scmp.lt.s32.totalorder %s3225_s14, %s4331_s2 }
 0x2b9   :  { %p3227_p4 = scmp.ne.s32.totalorder %s3225_s14, %s3226_s25  ;;  %p3230_p6 = scmp.lt.s32.totalorder %s3631_s29, %s3226_s25 }
 0x2bb   :  { %p3231_p7 = por %p3230_p6, %p3229_p5 }
 0x2bd   :  { %p3232_p8 = pnand %p3231_p7, %p3227_p4 }
 0x2bf   :  { %3235 = shalt.err (!%p3232_p8)  }
 0x2c0   :  { %988 = dma.hbm_to_vmem [thread:$0]  %s984_s9, 16, %s986_s6, [#allocation3] }
 0x2c1   :  { %s1000_s24 = sshll.u32 %s991_s30, 4  ;;  %s1739_s0 = sld [smem:[#allocation5 + $0x38]]  ;;  %s1001_s24 = int_to_ptr.hbm [resolvable:$true] %s1000_s24 }
 0x2c2   :  { %s3248_s16 = sshra.s32 %s1001_s24, 4  ;;  %s3249_s16 = int_to_ptr.hbm [resolvable:$true] %s3248_s16 }
 0x2c3   :  { %s3250_s7 = scalar_lea.hbm %s3249_s16, 1  ;;  %p3253_p10 = scmp.lt.s32.totalorder %s3249_s16, %s4331_s2 }
 0x2c4   :  { %p3251_p9 = scmp.ne.s32.totalorder %s3249_s16, %s3250_s7  ;;  %p3254_p11 = scmp.lt.s32.totalorder %s3631_s29, %s3250_s7 }
 0x2c6   :  { %p3255_p12 = por %p3254_p11, %p3253_p10 }
 0x2c8   :  { %p3256_p13 = pnand %p3255_p12, %p3251_p9 }
 0x2ca   :  { %3259 = shalt.err (!%p3256_p13)  }
 0x2cb   :  { %1005 = dma.hbm_to_vmem [thread:$0]  %s1001_s24, 16, %s1003_s10, [#allocation3] }
 0x2cc   :  { %s3559_s28 = smov [#allocation2 + $0x38]   ;;  %s1740_s18 = sld [smem:[#allocation5 + $0x39]] }
 0x2cd   :  { %s1019_s13 = sshll.u32 %s3559_s28, 4  ;;  %s3560_s6 = smov [#allocation2 + $0x39]   ;;  %s1020_s13 = int_to_ptr.vmem [resolvable:$true] %s1019_s13 }
 0x2ce   :  { %s4194_s19 = sshll.u32 %s3560_s6, 4  ;;  %s1741_s1 = sld [smem:[#allocation5 + $0x3a]]  ;;  %s1037_s19 = int_to_ptr.vmem [resolvable:$true] %s4194_s19 }
 0x2cf   :  { %s1008_s12 = scalar_lea.hbm %s4331_s2, %s1739_s0  ;;  %s3561_s15 = smov [#allocation2 + $0x3a]  }
 0x2d0   :  { %s1017_s11 = sshll.u32 %s1008_s12, 4  ;;  %s4200_s21 = sshll.u32 %s3561_s15, 4  ;;  %s1018_s11 = int_to_ptr.hbm [resolvable:$true] %s1017_s11  ;;  %s1054_s21 = int_to_ptr.vmem [resolvable:$true] %s4200_s21 }
 0x2d1   :  { %s3272_s10 = sshra.s32 %s1018_s11, 4  ;;  %s3273_s10 = int_to_ptr.hbm [resolvable:$true] %s3272_s10 }
 0x2d2   :  { %s3274_s9 = scalar_lea.hbm %s3273_s10, 1  ;;  %p3277_p1 = scmp.lt.s32.totalorder %s3273_s10, %s4331_s2 }
 0x2d3   :  { %p3275_p0 = scmp.ne.s32.totalorder %s3273_s10, %s3274_s9  ;;  %p3278_p2 = scmp.lt.s32.totalorder %s3631_s29, %s3274_s9 }
 0x2d5   :  { %p3279_p3 = por %p3278_p2, %p3277_p1 }
 0x2d7   :  { %p3280_p4 = pnand %p3279_p3, %p3275_p0 }
 0x2d9   :  { %3283 = shalt.err (!%p3280_p4)  }
 0x2da   :  { %1022 = dma.hbm_to_vmem [thread:$0]  %s1018_s11, 16, %s1020_s13, [#allocation3] }
 0x2db   :  { %s1025_s25 = scalar_lea.hbm %s4331_s2, %s1740_s18  ;;  %s1042_s0 = scalar_lea.hbm %s4331_s2, %s1741_s1 }
 0x2dc   :  { %s1034_s8 = sshll.u32 %s1025_s25, 4  ;;  %s1051_s16 = sshll.u32 %s1042_s0, 4  ;;  %s1035_s8 = int_to_ptr.hbm [resolvable:$true] %s1034_s8  ;;  %s1052_s16 = int_to_ptr.hbm [resolvable:$true] %s1051_s16 }
 0x2dd   :  { %s3296_s7 = sshra.s32 %s1035_s8, 4  ;;  %s3297_s7 = int_to_ptr.hbm [resolvable:$true] %s3296_s7 }
 0x2de   :  { %s3298_s26 = scalar_lea.hbm %s3297_s7, 1  ;;  %p3301_p6 = scmp.lt.s32.totalorder %s3297_s7, %s4331_s2 }
 0x2df   :  { %p3299_p5 = scmp.ne.s32.totalorder %s3297_s7, %s3298_s26  ;;  %p3302_p7 = scmp.lt.s32.totalorder %s3631_s29, %s3298_s26 }
 0x2e1   :  { %p3303_p8 = por %p3302_p7, %p3301_p6 }
 0x2e3   :  { %p3304_p9 = pnand %p3303_p8, %p3299_p5 }
 0x2e5   :  { %3307 = shalt.err (!%p3304_p9)  }
 0x2e6   :  { %1039 = dma.hbm_to_vmem [thread:$0]  %s1035_s8, 16, %s1037_s19, [#allocation3] }
 0x2e7   :  { %s1742_s13 = sld [smem:[#allocation5 + $0x3b]]  ;;  %s3320_s18 = sshra.s32 %s1052_s16, 4  ;;  %s3321_s18 = int_to_ptr.hbm [resolvable:$true] %s3320_s18 }
 0x2e8   :  { %s3322_s6 = scalar_lea.hbm %s3321_s18, 1  ;;  %p3325_p11 = scmp.lt.s32.totalorder %s3321_s18, %s4331_s2 }
 0x2e9   :  { %p3323_p10 = scmp.ne.s32.totalorder %s3321_s18, %s3322_s6  ;;  %p3326_p12 = scmp.lt.s32.totalorder %s3631_s29, %s3322_s6 }
 0x2eb   :  { %p3327_p13 = por %p3326_p12, %p3325_p11 }
 0x2ed   :  { %p3328_p0 = pnand %p3327_p13, %p3323_p10 }
 0x2ef   :  { %3331 = shalt.err (!%p3328_p0)  }
 0x2f0   :  { %1056 = dma.hbm_to_vmem [thread:$0]  %s1052_s16, 16, %s1054_s21, [#allocation3] }
 0x2f1   :  { %s1743_s3 = sld [smem:[#allocation5 + $0x3c]]  ;;  %s3562_s12 = smov [#allocation2 + $0x3b]  }
 0x2f2   :  { %s1070_s11 = sshll.u32 %s3562_s12, 4  ;;  %s3563_s19 = smov [#allocation2 + $0x3c]   ;;  %s1071_s11 = int_to_ptr.vmem [resolvable:$true] %s1070_s11 }
 0x2f3   :  { %s4223_s15 = sshll.u32 %s3563_s19, 4  ;;  %s4226_s10 = sld [smem:[#allocation5 + $0x3d]]  ;;  %s1088_s15 = int_to_ptr.vmem [resolvable:$true] %s4223_s15 }
 0x2f4   :  { %s1059_s23 = scalar_lea.hbm %s4331_s2, %s1742_s13  ;;  %s3564_s14 = smov [#allocation2 + $0x3d]  }
 0x2f5   :  { %s1068_s30 = sshll.u32 %s1059_s23, 4  ;;  %s4231_s25 = sshll.u32 %s3564_s14, 4  ;;  %s1069_s30 = int_to_ptr.hbm [resolvable:$true] %s1068_s30  ;;  %s1105_s25 = int_to_ptr.vmem [resolvable:$true] %s4231_s25 }
 0x2f6   :  { %s3344_s24 = sshra.s32 %s1069_s30, 4  ;;  %s3345_s24 = int_to_ptr.hbm [resolvable:$true] %s3344_s24 }
 0x2f7   :  { %s1076_s22 = scalar_lea.hbm %s4331_s2, %s1743_s3  ;;  %s3346_s0 = scalar_lea.hbm %s3345_s24, 1 }
 0x2f8   :  { %p3347_p1 = scmp.ne.s32.totalorder %s3345_s24, %s3346_s0  ;;  %p3349_p2 = scmp.lt.s32.totalorder %s3345_s24, %s4331_s2 }
 0x2f9   :  { %p3350_p3 = scmp.lt.s32.totalorder %s3631_s29, %s3346_s0 }
 0x2fb   :  { %p3351_p4 = por %p3350_p3, %p3349_p2 }
 0x2fd   :  { %p3352_p5 = pnand %p3351_p4, %p3347_p1 }
 0x2ff   :  { %3355 = shalt.err (!%p3352_p5)  }
 0x300   :  { %1073 = dma.hbm_to_vmem [thread:$0]  %s1069_s30, 16, %s1071_s11, [#allocation3] }
 0x301   :  { %s1085_s26 = sshll.u32 %s1076_s22, 4  ;;  %s1093_s13 = scalar_lea.hbm %s4331_s2, %s4226_s10  ;;  %s1086_s26 = int_to_ptr.hbm [resolvable:$true] %s1085_s26 }
 0x302   :  { %s3368_s18 = sshra.s32 %s1086_s26, 4  ;;  %s3369_s18 = int_to_ptr.hbm [resolvable:$true] %s3368_s18 }
 0x303   :  { %s3370_s6 = scalar_lea.hbm %s3369_s18, 1  ;;  %p3373_p7 = scmp.lt.s32.totalorder %s3369_s18, %s4331_s2 }
 0x304   :  { %p3371_p6 = scmp.ne.s32.totalorder %s3369_s18, %s3370_s6  ;;  %p3374_p8 = scmp.lt.s32.totalorder %s3631_s29, %s3370_s6 }
 0x306   :  { %p3375_p9 = por %p3374_p8, %p3373_p7 }
 0x308   :  { %p3376_p10 = pnand %p3375_p9, %p3371_p6 }
 0x30a   :  { %3379 = shalt.err (!%p3376_p10)  }
 0x30b   :  { %1090 = dma.hbm_to_vmem [thread:$0]  %s1086_s26, 16, %s1088_s15, [#allocation3] }
 0x30c   :  { %s1102_s3 = sshll.u32 %s1093_s13, 4  ;;  %s1745_s12 = sld [smem:[#allocation5 + $0x3e]]  ;;  %s1103_s3 = int_to_ptr.hbm [resolvable:$true] %s1102_s3 }
 0x30d   :  { %s3392_s11 = sshra.s32 %s1103_s3, 4  ;;  %s3393_s11 = int_to_ptr.hbm [resolvable:$true] %s3392_s11 }
 0x30e   :  { %s3394_s19 = scalar_lea.hbm %s3393_s11, 1  ;;  %p3397_p12 = scmp.lt.s32.totalorder %s3393_s11, %s4331_s2 }
 0x30f   :  { %p3395_p11 = scmp.ne.s32.totalorder %s3393_s11, %s3394_s19  ;;  %p3398_p13 = scmp.lt.s32.totalorder %s3631_s29, %s3394_s19 }
 0x311   :  { %p3399_p0 = por %p3398_p13, %p3397_p12 }
 0x313   :  { %p3400_p1 = pnand %p3399_p0, %p3395_p11 }
 0x315   :  { %3403 = shalt.err (!%p3400_p1)  }
 0x316   :  { %1107 = dma.hbm_to_vmem [thread:$0]  %s1103_s3, 16, %s1105_s25, [#allocation3] }
 0x317   :  { %s3565_s17 = smov [#allocation2 + $0x3e]   ;;  %s1746_s15 = sld [smem:[#allocation5 + $0x3f]] }
 0x318   :  { %s1121_s23 = sshll.u32 %s3565_s17, 4  ;;  %s1110_s21 = scalar_lea.hbm %s4331_s2, %s1745_s12  ;;  %s1122_s23 = int_to_ptr.vmem [resolvable:$true] %s1121_s23 }
 0x319   :  { %s1119_s8 = sshll.u32 %s1110_s21, 4  ;;  %s3566_s22 = smov [#allocation2 + $0x3f]   ;;  %s1120_s8 = int_to_ptr.hbm [resolvable:$true] %s1119_s8 }
 0x31a   :  { %s1138_s24 = sshll.u32 %s3566_s22, 4  ;;  %s3416_s0 = sshra.s32 %s1120_s8, 4  ;;  %s3417_s0 = int_to_ptr.hbm [resolvable:$true] %s3416_s0  ;;  %s1139_s24 = int_to_ptr.vmem [resolvable:$true] %s1138_s24 }
 0x31b   :  { %s3418_s16 = scalar_lea.hbm %s3417_s0, 1  ;;  %p3421_p3 = scmp.lt.s32.totalorder %s3417_s0, %s4331_s2 }
 0x31c   :  { %p3419_p2 = scmp.ne.s32.totalorder %s3417_s0, %s3418_s16  ;;  %p3422_p4 = scmp.lt.s32.totalorder %s3631_s29, %s3418_s16 }
 0x31e   :  { %p3423_p5 = por %p3422_p4, %p3421_p3 }
 0x320   :  { %p3424_p6 = pnand %p3423_p5, %p3419_p2 }
 0x322   :  { %3427 = shalt.err (!%p3424_p6)  }
 0x323   :  { %1124 = dma.hbm_to_vmem [thread:$0]  %s1120_s8, 16, %s1122_s23, [#allocation3] }
 0x324   :  { %s1127_s28 = scalar_lea.hbm %s4331_s2, %s1746_s15 }
 0x325   :  { %s1136_s13 = sshll.u32 %s1127_s28, 4  ;;  %s1137_s13 = int_to_ptr.hbm [resolvable:$true] %s1136_s13 }
 0x326   :  { %s3440_s18 = sshra.s32 %s1137_s13, 4  ;;  %s3441_s18 = int_to_ptr.hbm [resolvable:$true] %s3440_s18 }
 0x327   :  { %s3442_s6 = scalar_lea.hbm %s3441_s18, 1  ;;  %p3445_p8 = scmp.lt.s32.totalorder %s3441_s18, %s4331_s2 }
 0x328   :  { %p3443_p7 = scmp.ne.s32.totalorder %s3441_s18, %s3442_s6  ;;  %p3446_p9 = scmp.lt.s32.totalorder %s3631_s29, %s3442_s6 }
 0x32a   :  { %p3447_p10 = por %p3446_p9, %p3445_p8 }
 0x32c   :  { %p3448_p11 = pnand %p3447_p10, %p3443_p7 }
 0x32e   :  { %3451 = shalt.err (!%p3448_p11)  }
 0x32f   :  { %1141 = dma.hbm_to_vmem [thread:$0]  %s1137_s13, 16, %s1139_s24, [#allocation3] }
 0x330   :  { %3494 = dma.done.wait [#allocation3], 1024 }
 0x331   :  { %3495 = vsyncadd [#allocation3], 4294966272  ;;  %v4269_v0 = vld [vmem:[#allocation2] sm:$0xff]  ;;  %v4271_v1 = vld [vmem:[#allocation2 + $0x10] sm:$0xff]  ;;  %v1329_v27 = vlaneseq  ;;  %vm1339_vm0 = vcmask 1041409   ;;  %vm1341_vm1 = vcmask 1042434  }
 0x332   :  { %v4273_v2 = vld [vmem:[#allocation2 + $0x20] sm:$0xff]  ;;  %v1281_v3 = vperm.slane %v4269_v0, 0  ;;  %v1283_v4 = vperm.slane %v4271_v1, 0  ;;  %v4278_v6 = vld [vmem:[#allocation2 + $0x8] sm:$0xff]  ;;  %v4280_v7 = vld [vmem:[#allocation2 + $0x18] sm:$0xff]  ;;  %vm1343_vm2 = vcmask 1043459  }
 0x333   :  { %v1285_v5 = vperm.slane %v4273_v2, 0  ;;  %v4285_v11 = vld [vmem:[#allocation2 + $0x28] sm:$0xff]  ;;  %v1282_v12 = vperm.slane %v4278_v6, 0  ;;  %v1284_v13 = vperm.slane %v4280_v7, 0  ;;  %v4293_v18 = vld [vmem:[#allocation2 + $0x30] sm:$0xff]  ;;  %v4295_v19 = vld [vmem:[#allocation2 + $0x38] sm:$0xff] }
 0x334   :  { %v1289_v8 = vmul.f32 %v1281_v3, %v4269_v0  ;;  %v1291_v9 = vmul.f32 %v1283_v4, %v4271_v1  ;;  %v1286_v14 = vperm.slane %v4285_v11, 0  ;;  %v1287_v20 = vperm.slane %v4293_v18, 0  ;;  %v1279_v51 = vld [vmem:[#allocation6] sm:$0xff]  ;;  %s3567_s3 = smov [#allocation11]   ;;  %s1603_s10 = sshll.u32 %s4334_s5, 4  ;;  %s1604_s10 = int_to_ptr.hbm [resolvable:$true] %s1603_s10 }
 0x335   :  { %v1293_v10 = vmul.f32 %v1285_v5, %v4273_v2  ;;  %v1290_v15 = vmul.f32 %v1282_v12, %v4278_v6  ;;  %v1292_v16 = vmul.f32 %v1284_v13, %v4280_v7  ;;  %v1288_v21 = vperm.slane %v4295_v19, 0  ;;  %s1601_s12 = sshll.u32 %s3567_s3, 4  ;;  %s1602_s12 = int_to_ptr.vmem [resolvable:$true] %s1601_s12 }
 0x336   :  { %1297 = vadd.xlane.f32.xlu0 %v1289_v8  ;;  %1301 = vadd.xlane.f32.xlu1 %v1291_v9  ;;  %v1294_v17 = vmul.f32 %v1286_v14, %v4285_v11  ;;  %v1295_v22 = vmul.f32 %v1287_v20, %v4293_v18  ;;  %v1330_v28 = vand.u32 127, %v1329_v27  ;;  %vm1345_vm3 = vcmask 1044484  }
 0x337   :  { %1305 = vadd.xlane.f32.xlu2 %v1293_v10  ;;  %v1296_v23 = vmul.f32 %v1288_v21, %v4295_v19  ;;  %vm1347_vm4 = vcmask 1045509   ;;  %vm1349_vm5 = vcmask 1046534   ;;  %vm1351_vm6 = vcmask 1047559   ;;  %v1787_v21 = vld [vmem:[#allocation9 + $0x38] sm:$0xff] }
 0x338   :  { %vm1280_vm7 = vcmp.ne.s32.totalorder %v1279_v51, 0  ;;  %vm1355_vm8 = vcmask 64512   ;;  %v1369_v4 = vshrl.u32 %v1329_v27, 7  ;;  %1580 = vmatpush.bf16.msra.mxu0 %v1787_v21 }
 0x33a   :  { %1860 = vset.pattern.permute.xlu0 %v1369_v4  ;;  %1859 = vset.pattern.permute.xlu2 %v1369_v4 }
 0x33b   :  { %1858 = vset.pattern.permute.xlu1 %v1369_v4 }
 0x33e   :  { %1299 = vadd.xlane.f32.xlu0 %v1290_v15  ;;  %1303 = vadd.xlane.f32.xlu1 %v1292_v16 }
 0x33f   :  { %1307 = vadd.xlane.f32.xlu2 %v1294_v17 }
 0x346   :  { %1309 = vadd.xlane.f32.xlu0 %v1295_v22  ;;  %1311 = vadd.xlane.f32.xlu1 %v1296_v23  ;;  %v1786_v23 = vld [vmem:[#allocation9 + $0x30] sm:$0xff] }
 0x347   :  { %1581 = vmatpush.bf16.msra.mxu0 %v1786_v23 }
 0x3a9   :  { %v1298_v24 = vpop.xlane.xlu0 %1297  ;;  %v1302_v25 = vpop.xlane.xlu1 %1301 }
 0x3aa   :  { %v1306_v26 = vpop.xlane.xlu2 %1305  ;;  %v1313_v29 = vmul.f32 0.088388346, %v1298_v24  ;;  %v1315_v30 = vmul.f32 0.088388346, %v1302_v25  ;;  %v1785_v24 = vld [vmem:[#allocation9 + $0x28] sm:$0xff] }
 0x3ab   :  { %v1317_v37 = vmul.f32 0.088388346, %v1306_v26  ;;  %1582 = vmatpush.bf16.msra.mxu0 %v1785_v24  ;;  %v1784_v26 = vld [vmem:[#allocation9 + $0x20] sm:$0xff] }
 0x3ac   :  { %v1331_v36 = vperm.slane %v1313_v29, %v1330_v28  ;;  %v1333_v40 = vperm.slane %v1315_v30, %v1330_v28 }
 0x3ad   :  { %v1335_v44 = vperm.slane %v1317_v37, %v1330_v28 }
 0x3af   :  { %1583 = vmatpush.bf16.msra.mxu0 %v1784_v26 }
 0x3b1   :  { %v1300_v31 = vpop.xlane.xlu0 %1299  ;;  %v1304_v32 = vpop.xlane.xlu1 %1303 }
 0x3b2   :  { %v1314_v33 = vmul.f32 0.088388346, %v1300_v31  ;;  %v1316_v34 = vmul.f32 0.088388346, %v1304_v32  ;;  %v1308_v35 = vpop.xlane.xlu2 %1307  ;;  %v1782_v31 = vld [vmem:[#allocation9 + $0x10] sm:$0xff] }
 0x3b3   :  { %v1318_v41 = vmul.f32 0.088388346, %v1308_v35 }
 0x3b4   :  { %v1332_v38 = vperm.slane %v1314_v33, %v1330_v28  ;;  %v1334_v39 = vperm.slane %v1316_v34, %v1330_v28  ;;  %v1781_v34 = vld [vmem:[#allocation9 + $0x8] sm:$0xff] }
 0x3b5   :  { %v1336_v46 = vperm.slane %v1318_v41, %v1330_v28  ;;  %v1780_v41 = vld [vmem:[#allocation9] sm:$0xff] }
 0x3b6   :  { %v1340_v42 = vsel %vm1339_vm0, %v1332_v38, %v1331_v36 }
 0x3b7   :  { %v1342_v43 = vsel %vm1341_vm1, %v1333_v40, %v1340_v42 }
 0x3b8   :  { %v1344_v45 = vsel %vm1343_vm2, %v1334_v39, %v1342_v43 }
 0x3b9   :  { %v1310_v47 = vpop.xlane.xlu0 %1309  ;;  %v1312_v48 = vpop.xlane.xlu1 %1311  ;;  %v1346_v52 = vsel %vm1345_vm3, %v1335_v44, %v1344_v45 }
 0x3ba   :  { %v1319_v49 = vmul.f32 0.088388346, %v1310_v47  ;;  %v1320_v50 = vmul.f32 0.088388346, %v1312_v48  ;;  %v1348_v55 = vsel %vm1347_vm4, %v1336_v46, %v1346_v52 }
 0x3bc   :  { %v1337_v53 = vperm.slane %v1319_v49, %v1330_v28  ;;  %v1338_v54 = vperm.slane %v1320_v50, %v1330_v28  ;;  %v1783_v28 = vld [vmem:[#allocation9 + $0x18] sm:$0xff] }
 0x3bd   :  { %1584 = vmatpush.bf16.msra.mxu0 %v1783_v28 }
 0x3be   :  { %v1350_v56 = vsel %vm1349_vm5, %v1337_v53, %v1348_v55 }
 0x3bf   :  { %v1352_v57 = vsel %vm1351_vm6, %v1338_v54, %v1350_v56 }
 0x3c0   :  { %v1354_v58 = vsel %vm1280_vm7, %v1352_v57, -1e+30 }
 0x3c1   :  { %v1356_v59 = vsel %vm1355_vm8, %v1354_v58, -inf  ;;  %1585 = vmatpush.bf16.msra.mxu0 %v1782_v31 }
 0x3c2   :  { %1357 = vmax.xlane.f32.xlu2 %v1356_v59 }
 0x3c5   :  { %1586 = vmatpush.bf16.msra.mxu0 %v1781_v34 }
 0x3c9   :  { %1587 = vmatpush.bf16.msra.mxu0 %v1780_v41 }
 0x435   :  { %v1358_v60 = vpop.xlane.xlu2 %1357 }
 0x436   :  { %v1359_v61 = vsub.f32 %v1354_v58, %v1358_v60 }
 0x438   :  { %v1360_v62 = vmul.f32 1.442695, %v1359_v61 }
 0x43a   :  { %1862 = vpow2.f32 %v1360_v62 }
 0x440   :  { %v1863_v63 = vpop.eup %1862 }
 0x441   :  { %v1362_v3 = vsel %vm1355_vm8, %v1863_v63, 0.0 }
 0x442   :  { %1363 = vadd.xlane.f32.xlu0 %v1362_v3 }
 0x4b5   :  { %v1364_v5 = vpop.xlane.xlu0 %1363 }
 0x4b6   :  { %1864 = vrcp.f32 %v1364_v5 }
 0x4bc   :  { %v1865_v8 = vpop.eup %1864 }
 0x4bd   :  { %v1366_v9 = vmul.f32 %v1865_v8, %v1863_v63 }
 0x4bf   :  { %v1381_v10 = vperm.slane %v1366_v9, 2  ;;  %v1374_v12 = vperm.slane %v1366_v9, 1  ;;  %v1367_v13 = vperm.slane %v1366_v9, 0  ;;  %v1388_v14 = vperm.slane %v1366_v9, 3 }
 0x4c0   :  { %v1395_v15 = vperm.slane %v1366_v9, 4  ;;  %v1402_v16 = vperm.slane %v1366_v9, 5  ;;  %v1409_v17 = vperm.slane %v1366_v9, 6  ;;  %v1416_v20 = vperm.slane %v1366_v9, 7 }
 0x4c1   :  { %1386 = vperm.xlu0 %1860, %v1381_v10   ;;  %1379 = vperm.xlu2 %1859, %v1374_v12  }
 0x4c2   :  { %1372 = vperm.xlu1 %1858, %v1367_v13  }
 0x4c9   :  { %1393 = vperm.xlu2 %1859, %v1388_v14  }
 0x4ca   :  { %1400 = vperm.xlu1 %1858, %v1395_v15  }
 0x4d1   :  { %1407 = vperm.xlu2 %1859, %v1402_v16  }
 0x4d2   :  { %1414 = vperm.xlu1 %1858, %v1409_v17  }
 0x4d9   :  { %1421 = vperm.xlu2 %1859, %v1416_v20  }
 0x51b   :  { %v1380_v22 = vpop.permute.xlu2 %1379 }
 0x51c   :  { %v1424_v27 = vmul.f32 %v1380_v22, %v4278_v6 }
 0x51e   :  { %v1437_v30 = vrot.slane %v1424_v27, 4 }
 0x520   :  { %v1438_v33 = vadd.f32 %v1437_v30, %v1424_v27 }
 0x522   :  { %v1439_v42 = vrot.slane %v1438_v33, 2 }
 0x523   :  { %v1394_v25 = vpop.permute.xlu2 %1393 }
 0x524   :  { %v1426_v32 = vmul.f32 %v1394_v25, %v4280_v7  ;;  %v1440_v49 = vadd.f32 %v1439_v42, %v1438_v33 }
 0x526   :  { %v1449_v37 = vrot.slane %v1426_v32, 4  ;;  %v1441_v56 = vrot.slane %v1440_v49, 1 }
 0x528   :  { %v1450_v45 = vadd.f32 %v1449_v37, %v1426_v32  ;;  %v1442_v3 = vadd.f32 %v1441_v56, %v1440_v49 }
 0x52a   :  { %v1480_v15 = vpack.c.bf16 %v1442_v3, %v1442_v3 }
 0x52b   :  { %v1408_v29 = vpop.permute.xlu2 %1407 }
 0x52c   :  { %v1428_v38 = vmul.f32 %v1408_v29, %v4285_v11  ;;  %v1516_v27 = vunpack.c.l.b16 %v1480_v15 }
 0x52e   :  { %v1461_v46 = vrot.slane %v1428_v38, 4 }
 0x530   :  { %v1462_v52 = vadd.f32 %v1461_v46, %v1428_v38 }
 0x532   :  { %v1463_v61 = vrot.slane %v1462_v52, 2 }
 0x533   :  { %v1387_v35 = vpop.permute.xlu0 %1386  ;;  %v1422_v36 = vpop.permute.xlu2 %1421 }
 0x534   :  { %v1425_v39 = vmul.f32 %v1387_v35, %v4271_v1  ;;  %v1373_v40 = vpop.permute.xlu1 %1372  ;;  %v1430_v44 = vmul.f32 %v1422_v36, %v4295_v19  ;;  %v1451_v1 = vrot.slane %v1450_v45, 2  ;;  %v1464_v10 = vadd.f32 %v1463_v61, %v1462_v52 }
 0x535   :  { %v1423_v6 = vmul.f32 %v1373_v40, %v4269_v0 }
 0x536   :  { %v1443_v43 = vrot.slane %v1425_v39, 4  ;;  %v1473_v11 = vrot.slane %v1430_v44, 4  ;;  %v1452_v60 = vadd.f32 %v1451_v1, %v1450_v45  ;;  %v1465_v23 = vrot.slane %v1464_v10, 1 }
 0x537   :  { %v1431_v7 = vrot.slane %v1423_v6, 4 }
 0x538   :  { %v1444_v47 = vadd.f32 %v1443_v43, %v1425_v39  ;;  %v1474_v57 = vadd.f32 %v1473_v11, %v1430_v44  ;;  %v1453_v9 = vrot.slane %v1452_v60, 1  ;;  %v1466_v33 = vadd.f32 %v1465_v23, %v1464_v10  ;;  %v1861_v11 = vld [vmem:[%s4333_s4] ss:$0 sm:$0xff] }
 0x539   :  { %v1432_v48 = vadd.f32 %v1431_v7, %v1423_v6 }
 0x53a   :  { %v1445_v50 = vrot.slane %v1444_v47, 2  ;;  %v1475_v4 = vrot.slane %v1474_v57, 2  ;;  %v1454_v22 = vadd.f32 %v1453_v9, %v1452_v60  ;;  %v1484_v40 = vpack.c.bf16 %v1466_v33, %v1466_v33 }
 0x53b   :  { %v1433_v51 = vrot.slane %v1432_v48, 2 }
 0x53c   :  { %v1446_v53 = vadd.f32 %v1445_v50, %v1444_v47  ;;  %v1401_v54 = vpop.permute.xlu1 %1400  ;;  %v1476_v16 = vadd.f32 %v1475_v4, %v1474_v57  ;;  %v1482_v32 = vpack.c.bf16 %v1454_v22, %v1454_v22  ;;  %v1520_v7 = vunpack.c.l.b16 %v1484_v40 }
 0x53d   :  { %v1434_v0 = vadd.f32 %v1433_v51, %v1432_v48  ;;  %v1427_v55 = vmul.f32 %v1401_v54, %v4273_v2 }
 0x53e   :  { %v1447_v19 = vrot.slane %v1446_v53, 1  ;;  %v1477_v28 = vrot.slane %v1476_v16, 1  ;;  %v1518_v39 = vunpack.c.l.b16 %v1482_v32 }
 0x53f   :  { %v1435_v58 = vrot.slane %v1434_v0, 1  ;;  %v1455_v59 = vrot.slane %v1427_v55, 4 }
 0x540   :  { %v1448_v5 = vadd.f32 %v1447_v19, %v1446_v53  ;;  %v1478_v35 = vadd.f32 %v1477_v28, %v1476_v16 }
 0x541   :  { %v1436_v62 = vadd.f32 %v1435_v58, %v1434_v0  ;;  %v1456_v63 = vadd.f32 %v1455_v59, %v1427_v55 }
 0x542   :  { %v1481_v17 = vpack.c.bf16 %v1448_v5, %v1448_v5  ;;  %v1486_v41 = vpack.c.bf16 %v1478_v35, %v1478_v35 }
 0x543   :  { %v1457_v8 = vrot.slane %v1456_v63, 2  ;;  %v1479_v12 = vpack.c.bf16 %v1436_v62, %v1436_v62 }
 0x544   :  { %v1415_v13 = vpop.permute.xlu1 %1414  ;;  %v1517_v29 = vunpack.c.l.b16 %v1481_v17  ;;  %v1522_v46 = vunpack.c.l.b16 %v1486_v41 }
 0x545   :  { %v1458_v14 = vadd.f32 %v1457_v8, %v1456_v63  ;;  %v1429_v2 = vmul.f32 %v1415_v13, %v4293_v18  ;;  %v1515_v24 = vunpack.c.l.b16 %v1479_v12 }
 0x547   :  { %v1459_v20 = vrot.slane %v1458_v14, 1  ;;  %v1467_v21 = vrot.slane %v1429_v2, 4  ;;  %v1523_v34 = vsel %vm1339_vm0, %v1516_v27, %v1515_v24 }
 0x548   :  { %v1524_v38 = vsel %vm1341_vm1, %v1517_v29, %v1523_v34 }
 0x549   :  { %v1460_v25 = vadd.f32 %v1459_v20, %v1458_v14  ;;  %v1468_v26 = vadd.f32 %v1467_v21, %v1429_v2  ;;  %v1525_v42 = vsel %vm1343_vm2, %v1518_v39, %v1524_v38 }
 0x54b   :  { %v1483_v30 = vpack.c.bf16 %v1460_v25, %v1460_v25  ;;  %v1469_v31 = vrot.slane %v1468_v26, 2 }
 0x54d   :  { %v1470_v18 = vadd.f32 %v1469_v31, %v1468_v26  ;;  %v1519_v36 = vunpack.c.l.b16 %v1483_v30 }
 0x54f   :  { %v1471_v37 = vrot.slane %v1470_v18, 1  ;;  %v1526_v44 = vsel %vm1345_vm3, %v1519_v36, %v1525_v42 }
 0x550   :  { %v1527_v47 = vsel %vm1347_vm4, %v1520_v7, %v1526_v44 }
 0x551   :  { %v1472_v6 = vadd.f32 %v1471_v37, %v1470_v18 }
 0x553   :  { %v1485_v43 = vpack.c.bf16 %v1472_v6, %v1472_v6 }
 0x555   :  { %v1521_v45 = vunpack.c.l.b16 %v1485_v43 }
 0x557   :  { %v1528_v48 = vsel %vm1349_vm5, %v1521_v45, %v1527_v47 }
 0x558   :  { %v1529_v49 = vsel %vm1351_vm6, %v1522_v46, %v1528_v48 }
 0x559   :  { %v1530_v50 = vpack.c.b16 %v1529_v49, %v1529_v49 }
 0x55b   :  { %1588 = vmatmul.bf16.vlgmr.msra.gmra.mxu0 %v1530_v50 }
 0x5d8   :  { %v1589_v51 = vpop.f32.mrf.mxu0 }
 0x5d9   :  { %v1590_v1 = vadd.f32 %v1861_v11, %v1589_v51 }
 0x5db   :  { %1866 = vtanh.f32 %v1590_v1 }
 0x5e0   :  { %v1591_v52 = vpop.f32.mrf.mxu0 }
 0x5e1   :  { %v1867_v53 = vpop.eup %1866 }
 0x5e2   :  { %v1594_v54 = vpack.c.bf16 %v1867_v53, %v1867_v53 }
 0x5e4   :  { %1595 = vst [vmem:[#allocation11] sm:$0xf] %v1594_v54 }
 0x5e5   :  { %1606 = dma.vmem_to_hbm [thread:$0]  %s1602_s12, 64, %s1604_s10, [#allocation8]  }
 0x5e6   :  { %3496 = dma.done.wait [#allocation8], 64  }
 0x5e7   :  { %3497 = vsyncadd [#allocation8], 4294967232 }
 0x5e8   :  { %1611 = vsyncpa [#allocation7], 1 }
 0x5e9   :  { %1612 = vsyncpa [#allocation10], 1 }
 0x5ea   :  { %1613 = vsyncpa [#allocation8], 1 }
 0x5eb   :  { %1614 = vsyncmov [#allocation3] }
 0x5ee   :  { %s1615_s4 = vpop.sfrf %1614 }
 0x5ef   :  { %p1779_p12 = scmp.ne.s32.totalorder %s1615_s4, 0 }
 0x5f1   :  { %1619 = shalt.err (%p1779_p12)  }

</bundles_post_ra>
